<compile_context>
chip_gen: v7x
topology: tpu7x:2x2x1
jax: 0.10.0
libtpu: 0.0.40
codegen_flags: <defaults>
</compile_context>

<pallas_src>
import jax
import jax.numpy as jnp
from jax.experimental import pallas as pl
from jax.experimental.pallas import tpu as pltpu

TP = 2048   # lane tile along P = (pixels * batch) for the conv kernels
TN = 256    # lane tile along batch for the fc kernel


# ---------------------------------------------------------------------------
# Pallas kernels
# ---------------------------------------------------------------------------
def convT_relu_pool_kernel(a_ref, w_ref, b_ref, o_ref):
    """a_ref: (4, K, TP) transposed im2col patches (leading dim = pool position)
       w_ref: (Cout, K)   b_ref: (Cout, 1) f32   o_ref: (Cout, TP) f32
       Computes maxpool2x2(relu(conv(x))) = max_i relu(W @ A^T[i] + b),
       lane-dense in the P (pixel*batch) axis."""
    w = w_ref[...]                      # loaded once, shared by the 4 matmuls
    b = b_ref[...]
    out = None
    for i in range(4):                  # static unroll over the 2x2 pool window
        z = jnp.dot(w, a_ref[i], preferred_element_type=jnp.float32) + b
        z = jnp.maximum(z, 0.0)                           # ReLU
        out = z if out is None else jnp.maximum(out, z)   # 2x2 max-pool
    o_ref[...] = out.astype(o_ref.dtype)


def fcT_relu_fc_relu_kernel(x_ref, w1_ref, b1_ref, w2_ref, b2_ref, o_ref):
    """Transposed fc block, batch on the lane axis.
       x_ref: (784, TN)  w1_ref: (75, 784)  w2_ref: (10, 75)  o_ref: (10, TN)."""
    h = jnp.dot(w1_ref[...], x_ref[...], preferred_element_type=jnp.float32) + b1_ref[...]
    h = jnp.maximum(h, 0.0)                               # ReLU after fc1
    # dropout(p=0.2) is identity at inference time (eval-mode semantics).
    # TODO(synk): train-mode dropout would need pltpu.prng_seed/prng_random_bits.
    y = jnp.dot(w2_ref[...], h.astype(w2_ref.dtype),
                preferred_element_type=jnp.float32) + b2_ref[...]
    o_ref[...] = jnp.maximum(y, 0.0)                      # ReLU after fc2


# ---------------------------------------------------------------------------
# pallas_call wrappers: P / batch tiled grids, "parallel" dimension semantics
# ---------------------------------------------------------------------------
def convT_relu_pool(a, w, b, *, tp=TP):
    _, K, P = a.shape                    # P already padded to a multiple of tp
    Cout = w.shape[0]
    return pl.pallas_call(
        convT_relu_pool_kernel,
        out_shape=jax.ShapeDtypeStruct((Cout, P), jnp.float32),
        grid=(P // tp,),
        in_specs=[
            pl.BlockSpec((4, K, tp), lambda j: (0, 0, j)),
            pl.BlockSpec((Cout, K), lambda j: (0, 0)),
            pl.BlockSpec((Cout, 1), lambda j: (0, 0)),
        ],
        out_specs=pl.BlockSpec((Cout, tp), lambda j: (0, j)),
        compiler_params=pltpu.CompilerParams(dimension_semantics=("parallel",)),
    )(a, w, b)


def fcT_block(x, w1, b1, w2, b2, *, tn=TN):
    D, Np = x.shape                      # Np already padded to a multiple of tn
    H1 = w1.shape[0]
    H2 = w2.shape[0]
    return pl.pallas_call(
        fcT_relu_fc_relu_kernel,
        out_shape=jax.ShapeDtypeStruct((H2, Np), jnp.float32),
        grid=(Np // tn,),
        in_specs=[
            pl.BlockSpec((D, tn), lambda j: (0, j)),
            pl.BlockSpec((H1, D), lambda j: (0, 0)),
            pl.BlockSpec((H1, 1), lambda j: (0, 0)),
            pl.BlockSpec((H2, H1), lambda j: (0, 0)),
            pl.BlockSpec((H2, 1), lambda j: (0, 0)),
        ],
        out_specs=pl.BlockSpec((H2, tn), lambda j: (0, j)),
        compiler_params=pltpu.CompilerParams(dimension_semantics=("parallel",)),
    )(x, w1, b1, w2, b2)


# ---------------------------------------------------------------------------
# Host-side glue: transposed, pool-grouped im2col + one-time weight prep
# ---------------------------------------------------------------------------
def _pad_last_to(a, mult):
    p = a.shape[-1]
    pp = ((p + mult - 1) // mult) * mult
    if pp == p:
        return a
    return jnp.pad(a, [(0, 0)] * (a.ndim - 1) + [(0, pp - p)])


def im2colT_pooled(x_nhwc):
    """x_nhwc: (N,H,W,Cin) -> A^T: (4, Cin*9, Ho*Wo*N) for 3x3 conv pad=1, pool 2x2.
       Row k = ci*9 + kh*3 + kw (matches torch conv_w.reshape(Cout,-1)).
       Column p = (a*Wo + b)*N + n  (pixel-major, batch-minor -> flatten is a reshape)."""
    N, H, W, Cin = x_nhwc.shape
    Ho, Wo = H // 2, W // 2
    xpad = jnp.pad(x_nhwc, ((0, 0), (1, 1), (1, 1), (0, 0)))
    cols = [xpad[:, kh:kh + H, kw:kw + W, :] for kh in range(3) for kw in range(3)]
    pat = jnp.stack(cols, axis=-1)                       # (N, H, W, Cin, 9)
    pat = pat.reshape(N, Ho, 2, Wo, 2, Cin, 9)           # split out pool offsets
    pat = pat.transpose(2, 4, 5, 6, 1, 3, 0)             # (dy, dx, Cin, 9, Ho, Wo, N)
    return pat.reshape(4, Cin * 9, Ho * Wo * N)


def init_params(key):
    ks = jax.random.split(key, 8)

    def u(k, shape, fan_in):
        bound = 1.0 / jnp.sqrt(float(fan_in))
        return jax.random.uniform(k, shape, jnp.float32, -bound, bound)

    return dict(
        conv1_w=u(ks[0], (8, 1, 3, 3), 1 * 9),        # Conv2d(1, 8, 3, padding=1)
        conv1_b=u(ks[1], (8,), 1 * 9),
        conv2_w=u(ks[2], (16, 8, 3, 3), 8 * 9),       # Conv2d(8, 16, 3, padding=1)
        conv2_b=u(ks[3], (16,), 8 * 9),
        fc1_w=u(ks[4], (75, 7 * 7 * 16), 7 * 7 * 16),  # Linear(784, 75)
        fc1_b=u(ks[5], (75,), 7 * 7 * 16),
        fc2_w=u(ks[6], (10, 75), 75),                 # Linear(75, 10)
        fc2_b=u(ks[7], (10,), 75),
    )


def prepare_params(params, dtype=jnp.float32):
    """One-time weight layout prep (no per-forward reshapes/transposes).
       Biases stay f32 (they add into the f32 MXU accumulators)."""
    return dict(
        conv1_w=params["conv1_w"].reshape(8, -1).astype(dtype),    # (8, 9)
        conv1_b=params["conv1_b"].reshape(-1, 1).astype(jnp.float32),
        conv2_w=params["conv2_w"].reshape(16, -1).astype(dtype),   # (16, 72)
        conv2_b=params["conv2_b"].reshape(-1, 1).astype(jnp.float32),
        fc1_w=params["fc1_w"].astype(dtype),                       # (75, 784) NCHW order
        fc1_b=params["fc1_b"].reshape(-1, 1).astype(jnp.float32),
        fc2_w=params["fc2_w"].astype(dtype),                       # (10, 75)
        fc2_b=params["fc2_b"].reshape(-1, 1).astype(jnp.float32),
    )


def net_forward(x_nchw, prep, *, compute_dtype=jnp.float32):
    N = x_nchw.shape[0]
    x = jnp.transpose(x_nchw, (0, 2, 3, 1)).astype(jnp.float32)      # NCHW -> NHWC

    # conv1 + relu + pool   (28x28x1 -> 14x14x8), output lane-dense as (8, P1)
    a1 = _pad_last_to(im2colT_pooled(x).astype(compute_dtype), TP)   # (4, 9, P1p)
    p1 = convT_relu_pool(a1, prep["conv1_w"], prep["conv1_b"])       # (8, P1p)
    p1 = p1[:, :196 * N].reshape(8, 14, 14, N).transpose(3, 1, 2, 0)  # (N,14,14,8)

    # conv2 + relu + pool   (14x14x8 -> 7x7x16), output lane-dense as (16, P2)
    a2 = _pad_last_to(im2colT_pooled(p1).astype(compute_dtype), TP)  # (4, 72, P2p)
    p2 = convT_relu_pool(a2, prep["conv2_w"], prep["conv2_b"])       # (16, P2p)

    # flatten in PyTorch NCHW order is a pure reshape in this layout:
    # p2[c, (a*7+b)*N + n]  ->  flat[c*49 + a*7 + b, n]
    flat = p2[:, :49 * N].reshape(784, N).astype(compute_dtype)
    flat = _pad_last_to(flat, TN)                                    # (784, Np)

    out = fcT_block(flat, prep["fc1_w"], prep["fc1_b"],
                    prep["fc2_w"], prep["fc2_b"])                    # (10, Np)
    return out[:, :N].T                                              # (N, 10)


# ---------------------------------------------------------------------------
# Pure-JAX reference for self-verification
# ---------------------------------------------------------------------------
def net_forward_ref(x_nchw, params):
    x = jnp.transpose(x_nchw, (0, 2, 3, 1))

    def conv(x, w, b):
        wt = jnp.transpose(w, (2, 3, 1, 0))  # OIHW -> HWIO
        y = jax.lax.conv_general_dilated(
            x, wt, (1, 1), "SAME", dimension_numbers=("NHWC", "HWIO", "NHWC"))
        return y + b.reshape(1, 1, 1, -1)

    def pool(x):
        N, H, W, C = x.shape
        return jnp.max(x.reshape(N, H // 2, 2, W // 2, 2, C), axis=(2, 4))

    h = pool(jax.nn.relu(conv(x, params["conv1_w"], params["conv1_b"])))
    h = pool(jax.nn.relu(conv(h, params["conv2_w"], params["conv2_b"])))
    flat = jnp.transpose(h, (0, 3, 1, 2)).reshape(x.shape[0], -1)
    h = jax.nn.relu(flat @ params["fc1_w"].T + params["fc1_b"])
    return jax.nn.relu(h @ params["fc2_w"].T + params["fc2_b"])


if __name__ == "__main__":
    key = jax.random.PRNGKey(0)
    kx, kp = jax.random.split(key)
    params = init_params(kp)
    x = jax.random.normal(kx, (2, 1, 28, 28), jnp.float32)   # NCHW, like PyTorch

    y_ref = net_forward_ref(x, params)

    # f32 path (bit-accurate check against the reference)
    prep32 = prepare_params(params, jnp.float32)
    y = jax.block_until_ready(jax.jit(net_forward)(x, prep32))
    assert y.shape == (2, 10), y.shape
    assert jnp.allclose(y, y_ref, atol=1e-4, rtol=1e-4), float(jnp.max(jnp.abs(y - y_ref)))

    # bf16 MXU-input path (f32 accumulation) -- v5e/v6e/v7x native MXU dtype
    prep16 = prepare_params(params, jnp.bfloat16)
    fwd16 = jax.jit(lambda xx, pp: net_forward(xx, pp, compute_dtype=jnp.bfloat16))
    y16 = jax.block_until_ready(fwd16(x, prep16))
    assert y16.shape == (2, 10), y16.shape
    assert jnp.allclose(y16, y_ref, atol=1e-1, rtol=1e-1), float(jnp.max(jnp.abs(y16 - y_ref)))

    print("KERNEL_OK")
</pallas_src>

<mosaic_0001>
module attributes {stable_mosaic.version = 11 : i64} {
  func.func @convT_relu_pool_kernel(%arg0: i32, %arg1: memref<4x9x2048xf32, #tpu.memory_space<vmem>>, %arg2: memref<8x9xf32, #tpu.memory_space<vmem>>, %arg3: memref<8x1xf32, #tpu.memory_space<vmem>>, %arg4: memref<8x2048xf32, #tpu.memory_space<vmem>>) attributes {dimension_semantics = [#tpu.dimension_semantics<parallel>], iteration_bounds = array<i64: 1>, scalar_prefetch = 0 : i64, scratch_operands = 0 : i64, tpu.core_type = #tpu.core_type<tc>, window_params = [{transform_indices = @transform_0, window_bounds = array<i64: 4, 9, 2048>}, {pipeline_mode = #tpu.pipeline_mode<synchronous>, transform_indices = @transform_1, window_bounds = array<i64: 8, 9>}, {pipeline_mode = #tpu.pipeline_mode<synchronous>, transform_indices = @transform_2, window_bounds = array<i64: 8, 1>}, {transform_indices = @transform_3, window_bounds = array<i64: 8, 2048>}]} {
    %c0 = arith.constant 0 : index
    %c0_0 = arith.constant 0 : index
    %0 = vector.load %arg2[%c0, %c0_0] : memref<8x9xf32, #tpu.memory_space<vmem>>, vector<8x9xf32>
    %c0_1 = arith.constant 0 : index
    %c0_2 = arith.constant 0 : index
    %1 = vector.load %arg3[%c0_1, %c0_2] : memref<8x1xf32, #tpu.memory_space<vmem>>, vector<8x1xf32>
    %c0_3 = arith.constant 0 : index
    %c0_4 = arith.constant 0 : index
    %c0_5 = arith.constant 0 : index
    %2 = vector.load %arg1[%c0_3, %c0_4, %c0_5] : memref<4x9x2048xf32, #tpu.memory_space<vmem>>, vector<1x9x2048xf32>
    %3 = vector.shape_cast %2 : vector<1x9x2048xf32> to vector<9x2048xf32>
    %cst = arith.constant dense<0.000000e+00> : vector<8x2048xf32>
    %4 = tpu.matmul %0, %3, %cst {dimension_numbers = #tpu.dot_dimension_numbers<[1], [0], [0], [1], [0, 0, 1, 1], [], []>} : vector<8x9xf32>, vector<9x2048xf32>, vector<8x2048xf32> -> vector<8x2048xf32>
    %5 = vector.broadcast %1 : vector<8x1xf32> to vector<8x2048xf32>
    %6 = arith.addf %4, %5 : vector<8x2048xf32>
    %cst_6 = arith.constant 0.000000e+00 : f32
    %7 = vector.broadcast %cst_6 : f32 to vector<8x2048xf32>
    %8 = arith.maximumf %6, %7 : vector<8x2048xf32>
    %c1 = arith.constant 1 : index
    %c0_7 = arith.constant 0 : index
    %c0_8 = arith.constant 0 : index
    %9 = vector.load %arg1[%c1, %c0_7, %c0_8] : memref<4x9x2048xf32, #tpu.memory_space<vmem>>, vector<1x9x2048xf32>
    %10 = vector.shape_cast %9 : vector<1x9x2048xf32> to vector<9x2048xf32>
    %cst_9 = arith.constant dense<0.000000e+00> : vector<8x2048xf32>
    %11 = tpu.matmul %0, %10, %cst_9 {dimension_numbers = #tpu.dot_dimension_numbers<[1], [0], [0], [1], [0, 0, 1, 1], [], []>} : vector<8x9xf32>, vector<9x2048xf32>, vector<8x2048xf32> -> vector<8x2048xf32>
    %12 = vector.broadcast %1 : vector<8x1xf32> to vector<8x2048xf32>
    %13 = arith.addf %11, %12 : vector<8x2048xf32>
    %cst_10 = arith.constant 0.000000e+00 : f32
    %14 = vector.broadcast %cst_10 : f32 to vector<8x2048xf32>
    %15 = arith.maximumf %13, %14 : vector<8x2048xf32>
    %16 = arith.maximumf %8, %15 : vector<8x2048xf32>
    %c2 = arith.constant 2 : index
    %c0_11 = arith.constant 0 : index
    %c0_12 = arith.constant 0 : index
    %17 = vector.load %arg1[%c2, %c0_11, %c0_12] : memref<4x9x2048xf32, #tpu.memory_space<vmem>>, vector<1x9x2048xf32>
    %18 = vector.shape_cast %17 : vector<1x9x2048xf32> to vector<9x2048xf32>
    %cst_13 = arith.constant dense<0.000000e+00> : vector<8x2048xf32>
    %19 = tpu.matmul %0, %18, %cst_13 {dimension_numbers = #tpu.dot_dimension_numbers<[1], [0], [0], [1], [0, 0, 1, 1], [], []>} : vector<8x9xf32>, vector<9x2048xf32>, vector<8x2048xf32> -> vector<8x2048xf32>
    %20 = vector.broadcast %1 : vector<8x1xf32> to vector<8x2048xf32>
    %21 = arith.addf %19, %20 : vector<8x2048xf32>
    %cst_14 = arith.constant 0.000000e+00 : f32
    %22 = vector.broadcast %cst_14 : f32 to vector<8x2048xf32>
    %23 = arith.maximumf %21, %22 : vector<8x2048xf32>
    %24 = arith.maximumf %16, %23 : vector<8x2048xf32>
    %c3 = arith.constant 3 : index
    %c0_15 = arith.constant 0 : index
    %c0_16 = arith.constant 0 : index
    %25 = vector.load %arg1[%c3, %c0_15, %c0_16] : memref<4x9x2048xf32, #tpu.memory_space<vmem>>, vector<1x9x2048xf32>
    %26 = vector.shape_cast %25 : vector<1x9x2048xf32> to vector<9x2048xf32>
    %cst_17 = arith.constant dense<0.000000e+00> : vector<8x2048xf32>
    %27 = tpu.matmul %0, %26, %cst_17 {dimension_numbers = #tpu.dot_dimension_numbers<[1], [0], [0], [1], [0, 0, 1, 1], [], []>} : vector<8x9xf32>, vector<9x2048xf32>, vector<8x2048xf32> -> vector<8x2048xf32>
    %28 = vector.broadcast %1 : vector<8x1xf32> to vector<8x2048xf32>
    %29 = arith.addf %27, %28 : vector<8x2048xf32>
    %cst_18 = arith.constant 0.000000e+00 : f32
    %30 = vector.broadcast %cst_18 : f32 to vector<8x2048xf32>
    %31 = arith.maximumf %29, %30 : vector<8x2048xf32>
    %32 = arith.maximumf %24, %31 : vector<8x2048xf32>
    %c0_19 = arith.constant 0 : index
    %c0_20 = arith.constant 0 : index
    %33 = vector.load %arg4[%c0_19, %c0_20] : memref<8x2048xf32, #tpu.memory_space<vmem>>, vector<8x2048xf32>
    tpu.vector_store %arg4[%c0_19, %c0_20], %32 {strides = array<i32>} : memref<8x2048xf32, #tpu.memory_space<vmem>>, vector<8x2048xf32>,
    return
  }
  func.func @transform_0(%arg0: i32) -> (i32, i32, i32) {
    %c0_i32 = arith.constant 0 : i32
    %c0_i32_0 = arith.constant 0 : i32
    %c0_i32_1 = arith.constant 0 : i32
    return %c0_i32, %c0_i32_0, %arg0 : i32, i32, i32
  }
  func.func @transform_1(%arg0: i32) -> (i32, i32) {
    %c0_i32 = arith.constant 0 : i32
    %c0_i32_0 = arith.constant 0 : i32
    %c0_i32_1 = arith.constant 0 : i32
    return %c0_i32, %c0_i32_0 : i32, i32
  }
  func.func @transform_2(%arg0: i32) -> (i32, i32) {
    %c0_i32 = arith.constant 0 : i32
    %c0_i32_0 = arith.constant 0 : i32
    %c0_i32_1 = arith.constant 0 : i32
    return %c0_i32, %c0_i32_0 : i32, i32
  }
  func.func @transform_3(%arg0: i32) -> (i32, i32) {
    %c0_i32 = arith.constant 0 : i32
    %c0_i32_0 = arith.constant 0 : i32
    return %c0_i32, %arg0 : i32, i32
  }
}

module attributes {stable_mosaic.version = 11 : i64} {
  func.func @convT_relu_pool_kernel(%arg0: i32, %arg1: memref<4x72x2048xf32, #tpu.memory_space<vmem>>, %arg2: memref<16x72xf32, #tpu.memory_space<vmem>>, %arg3: memref<16x1xf32, #tpu.memory_space<vmem>>, %arg4: memref<16x2048xf32, #tpu.memory_space<vmem>>) attributes {dimension_semantics = [#tpu.dimension_semantics<parallel>], iteration_bounds = array<i64: 1>, scalar_prefetch = 0 : i64, scratch_operands = 0 : i64, tpu.core_type = #tpu.core_type<tc>, window_params = [{transform_indices = @transform_0, window_bounds = array<i64: 4, 72, 2048>}, {pipeline_mode = #tpu.pipeline_mode<synchronous>, transform_indices = @transform_1, window_bounds = array<i64: 16, 72>}, {pipeline_mode = #tpu.pipeline_mode<synchronous>, transform_indices = @transform_2, window_bounds = array<i64: 16, 1>}, {transform_indices = @transform_3, window_bounds = array<i64: 16, 2048>}]} {
    %c0 = arith.constant 0 : index
    %c0_0 = arith.constant 0 : index
    %0 = vector.load %arg2[%c0, %c0_0] : memref<16x72xf32, #tpu.memory_space<vmem>>, vector<16x72xf32>
    %c0_1 = arith.constant 0 : index
    %c0_2 = arith.constant 0 : index
    %1 = vector.load %arg3[%c0_1, %c0_2] : memref<16x1xf32, #tpu.memory_space<vmem>>, vector<16x1xf32>
    %c0_3 = arith.constant 0 : index
    %c0_4 = arith.constant 0 : index
    %c0_5 = arith.constant 0 : index
    %2 = vector.load %arg1[%c0_3, %c0_4, %c0_5] : memref<4x72x2048xf32, #tpu.memory_space<vmem>>, vector<1x72x2048xf32>
    %3 = vector.shape_cast %2 : vector<1x72x2048xf32> to vector<72x2048xf32>
    %cst = arith.constant dense<0.000000e+00> : vector<16x2048xf32>
    %4 = tpu.matmul %0, %3, %cst {dimension_numbers = #tpu.dot_dimension_numbers<[1], [0], [0], [1], [0, 0, 1, 1], [], []>} : vector<16x72xf32>, vector<72x2048xf32>, vector<16x2048xf32> -> vector<16x2048xf32>
    %5 = vector.broadcast %1 : vector<16x1xf32> to vector<16x2048xf32>
    %6 = arith.addf %4, %5 : vector<16x2048xf32>
    %cst_6 = arith.constant 0.000000e+00 : f32
    %7 = vector.broadcast %cst_6 : f32 to vector<16x2048xf32>
    %8 = arith.maximumf %6, %7 : vector<16x2048xf32>
    %c1 = arith.constant 1 : index
    %c0_7 = arith.constant 0 : index
    %c0_8 = arith.constant 0 : index
    %9 = vector.load %arg1[%c1, %c0_7, %c0_8] : memref<4x72x2048xf32, #tpu.memory_space<vmem>>, vector<1x72x2048xf32>
    %10 = vector.shape_cast %9 : vector<1x72x2048xf32> to vector<72x2048xf32>
    %cst_9 = arith.constant dense<0.000000e+00> : vector<16x2048xf32>
    %11 = tpu.matmul %0, %10, %cst_9 {dimension_numbers = #tpu.dot_dimension_numbers<[1], [0], [0], [1], [0, 0, 1, 1], [], []>} : vector<16x72xf32>, vector<72x2048xf32>, vector<16x2048xf32> -> vector<16x2048xf32>
    %12 = vector.broadcast %1 : vector<16x1xf32> to vector<16x2048xf32>
    %13 = arith.addf %11, %12 : vector<16x2048xf32>
    %cst_10 = arith.constant 0.000000e+00 : f32
    %14 = vector.broadcast %cst_10 : f32 to vector<16x2048xf32>
    %15 = arith.maximumf %13, %14 : vector<16x2048xf32>
    %16 = arith.maximumf %8, %15 : vector<16x2048xf32>
    %c2 = arith.constant 2 : index
    %c0_11 = arith.constant 0 : index
    %c0_12 = arith.constant 0 : index
    %17 = vector.load %arg1[%c2, %c0_11, %c0_12] : memref<4x72x2048xf32, #tpu.memory_space<vmem>>, vector<1x72x2048xf32>
    %18 = vector.shape_cast %17 : vector<1x72x2048xf32> to vector<72x2048xf32>
    %cst_13 = arith.constant dense<0.000000e+00> : vector<16x2048xf32>
    %19 = tpu.matmul %0, %18, %cst_13 {dimension_numbers = #tpu.dot_dimension_numbers<[1], [0], [0], [1], [0, 0, 1, 1], [], []>} : vector<16x72xf32>, vector<72x2048xf32>, vector<16x2048xf32> -> vector<16x2048xf32>
    %20 = vector.broadcast %1 : vector<16x1xf32> to vector<16x2048xf32>
    %21 = arith.addf %19, %20 : vector<16x2048xf32>
    %cst_14 = arith.constant 0.000000e+00 : f32
    %22 = vector.broadcast %cst_14 : f32 to vector<16x2048xf32>
    %23 = arith.maximumf %21, %22 : vector<16x2048xf32>
    %24 = arith.maximumf %16, %23 : vector<16x2048xf32>
    %c3 = arith.constant 3 : index
    %c0_15 = arith.constant 0 : index
    %c0_16 = arith.constant 0 : index
    %25 = vector.load %arg1[%c3, %c0_15, %c0_16] : memref<4x72x2048xf32, #tpu.memory_space<vmem>>, vector<1x72x2048xf32>
    %26 = vector.shape_cast %25 : vector<1x72x2048xf32> to vector<72x2048xf32>
    %cst_17 = arith.constant dense<0.000000e+00> : vector<16x2048xf32>
    %27 = tpu.matmul %0, %26, %cst_17 {dimension_numbers = #tpu.dot_dimension_numbers<[1], [0], [0], [1], [0, 0, 1, 1], [], []>} : vector<16x72xf32>, vector<72x2048xf32>, vector<16x2048xf32> -> vector<16x2048xf32>
    %28 = vector.broadcast %1 : vector<16x1xf32> to vector<16x2048xf32>
    %29 = arith.addf %27, %28 : vector<16x2048xf32>
    %cst_18 = arith.constant 0.000000e+00 : f32
    %30 = vector.broadcast %cst_18 : f32 to vector<16x2048xf32>
    %31 = arith.maximumf %29, %30 : vector<16x2048xf32>
    %32 = arith.maximumf %24, %31 : vector<16x2048xf32>
    %c0_19 = arith.constant 0 : index
    %c0_20 = arith.constant 0 : index
    %33 = vector.load %arg4[%c0_19, %c0_20] : memref<16x2048xf32, #tpu.memory_space<vmem>>, vector<16x2048xf32>
    tpu.vector_store %arg4[%c0_19, %c0_20], %32 {strides = array<i32>} : memref<16x2048xf32, #tpu.memory_space<vmem>>, vector<16x2048xf32>,
    return
  }
  func.func @transform_0(%arg0: i32) -> (i32, i32, i32) {
    %c0_i32 = arith.constant 0 : i32
    %c0_i32_0 = arith.constant 0 : i32
    %c0_i32_1 = arith.constant 0 : i32
    return %c0_i32, %c0_i32_0, %arg0 : i32, i32, i32
  }
  func.func @transform_1(%arg0: i32) -> (i32, i32) {
    %c0_i32 = arith.constant 0 : i32
    %c0_i32_0 = arith.constant 0 : i32
    %c0_i32_1 = arith.constant 0 : i32
    return %c0_i32, %c0_i32_0 : i32, i32
  }
  func.func @transform_2(%arg0: i32) -> (i32, i32) {
    %c0_i32 = arith.constant 0 : i32
    %c0_i32_0 = arith.constant 0 : i32
    %c0_i32_1 = arith.constant 0 : i32
    return %c0_i32, %c0_i32_0 : i32, i32
  }
  func.func @transform_3(%arg0: i32) -> (i32, i32) {
    %c0_i32 = arith.constant 0 : i32
    %c0_i32_0 = arith.constant 0 : i32
    return %c0_i32, %arg0 : i32, i32
  }
}

module attributes {stable_mosaic.version = 11 : i64} {
  func.func @fcT_relu_fc_relu_kernel(%arg0: i32, %arg1: memref<784x256xf32, #tpu.memory_space<vmem>>, %arg2: memref<75x784xf32, #tpu.memory_space<vmem>>, %arg3: memref<75x1xf32, #tpu.memory_space<vmem>>, %arg4: memref<10x75xf32, #tpu.memory_space<vmem>>, %arg5: memref<10x1xf32, #tpu.memory_space<vmem>>, %arg6: memref<10x256xf32, #tpu.memory_space<vmem>>) attributes {dimension_semantics = [#tpu.dimension_semantics<parallel>], iteration_bounds = array<i64: 1>, scalar_prefetch = 0 : i64, scratch_operands = 0 : i64, tpu.core_type = #tpu.core_type<tc>, window_params = [{transform_indices = @transform_0, window_bounds = array<i64: 784, 256>}, {pipeline_mode = #tpu.pipeline_mode<synchronous>, transform_indices = @transform_1, window_bounds = array<i64: 75, 784>}, {pipeline_mode = #tpu.pipeline_mode<synchronous>, transform_indices = @transform_2, window_bounds = array<i64: 75, 1>}, {pipeline_mode = #tpu.pipeline_mode<synchronous>, transform_indices = @transform_3, window_bounds = array<i64: 10, 75>}, {pipeline_mode = #tpu.pipeline_mode<synchronous>, transform_indices = @transform_4, window_bounds = array<i64: 10, 1>}, {transform_indices = @transform_5, window_bounds = array<i64: 10, 256>}]} {
    %c0 = arith.constant 0 : index
    %c0_0 = arith.constant 0 : index
    %0 = vector.load %arg2[%c0, %c0_0] : memref<75x784xf32, #tpu.memory_space<vmem>>, vector<75x784xf32>
    %c0_1 = arith.constant 0 : index
    %c0_2 = arith.constant 0 : index
    %1 = vector.load %arg1[%c0_1, %c0_2] : memref<784x256xf32, #tpu.memory_space<vmem>>, vector<784x256xf32>
    %cst = arith.constant dense<0.000000e+00> : vector<75x256xf32>
    %2 = tpu.matmul %0, %1, %cst {dimension_numbers = #tpu.dot_dimension_numbers<[1], [0], [0], [1], [0, 0, 1, 1], [], []>} : vector<75x784xf32>, vector<784x256xf32>, vector<75x256xf32> -> vector<75x256xf32>
    %c0_3 = arith.constant 0 : index
    %c0_4 = arith.constant 0 : index
    %3 = vector.load %arg3[%c0_3, %c0_4] : memref<75x1xf32, #tpu.memory_space<vmem>>, vector<75x1xf32>
    %4 = vector.broadcast %3 : vector<75x1xf32> to vector<75x256xf32>
    %5 = arith.addf %2, %4 : vector<75x256xf32>
    %cst_5 = arith.constant 0.000000e+00 : f32
    %6 = vector.broadcast %cst_5 : f32 to vector<75x256xf32>
    %7 = arith.maximumf %5, %6 : vector<75x256xf32>
    %c0_6 = arith.constant 0 : index
    %c0_7 = arith.constant 0 : index
    %8 = vector.load %arg4[%c0_6, %c0_7] : memref<10x75xf32, #tpu.memory_space<vmem>>, vector<10x75xf32>
    %cst_8 = arith.constant dense<0.000000e+00> : vector<10x256xf32>
    %9 = tpu.matmul %8, %7, %cst_8 {dimension_numbers = #tpu.dot_dimension_numbers<[1], [0], [0], [1], [0, 0, 1, 1], [], []>} : vector<10x75xf32>, vector<75x256xf32>, vector<10x256xf32> -> vector<10x256xf32>
    %c0_9 = arith.constant 0 : index
    %c0_10 = arith.constant 0 : index
    %10 = vector.load %arg5[%c0_9, %c0_10] : memref<10x1xf32, #tpu.memory_space<vmem>>, vector<10x1xf32>
    %11 = vector.broadcast %10 : vector<10x1xf32> to vector<10x256xf32>
    %12 = arith.addf %9, %11 : vector<10x256xf32>
    %cst_11 = arith.constant 0.000000e+00 : f32
    %13 = vector.broadcast %cst_11 : f32 to vector<10x256xf32>
    %14 = arith.maximumf %12, %13 : vector<10x256xf32>
    %c0_12 = arith.constant 0 : index
    %c0_13 = arith.constant 0 : index
    %15 = vector.load %arg6[%c0_12, %c0_13] : memref<10x256xf32, #tpu.memory_space<vmem>>, vector<10x256xf32>
    tpu.vector_store %arg6[%c0_12, %c0_13], %14 {strides = array<i32>} : memref<10x256xf32, #tpu.memory_space<vmem>>, vector<10x256xf32>,
    return
  }
  func.func @transform_0(%arg0: i32) -> (i32, i32) {
    %c0_i32 = arith.constant 0 : i32
    %c0_i32_0 = arith.constant 0 : i32
    return %c0_i32, %arg0 : i32, i32
  }
  func.func @transform_1(%arg0: i32) -> (i32, i32) {
    %c0_i32 = arith.constant 0 : i32
    %c0_i32_0 = arith.constant 0 : i32
    %c0_i32_1 = arith.constant 0 : i32
    return %c0_i32, %c0_i32_0 : i32, i32
  }
  func.func @transform_2(%arg0: i32) -> (i32, i32) {
    %c0_i32 = arith.constant 0 : i32
    %c0_i32_0 = arith.constant 0 : i32
    %c0_i32_1 = arith.constant 0 : i32
    return %c0_i32, %c0_i32_0 : i32, i32
  }
  func.func @transform_3(%arg0: i32) -> (i32, i32) {
    %c0_i32 = arith.constant 0 : i32
    %c0_i32_0 = arith.constant 0 : i32
    %c0_i32_1 = arith.constant 0 : i32
    return %c0_i32, %c0_i32_0 : i32, i32
  }
  func.func @transform_4(%arg0: i32) -> (i32, i32) {
    %c0_i32 = arith.constant 0 : i32
    %c0_i32_0 = arith.constant 0 : i32
    %c0_i32_1 = arith.constant 0 : i32
    return %c0_i32, %c0_i32_0 : i32, i32
  }
  func.func @transform_5(%arg0: i32) -> (i32, i32) {
    %c0_i32 = arith.constant 0 : i32
    %c0_i32_0 = arith.constant 0 : i32
    return %c0_i32, %arg0 : i32, i32
  }
}

</mosaic_0001>

<bundles_post_ra>
// kernel: net_forward.3
= control target key start
LH: loop header
LB: loop body
LE: loop exit
PB: predicated region body
PF: predicated region fallthrough
CT: control target
= control target key end

     0   :  { %vm57_vm0 = vcmask 1040384   ;;  %vm3141_vm1 = vmmov 1   ;;  %v3142_v3 = vmov 0.0   ;;  %v3143_v8 = vmov 0   ;;  %s4006_s0 = inlined_call_operand.vmem [shape: f32[4,9,2048], index: 0, kind: input, shape index: {}]   ;;  %s4007_s1 = inlined_call_operand.vmem [shape: f32[8,9], index: 1, kind: input, shape index: {}]   ;;  %s4008_s2 = inlined_call_operand.vmem [shape: f32[8,1], index: 2, kind: input, shape index: {}]   ;;  %s4009_s3 = inlined_call_operand.vmem [shape: f32[8,2048], index: 3, kind: output, shape index: {}]  }
   0x1   :  { %v17_v0 = vld [vmem:[%s4006_s0 + $0x8] sm:$0xff]  ;;  %vm3170_vm2 = vmpackc.low %vm57_vm0, %vm3141_vm1  ;;  %170 = vmatprep.mubr.f32.mxu0 %v3142_v3  ;;  %241 = vmatprep.mubr.f32.mxu1 %v3142_v3  ;;  %v19_v5 = vld [vmem:[%s4006_s0 + $0x18] sm:$0xff]  ;;  %vm53_vm3 = vcmask 72704  }
   0x2   :  { %v33_v1 = vld [vmem:[%s4006_s0 + $0x88] sm:$0x1]  ;;  %v35_v6 = vld [vmem:[%s4006_s0 + $0x98] sm:$0x1]  ;;  %v16_v7 = vld [vmem:[%s4006_s0] sm:$0xff]  ;;  %3140 = vset.pattern.permute.xlu0 %v3143_v8 }
   0x3   :  { %v2945_v4 = vpack.c.bf16 %v33_v1, %v17_v0  ;;  %v2951_v9 = vpack.c.bf16 %v35_v6, %v19_v5  ;;  %v32_v10 = vld [vmem:[%s4006_s0 + $0x80] sm:$0x1]  ;;  %v18_v11 = vld [vmem:[%s4006_s0 + $0x10] sm:$0xff]  ;;  %v21_v16 = vld [vmem:[%s4006_s0 + $0x28] sm:$0xff] }
   0x4   :  { %v34_v12 = vld [vmem:[%s4006_s0 + $0x90] sm:$0x1]  ;;  %v2948_v13 = vpack.c.bf16 %v32_v10, %v16_v7  ;;  %v3199_v15 = vld [vmem:[%s4007_s1] sm:$0xff]  ;;  %v37_v17 = vld [vmem:[%s4006_s0 + $0xa8] sm:$0x1] }
   0x5   :  { %2947 = vmatprep.subr.msk.bf16.mxu0 %vm3170_vm2, %v2945_v4  ;;  %v2954_v14 = vpack.c.bf16 %v34_v12, %v18_v11  ;;  %2953 = vmatprep.subr.msk.bf16.mxu1 %vm3170_vm2, %v2951_v9  ;;  %v2957_v18 = vpack.c.bf16 %v37_v17, %v21_v16  ;;  %v23_v19 = vld [vmem:[%s4006_s0 + $0x38] sm:$0xff]  ;;  %v20_v21 = vld [vmem:[%s4006_s0 + $0x20] sm:$0xff]  ;;  %v22_v24 = vld [vmem:[%s4006_s0 + $0x30] sm:$0xff] }
   0x6   :  { %v39_v20 = vld [vmem:[%s4006_s0 + $0xb8] sm:$0x1]  ;;  %2950 = vmatpush1.bf16.msk.msra.mxu0 %vm3170_vm2, %v2948_v13  ;;  %v36_v23 = vld [vmem:[%s4006_s0 + $0xa0] sm:$0x1]  ;;  %v38_v25 = vld [vmem:[%s4006_s0 + $0xb0] sm:$0x1] }
   0x7   :  { %2956 = vmatpush1.bf16.msk.msra.mxu1 %vm3170_vm2, %v2954_v14  ;;  %v2963_v22 = vpack.c.bf16 %v39_v20, %v23_v19  ;;  %2959 = vmatprep.subr.msk.bf16.mxu0 %vm3170_vm2, %v2957_v18  ;;  %v2960_v26 = vpack.c.bf16 %v36_v23, %v20_v21  ;;  %v2966_v27 = vpack.c.bf16 %v38_v25, %v22_v24  ;;  %v25_v28 = vld [vmem:[%s4006_s0 + $0x48] sm:$0xff]  ;;  %v27_v30 = vld [vmem:[%s4006_s0 + $0x58] sm:$0xff]  ;;  %v24_v33 = vld [vmem:[%s4006_s0 + $0x40] sm:$0xff] }
   0x8   :  { %v41_v29 = vld [vmem:[%s4006_s0 + $0xc8] sm:$0x1]  ;;  %v43_v32 = vld [vmem:[%s4006_s0 + $0xd8] sm:$0x1]  ;;  %v40_v34 = vld [vmem:[%s4006_s0 + $0xc0] sm:$0x1] }
   0x9   :  { %2965 = vmatprep.subr.msk.bf16.mxu1 %vm3170_vm2, %v2963_v22  ;;  %v2969_v31 = vpack.c.bf16 %v41_v29, %v25_v28  ;;  %2755 = vmatmul.mubr.msk.f32.vlgmr.msra.gmra.mrb[0].mxu0 %vm53_vm3, %v3199_v15  ;;  %v2975_v35 = vpack.c.bf16 %v43_v32, %v27_v30  ;;  %v26_v36 = vld [vmem:[%s4006_s0 + $0x50] sm:$0xff]  ;;  %v29_v38 = vld [vmem:[%s4006_s0 + $0x68] sm:$0xff]  ;;  %v2972_v39 = vpack.c.bf16 %v40_v34, %v24_v33  ;;  %v31_v42 = vld [vmem:[%s4006_s0 + $0x78] sm:$0xff] }
   0xa   :  { %2758 = vmatmul.mubr.msk.f32.vlgmr.msra.gmra.mrb[0].mxu1 %vm53_vm3, %v3199_v15  ;;  %v42_v37 = vld [vmem:[%s4006_s0 + $0xd0] sm:$0x1]  ;;  %2962 = vmatpush1.bf16.msk.msra.mxu0 %vm3170_vm2, %v2960_v26  ;;  %v45_v41 = vld [vmem:[%s4006_s0 + $0xe8] sm:$0x1]  ;;  %v47_v43 = vld [vmem:[%s4006_s0 + $0xf8] sm:$0x1] }
   0xb   :  { %2968 = vmatpush1.bf16.msk.msra.mxu1 %vm3170_vm2, %v2966_v27  ;;  %v2978_v40 = vpack.c.bf16 %v42_v37, %v26_v36  ;;  %312 = vmatprep.mubr.f32.mxu0 %v3142_v3  ;;  %v28_v44 = vld [vmem:[%s4006_s0 + $0x60] sm:$0xff]  ;;  %v30_v46 = vld [vmem:[%s4006_s0 + $0x70] sm:$0xff]  ;;  %v2981_v47 = vpack.c.bf16 %v45_v41, %v29_v38  ;;  %v2987_v48 = vpack.c.bf16 %v47_v43, %v31_v42  ;;  %v2778_v50 = vld [vmem:[%s4006_s0 + $0x108] sm:$0xff] }
   0xc   :  { %383 = vmatprep.mubr.f32.mxu1 %v3142_v3  ;;  %v44_v45 = vld [vmem:[%s4006_s0 + $0xe0] sm:$0x1]  ;;  %2971 = vmatprep.subr.msk.bf16.mxu0 %vm3170_vm2, %v2969_v31  ;;  %v46_v49 = vld [vmem:[%s4006_s0 + $0xf0] sm:$0x1]  ;;  %v2794_v51 = vld [vmem:[%s4006_s0 + $0x188] sm:$0x1] }
   0xd   :  { %2977 = vmatprep.subr.msk.bf16.mxu1 %vm3170_vm2, %v2975_v35  ;;  %2761 = vmatmul.mubr.msk.f32.vlgmr.msra.gmra.mrb[2].mxu0 %vm53_vm3, %v3199_v15  ;;  %v2780_v52 = vld [vmem:[%s4006_s0 + $0x118] sm:$0xff]  ;;  %v2984_v54 = vpack.c.bf16 %v44_v45, %v28_v44  ;;  %v2990_v55 = vpack.c.bf16 %v46_v49, %v30_v46  ;;  %v2777_v56 = vld [vmem:[%s4006_s0 + $0x100] sm:$0xff]  ;;  %v2779_v58 = vld [vmem:[%s4006_s0 + $0x110] sm:$0xff]  ;;  %v2993_v60 = vpack.c.bf16 %v2794_v51, %v2778_v50 }
   0xe   :  { %2764 = vmatmul.mubr.msk.f32.vlgmr.msra.gmra.mrb[2].mxu1 %vm53_vm3, %v3199_v15  ;;  %v2796_v53 = vld [vmem:[%s4006_s0 + $0x198] sm:$0x1]  ;;  %2974 = vmatpush1.bf16.msk.msra.mxu0 %vm3170_vm2, %v2972_v39  ;;  %v2793_v57 = vld [vmem:[%s4006_s0 + $0x180] sm:$0x1]  ;;  %v2795_v59 = vld [vmem:[%s4006_s0 + $0x190] sm:$0x1] }
   0xf   :  { %2980 = vmatpush1.bf16.msk.msra.mxu1 %vm3170_vm2, %v2978_v40  ;;  %454 = vmatprep.mubr.f32.mxu0 %v3142_v3  ;;  %v2999_v61 = vpack.c.bf16 %v2796_v53, %v2780_v52  ;;  %v2782_v62 = vld [vmem:[%s4006_s0 + $0x128] sm:$0xff]  ;;  %v2784_v0 = vld [vmem:[%s4006_s0 + $0x138] sm:$0xff]  ;;  %v2996_v4 = vpack.c.bf16 %v2793_v57, %v2777_v56  ;;  %v3002_v5 = vpack.c.bf16 %v2795_v59, %v2779_v58  ;;  %v2781_v6 = vld [vmem:[%s4006_s0 + $0x120] sm:$0xff] }
  0x10   :  { %525 = vmatprep.mubr.f32.mxu1 %v3142_v3  ;;  %2983 = vmatprep.subr.msk.bf16.mxu0 %vm3170_vm2, %v2981_v47  ;;  %v2798_v63 = vld [vmem:[%s4006_s0 + $0x1a8] sm:$0x1]  ;;  %v2800_v1 = vld [vmem:[%s4006_s0 + $0x1b8] sm:$0x1]  ;;  %v2797_v7 = vld [vmem:[%s4006_s0 + $0x1a0] sm:$0x1] }
  0x11   :  { %2989 = vmatprep.subr.msk.bf16.mxu1 %vm3170_vm2, %v2987_v48  ;;  %2767 = vmatmul.mubr.msk.f32.vlgmr.msra.gmra.mrb[4].mxu0 %vm53_vm3, %v3199_v15  ;;  %v2783_v8 = vld [vmem:[%s4006_s0 + $0x130] sm:$0xff]  ;;  %v3005_v10 = vpack.c.bf16 %v2798_v63, %v2782_v62  ;;  %v3011_v11 = vpack.c.bf16 %v2800_v1, %v2784_v0  ;;  %v2786_v12 = vld [vmem:[%s4006_s0 + $0x148] sm:$0xff]  ;;  %v2788_v14 = vld [vmem:[%s4006_s0 + $0x158] sm:$0xff]  ;;  %v3008_v17 = vpack.c.bf16 %v2797_v7, %v2781_v6 }
  0x12   :  { %2770 = vmatmul.mubr.msk.f32.vlgmr.msra.gmra.mrb[4].mxu1 %vm53_vm3, %v3199_v15  ;;  %2986 = vmatpush1.bf16.msk.msra.mxu0 %vm3170_vm2, %v2984_v54  ;;  %v2799_v9 = vld [vmem:[%s4006_s0 + $0x1b0] sm:$0x1]  ;;  %v2802_v13 = vld [vmem:[%s4006_s0 + $0x1c8] sm:$0x1]  ;;  %v2804_v16 = vld [vmem:[%s4006_s0 + $0x1d8] sm:$0x1] }
  0x13   :  { %2992 = vmatpush1.bf16.msk.msra.mxu1 %vm3170_vm2, %v2990_v55  ;;  %596 = vmatprep.mubr.f32.mxu0 %v3142_v3  ;;  %v3014_v18 = vpack.c.bf16 %v2799_v9, %v2783_v8  ;;  %v2785_v19 = vld [vmem:[%s4006_s0 + $0x140] sm:$0xff]  ;;  %v2787_v21 = vld [vmem:[%s4006_s0 + $0x150] sm:$0xff]  ;;  %v3017_v23 = vpack.c.bf16 %v2802_v13, %v2786_v12  ;;  %v3023_v24 = vpack.c.bf16 %v2804_v16, %v2788_v14  ;;  %v2790_v25 = vld [vmem:[%s4006_s0 + $0x168] sm:$0xff] }
  0x14   :  { %667 = vmatprep.mubr.f32.mxu1 %v3142_v3  ;;  %2995 = vmatprep.subr.msk.bf16.mxu0 %vm3170_vm2, %v2993_v60  ;;  %v2801_v20 = vld [vmem:[%s4006_s0 + $0x1c0] sm:$0x1]  ;;  %v2803_v22 = vld [vmem:[%s4006_s0 + $0x1d0] sm:$0x1]  ;;  %v2806_v26 = vld [vmem:[%s4006_s0 + $0x1e8] sm:$0x1] }
  0x15   :  { %3001 = vmatprep.subr.msk.bf16.mxu1 %vm3170_vm2, %v2999_v61  ;;  %2773 = vmatmul.mubr.msk.f32.vlgmr.msra.gmra.mrb[6].mxu0 %vm53_vm3, %v3199_v15  ;;  %v2792_v27 = vld [vmem:[%s4006_s0 + $0x178] sm:$0xff]  ;;  %v3020_v29 = vpack.c.bf16 %v2801_v20, %v2785_v19  ;;  %v3026_v30 = vpack.c.bf16 %v2803_v22, %v2787_v21  ;;  %v2789_v31 = vld [vmem:[%s4006_s0 + $0x160] sm:$0xff]  ;;  %v2791_v33 = vld [vmem:[%s4006_s0 + $0x170] sm:$0xff]  ;;  %v3029_v35 = vpack.c.bf16 %v2806_v26, %v2790_v25 }
  0x16   :  { %2776 = vmatmul.mubr.msk.f32.vlgmr.msra.gmra.mrb[6].mxu1 %vm53_vm3, %v3199_v15  ;;  %2998 = vmatpush1.bf16.msk.msra.mxu0 %vm3170_vm2, %v2996_v4  ;;  %v2808_v28 = vld [vmem:[%s4006_s0 + $0x1f8] sm:$0x1]  ;;  %v2805_v32 = vld [vmem:[%s4006_s0 + $0x1e0] sm:$0x1]  ;;  %v2807_v34 = vld [vmem:[%s4006_s0 + $0x1f0] sm:$0x1] }
  0x17   :  { %3004 = vmatpush1.bf16.msk.msra.mxu1 %vm3170_vm2, %v3002_v5  ;;  %835 = vmatprep.mubr.f32.mxu0 %v3142_v3  ;;  %v3035_v36 = vpack.c.bf16 %v2808_v28, %v2792_v27  ;;  %v2834_v37 = vld [vmem:[%s4006_s0 + $0x208] sm:$0xff]  ;;  %v2836_v39 = vld [vmem:[%s4006_s0 + $0x218] sm:$0xff]  ;;  %v3032_v41 = vpack.c.bf16 %v2805_v32, %v2789_v31  ;;  %v3038_v42 = vpack.c.bf16 %v2807_v34, %v2791_v33  ;;  %v2833_v43 = vld [vmem:[%s4006_s0 + $0x200] sm:$0xff] }
  0x18   :  { %906 = vmatprep.mubr.f32.mxu1 %v3142_v3  ;;  %3007 = vmatprep.subr.msk.bf16.mxu0 %vm3170_vm2, %v3005_v10  ;;  %v2850_v38 = vld [vmem:[%s4006_s0 + $0x288] sm:$0x1]  ;;  %v2852_v40 = vld [vmem:[%s4006_s0 + $0x298] sm:$0x1]  ;;  %v2849_v44 = vld [vmem:[%s4006_s0 + $0x280] sm:$0x1] }
  0x19   :  { %3013 = vmatprep.subr.msk.bf16.mxu1 %vm3170_vm2, %v3011_v11  ;;  %2811 = vmatmul.mubr.msk.f32.vlgmr.msra.gmra.mrb[8].mxu0 %vm53_vm3, %v3199_v15  ;;  %v2835_v45 = vld [vmem:[%s4006_s0 + $0x210] sm:$0xff]  ;;  %v3041_v47 = vpack.c.bf16 %v2850_v38, %v2834_v37  ;;  %v3047_v48 = vpack.c.bf16 %v2852_v40, %v2836_v39  ;;  %v2838_v49 = vld [vmem:[%s4006_s0 + $0x228] sm:$0xff]  ;;  %v2840_v51 = vld [vmem:[%s4006_s0 + $0x238] sm:$0xff]  ;;  %v3044_v53 = vpack.c.bf16 %v2849_v44, %v2833_v43 }
  0x1a   :  { %2814 = vmatmul.mubr.msk.f32.vlgmr.msra.gmra.mrb[8].mxu1 %vm53_vm3, %v3199_v15  ;;  %3010 = vmatpush1.bf16.msk.msra.mxu0 %vm3170_vm2, %v3008_v17  ;;  %v2851_v46 = vld [vmem:[%s4006_s0 + $0x290] sm:$0x1]  ;;  %v2854_v50 = vld [vmem:[%s4006_s0 + $0x2a8] sm:$0x1]  ;;  %v2856_v52 = vld [vmem:[%s4006_s0 + $0x2b8] sm:$0x1] }
  0x1b   :  { %3016 = vmatpush1.bf16.msk.msra.mxu1 %vm3170_vm2, %v3014_v18  ;;  %977 = vmatprep.mubr.f32.mxu0 %v3142_v3  ;;  %v3050_v54 = vpack.c.bf16 %v2851_v46, %v2835_v45  ;;  %v2837_v55 = vld [vmem:[%s4006_s0 + $0x220] sm:$0xff]  ;;  %v2839_v57 = vld [vmem:[%s4006_s0 + $0x230] sm:$0xff]  ;;  %v3053_v59 = vpack.c.bf16 %v2854_v50, %v2838_v49  ;;  %v3059_v60 = vpack.c.bf16 %v2856_v52, %v2840_v51  ;;  %v2842_v61 = vld [vmem:[%s4006_s0 + $0x248] sm:$0xff] }
  0x1c   :  { %1048 = vmatprep.mubr.f32.mxu1 %v3142_v3  ;;  %3019 = vmatprep.subr.msk.bf16.mxu0 %vm3170_vm2, %v3017_v23  ;;  %v2853_v56 = vld [vmem:[%s4006_s0 + $0x2a0] sm:$0x1]  ;;  %v2855_v58 = vld [vmem:[%s4006_s0 + $0x2b0] sm:$0x1]  ;;  %v2858_v62 = vld [vmem:[%s4006_s0 + $0x2c8] sm:$0x1] }
  0x1d   :  { %3025 = vmatprep.subr.msk.bf16.mxu1 %vm3170_vm2, %v3023_v24  ;;  %2817 = vmatmul.mubr.msk.f32.vlgmr.msra.gmra.mrb[10].mxu0 %vm53_vm3, %v3199_v15  ;;  %v2844_v63 = vld [vmem:[%s4006_s0 + $0x258] sm:$0xff]  ;;  %v3056_v1 = vpack.c.bf16 %v2853_v56, %v2837_v55  ;;  %v3062_v4 = vpack.c.bf16 %v2855_v58, %v2839_v57  ;;  %v2841_v5 = vld [vmem:[%s4006_s0 + $0x240] sm:$0xff]  ;;  %v2843_v7 = vld [vmem:[%s4006_s0 + $0x250] sm:$0xff]  ;;  %v3065_v9 = vpack.c.bf16 %v2858_v62, %v2842_v61 }
  0x1e   :  { %2820 = vmatmul.mubr.msk.f32.vlgmr.msra.gmra.mrb[10].mxu1 %vm53_vm3, %v3199_v15  ;;  %3022 = vmatpush1.bf16.msk.msra.mxu0 %vm3170_vm2, %v3020_v29  ;;  %v2860_v0 = vld [vmem:[%s4006_s0 + $0x2d8] sm:$0x1]  ;;  %v2857_v6 = vld [vmem:[%s4006_s0 + $0x2c0] sm:$0x1]  ;;  %v2859_v8 = vld [vmem:[%s4006_s0 + $0x2d0] sm:$0x1] }
  0x1f   :  { %3028 = vmatpush1.bf16.msk.msra.mxu1 %vm3170_vm2, %v3026_v30  ;;  %1119 = vmatprep.mubr.f32.mxu0 %v3142_v3  ;;  %v3071_v10 = vpack.c.bf16 %v2860_v0, %v2844_v63  ;;  %v2846_v11 = vld [vmem:[%s4006_s0 + $0x268] sm:$0xff]  ;;  %v2848_v13 = vld [vmem:[%s4006_s0 + $0x278] sm:$0xff]  ;;  %v3068_v16 = vpack.c.bf16 %v2857_v6, %v2841_v5  ;;  %v3074_v17 = vpack.c.bf16 %v2859_v8, %v2843_v7  ;;  %v2845_v18 = vld [vmem:[%s4006_s0 + $0x260] sm:$0xff] }
  0x20   :  { %1190 = vmatprep.mubr.f32.mxu1 %v3142_v3  ;;  %3031 = vmatprep.subr.msk.bf16.mxu0 %vm3170_vm2, %v3029_v35  ;;  %v2862_v12 = vld [vmem:[%s4006_s0 + $0x2e8] sm:$0x1]  ;;  %v2864_v14 = vld [vmem:[%s4006_s0 + $0x2f8] sm:$0x1]  ;;  %v2861_v19 = vld [vmem:[%s4006_s0 + $0x2e0] sm:$0x1] }
  0x21   :  { %3037 = vmatprep.subr.msk.bf16.mxu1 %vm3170_vm2, %v3035_v36  ;;  %2823 = vmatmul.mubr.msk.f32.vlgmr.msra.gmra.mrb[12].mxu0 %vm53_vm3, %v3199_v15  ;;  %v2847_v20 = vld [vmem:[%s4006_s0 + $0x270] sm:$0xff]  ;;  %v3077_v22 = vpack.c.bf16 %v2862_v12, %v2846_v11  ;;  %v3083_v23 = vpack.c.bf16 %v2864_v14, %v2848_v13  ;;  %v2890_v24 = vld [vmem:[%s4006_s0 + $0x308] sm:$0xff]  ;;  %v2892_v26 = vld [vmem:[%s4006_s0 + $0x318] sm:$0xff]  ;;  %v3080_v28 = vpack.c.bf16 %v2861_v19, %v2845_v18 }
  0x22   :  { %2826 = vmatmul.mubr.msk.f32.vlgmr.msra.gmra.mrb[12].mxu1 %vm53_vm3, %v3199_v15  ;;  %3034 = vmatpush1.bf16.msk.msra.mxu0 %vm3170_vm2, %v3032_v41  ;;  %v2863_v21 = vld [vmem:[%s4006_s0 + $0x2f0] sm:$0x1]  ;;  %v2906_v25 = vld [vmem:[%s4006_s0 + $0x388] sm:$0x1]  ;;  %v2908_v27 = vld [vmem:[%s4006_s0 + $0x398] sm:$0x1] }
  0x23   :  { %3040 = vmatpush1.bf16.msk.msra.mxu1 %vm3170_vm2, %v3038_v42  ;;  %1261 = vmatprep.mubr.f32.mxu0 %v3142_v3  ;;  %v3086_v29 = vpack.c.bf16 %v2863_v21, %v2847_v20  ;;  %v2889_v30 = vld [vmem:[%s4006_s0 + $0x300] sm:$0xff]  ;;  %v2891_v32 = vld [vmem:[%s4006_s0 + $0x310] sm:$0xff]  ;;  %v3089_v34 = vpack.c.bf16 %v2906_v25, %v2890_v24  ;;  %v3095_v35 = vpack.c.bf16 %v2908_v27, %v2892_v26  ;;  %v2894_v36 = vld [vmem:[%s4006_s0 + $0x328] sm:$0xff] }
  0x24   :  { %1332 = vmatprep.mubr.f32.mxu1 %v3142_v3  ;;  %3043 = vmatprep.subr.msk.bf16.mxu0 %vm3170_vm2, %v3041_v47  ;;  %v2905_v31 = vld [vmem:[%s4006_s0 + $0x380] sm:$0x1]  ;;  %v2907_v33 = vld [vmem:[%s4006_s0 + $0x390] sm:$0x1]  ;;  %v2910_v37 = vld [vmem:[%s4006_s0 + $0x3a8] sm:$0x1] }
  0x25   :  { %3049 = vmatprep.subr.msk.bf16.mxu1 %vm3170_vm2, %v3047_v48  ;;  %2829 = vmatmul.mubr.msk.f32.vlgmr.msra.gmra.mrb[14].mxu0 %vm53_vm3, %v3199_v15  ;;  %v2896_v38 = vld [vmem:[%s4006_s0 + $0x338] sm:$0xff]  ;;  %v3092_v40 = vpack.c.bf16 %v2905_v31, %v2889_v30  ;;  %v3098_v41 = vpack.c.bf16 %v2907_v33, %v2891_v32  ;;  %v2893_v42 = vld [vmem:[%s4006_s0 + $0x320] sm:$0xff]  ;;  %v2895_v44 = vld [vmem:[%s4006_s0 + $0x330] sm:$0xff]  ;;  %v3101_v46 = vpack.c.bf16 %v2910_v37, %v2894_v36 }
  0x26   :  { %2832 = vmatmul.mubr.msk.f32.vlgmr.msra.gmra.mrb[14].mxu1 %vm53_vm3, %v3199_v15  ;;  %3046 = vmatpush1.bf16.msk.msra.mxu0 %vm3170_vm2, %v3044_v53  ;;  %v2912_v39 = vld [vmem:[%s4006_s0 + $0x3b8] sm:$0x1]  ;;  %v2909_v43 = vld [vmem:[%s4006_s0 + $0x3a0] sm:$0x1]  ;;  %v2911_v45 = vld [vmem:[%s4006_s0 + $0x3b0] sm:$0x1] }
  0x27   :  { %3052 = vmatpush1.bf16.msk.msra.mxu1 %vm3170_vm2, %v3050_v54  ;;  %1516 = vmatprep.mubr.f32.mxu0 %v3142_v3  ;;  %v3107_v47 = vpack.c.bf16 %v2912_v39, %v2896_v38  ;;  %v2898_v48 = vld [vmem:[%s4006_s0 + $0x348] sm:$0xff]  ;;  %v2900_v50 = vld [vmem:[%s4006_s0 + $0x358] sm:$0xff]  ;;  %v3104_v52 = vpack.c.bf16 %v2909_v43, %v2893_v42  ;;  %v3110_v53 = vpack.c.bf16 %v2911_v45, %v2895_v44  ;;  %v2897_v54 = vld [vmem:[%s4006_s0 + $0x340] sm:$0xff] }
  0x28   :  { %1587 = vmatprep.mubr.f32.mxu1 %v3142_v3  ;;  %3055 = vmatprep.subr.msk.bf16.mxu0 %vm3170_vm2, %v3053_v59  ;;  %v2914_v49 = vld [vmem:[%s4006_s0 + $0x3c8] sm:$0x1]  ;;  %v2916_v51 = vld [vmem:[%s4006_s0 + $0x3d8] sm:$0x1]  ;;  %v2913_v55 = vld [vmem:[%s4006_s0 + $0x3c0] sm:$0x1] }
  0x29   :  { %3061 = vmatprep.subr.msk.bf16.mxu1 %vm3170_vm2, %v3059_v60  ;;  %2867 = vmatmul.mubr.msk.f32.vlgmr.msra.gmra.mrb[16].mxu0 %vm53_vm3, %v3199_v15  ;;  %v2899_v56 = vld [vmem:[%s4006_s0 + $0x350] sm:$0xff]  ;;  %v3113_v58 = vpack.c.bf16 %v2914_v49, %v2898_v48  ;;  %v3119_v59 = vpack.c.bf16 %v2916_v51, %v2900_v50  ;;  %v2902_v60 = vld [vmem:[%s4006_s0 + $0x368] sm:$0xff]  ;;  %v2904_v62 = vld [vmem:[%s4006_s0 + $0x378] sm:$0xff]  ;;  %v3116_v0 = vpack.c.bf16 %v2913_v55, %v2897_v54 }
  0x2a   :  { %2870 = vmatmul.mubr.msk.f32.vlgmr.msra.gmra.mrb[16].mxu1 %vm53_vm3, %v3199_v15  ;;  %3058 = vmatpush1.bf16.msk.msra.mxu0 %vm3170_vm2, %v3056_v1  ;;  %v2915_v57 = vld [vmem:[%s4006_s0 + $0x3d0] sm:$0x1]  ;;  %v2918_v61 = vld [vmem:[%s4006_s0 + $0x3e8] sm:$0x1]  ;;  %v2920_v63 = vld [vmem:[%s4006_s0 + $0x3f8] sm:$0x1] }
  0x2b   :  { %3064 = vmatpush1.bf16.msk.msra.mxu1 %vm3170_vm2, %v3062_v4  ;;  %1658 = vmatprep.mubr.f32.mxu0 %v3142_v3  ;;  %v3122_v1 = vpack.c.bf16 %v2915_v57, %v2899_v56  ;;  %v2901_v4 = vld [vmem:[%s4006_s0 + $0x360] sm:$0xff]  ;;  %v2903_v6 = vld [vmem:[%s4006_s0 + $0x370] sm:$0xff]  ;;  %v3125_v8 = vpack.c.bf16 %v2918_v61, %v2902_v60 }
  0x2c   :  { %1729 = vmatprep.mubr.f32.mxu1 %v3142_v3  ;;  %3067 = vmatprep.subr.msk.bf16.mxu0 %vm3170_vm2, %v3065_v9  ;;  %v2917_v5 = vld [vmem:[%s4006_s0 + $0x3e0] sm:$0x1]  ;;  %v2919_v7 = vld [vmem:[%s4006_s0 + $0x3f0] sm:$0x1]  ;;  %v3131_v9 = vpack.c.bf16 %v2920_v63, %v2904_v62 }
  0x2d   :  { %3073 = vmatprep.subr.msk.bf16.mxu1 %vm3170_vm2, %v3071_v10  ;;  %2873 = vmatmul.mubr.msk.f32.vlgmr.msra.gmra.mrb[18].mxu0 %vm53_vm3, %v3199_v15  ;;  %v3128_v10 = vpack.c.bf16 %v2917_v5, %v2901_v4  ;;  %v3134_v11 = vpack.c.bf16 %v2919_v7, %v2903_v6  ;;  %v15_v12 = vld [vmem:[%s4008_s2] sm:$0xff] }
  0x2e   :  { %2876 = vmatmul.mubr.msk.f32.vlgmr.msra.gmra.mrb[18].mxu1 %vm53_vm3, %v3199_v15  ;;  %3070 = vmatpush1.bf16.msk.msra.mxu0 %vm3170_vm2, %v3068_v16 }
  0x2f   :  { %3076 = vmatpush1.bf16.msk.msra.mxu1 %vm3170_vm2, %v3074_v17  ;;  %1800 = vmatprep.mubr.f32.mxu0 %v3142_v3 }
  0x30   :  { %1871 = vmatprep.mubr.f32.mxu1 %v3142_v3  ;;  %3079 = vmatprep.subr.msk.bf16.mxu0 %vm3170_vm2, %v3077_v22 }
  0x31   :  { %3085 = vmatprep.subr.msk.bf16.mxu1 %vm3170_vm2, %v3083_v23  ;;  %2879 = vmatmul.mubr.msk.f32.vlgmr.msra.gmra.mrb[20].mxu0 %vm53_vm3, %v3199_v15 }
  0x32   :  { %2882 = vmatmul.mubr.msk.f32.vlgmr.msra.gmra.mrb[20].mxu1 %vm53_vm3, %v3199_v15  ;;  %3082 = vmatpush1.bf16.msk.msra.mxu0 %vm3170_vm2, %v3080_v28 }
  0x33   :  { %3088 = vmatpush1.bf16.msk.msra.mxu1 %vm3170_vm2, %v3086_v29  ;;  %1942 = vmatprep.mubr.f32.mxu0 %v3142_v3 }
  0x34   :  { %2013 = vmatprep.mubr.f32.mxu1 %v3142_v3  ;;  %3091 = vmatprep.subr.msk.bf16.mxu0 %vm3170_vm2, %v3089_v34 }
  0x35   :  { %3097 = vmatprep.subr.msk.bf16.mxu1 %vm3170_vm2, %v3095_v35  ;;  %2885 = vmatmul.mubr.msk.f32.vlgmr.msra.gmra.mrb[22].mxu0 %vm53_vm3, %v3199_v15 }
  0x36   :  { %2888 = vmatmul.mubr.msk.f32.vlgmr.msra.gmra.mrb[22].mxu1 %vm53_vm3, %v3199_v15  ;;  %3094 = vmatpush1.bf16.msk.msra.mxu0 %vm3170_vm2, %v3092_v40 }
  0x37   :  { %3100 = vmatpush1.bf16.msk.msra.mxu1 %vm3170_vm2, %v3098_v41  ;;  %2197 = vmatprep.mubr.f32.mxu0 %v3142_v3 }
  0x38   :  { %2268 = vmatprep.mubr.f32.mxu1 %v3142_v3  ;;  %3103 = vmatprep.subr.msk.bf16.mxu0 %vm3170_vm2, %v3101_v46 }
  0x39   :  { %3109 = vmatprep.subr.msk.bf16.mxu1 %vm3170_vm2, %v3107_v47  ;;  %2923 = vmatmul.mubr.msk.f32.vlgmr.msra.gmra.mrb[24].mxu0 %vm53_vm3, %v3199_v15 }
  0x3a   :  { %2926 = vmatmul.mubr.msk.f32.vlgmr.msra.gmra.mrb[24].mxu1 %vm53_vm3, %v3199_v15  ;;  %3106 = vmatpush1.bf16.msk.msra.mxu0 %vm3170_vm2, %v3104_v52 }
  0x3b   :  { %3112 = vmatpush1.bf16.msk.msra.mxu1 %vm3170_vm2, %v3110_v53  ;;  %2339 = vmatprep.mubr.f32.mxu0 %v3142_v3 }
  0x3c   :  { %2410 = vmatprep.mubr.f32.mxu1 %v3142_v3  ;;  %3115 = vmatprep.subr.msk.bf16.mxu0 %vm3170_vm2, %v3113_v58 }
  0x3d   :  { %3121 = vmatprep.subr.msk.bf16.mxu1 %vm3170_vm2, %v3119_v59  ;;  %2929 = vmatmul.mubr.msk.f32.vlgmr.msra.gmra.mrb[26].mxu0 %vm53_vm3, %v3199_v15 }
  0x3e   :  { %2932 = vmatmul.mubr.msk.f32.vlgmr.msra.gmra.mrb[26].mxu1 %vm53_vm3, %v3199_v15  ;;  %3118 = vmatpush1.bf16.msk.msra.mxu0 %vm3170_vm2, %v3116_v0 }
  0x3f   :  { %3124 = vmatpush1.bf16.msk.msra.mxu1 %vm3170_vm2, %v3122_v1  ;;  %2481 = vmatprep.mubr.f32.mxu0 %v3142_v3 }
  0x40   :  { %2552 = vmatprep.mubr.f32.mxu1 %v3142_v3  ;;  %3127 = vmatprep.subr.msk.bf16.mxu0 %vm3170_vm2, %v3125_v8 }
  0x41   :  { %3133 = vmatprep.subr.msk.bf16.mxu1 %vm3170_vm2, %v3131_v9  ;;  %2935 = vmatmul.mubr.msk.f32.vlgmr.msra.gmra.mrb[28].mxu0 %vm53_vm3, %v3199_v15 }
  0x42   :  { %2938 = vmatmul.mubr.msk.f32.vlgmr.msra.gmra.mrb[28].mxu1 %vm53_vm3, %v3199_v15  ;;  %3130 = vmatpush1.bf16.msk.msra.mxu0 %vm3170_vm2, %v3128_v10 }
  0x43   :  { %3136 = vmatpush1.bf16.msk.msra.mxu1 %vm3170_vm2, %v3134_v11  ;;  %2623 = vmatprep.mubr.f32.mxu0 %v3142_v3 }
  0x44   :  { %2694 = vmatprep.mubr.f32.mxu1 %v3142_v3  ;;  %50 = vperm.xlu0 %3140, %v15_v12  }
  0x45   :  { %2941 = vmatmul.mubr.msk.f32.vlgmr.msra.gmra.mrb[30].mxu0 %vm53_vm3, %v3199_v15 }
  0x46   :  { %2944 = vmatmul.mubr.msk.f32.vlgmr.msra.gmra.mrb[30].mxu1 %vm53_vm3, %v3199_v15 }
  0xc3   :  { %v3784_v21 = vpop.permute.xlu0 %50 }
  0xdc   :  { %v172_v13 = vpop.f32.mrb[0].mxu0 }
  0xdd   :  { %v243_v14 = vpop.f32.mrb[0].mxu1  ;;  %v174_v16 = vpop.f32.mrb[1].mxu0  ;;  %v173_v28 = vadd.f32 %v172_v13, %v3784_v21 }
  0xde   :  { %v245_v17 = vpop.f32.mrb[1].mxu1  ;;  %v175_v25 = vadd.f32 %v174_v16, %v3784_v21  ;;  %v244_v29 = vadd.f32 %v243_v14, %v3784_v21 }
  0xdf   :  { %v246_v26 = vadd.f32 %v245_v17, %v3784_v21  ;;  %v674_v38 = vmax.f32 %v173_v28, 0.0 }
  0xe0   :  { %v314_v18 = vpop.f32.mrb[2].mxu0  ;;  %v675_v36 = vmax.f32 %v175_v25, 0.0  ;;  %v676_v40 = vmax.f32 %v244_v29, 0.0 }
  0xe1   :  { %v385_v19 = vpop.f32.mrb[2].mxu1  ;;  %v316_v20 = vpop.f32.mrb[3].mxu0  ;;  %v315_v30 = vadd.f32 %v314_v18, %v3784_v21  ;;  %v677_v37 = vmax.f32 %v246_v26, 0.0 }
  0xe2   :  { %v387_v2 = vpop.f32.mrb[3].mxu1  ;;  %v386_v31 = vadd.f32 %v385_v19, %v3784_v21  ;;  %v317_v34 = vadd.f32 %v316_v20, %v3784_v21 }
  0xe3   :  { %v388_v35 = vadd.f32 %v387_v2, %v3784_v21  ;;  %v678_v42 = vmax.f32 %v315_v30, 0.0 }
  0xe4   :  { %v456_v22 = vpop.f32.mrb[4].mxu0  ;;  %v680_v43 = vmax.f32 %v386_v31, 0.0  ;;  %v679_v48 = vmax.f32 %v317_v34, 0.0 }
  0xe5   :  { %v527_v23 = vpop.f32.mrb[4].mxu1  ;;  %v458_v3 = vpop.f32.mrb[5].mxu0  ;;  %v681_v49 = vmax.f32 %v388_v35, 0.0  ;;  %v457_v52 = vadd.f32 %v456_v22, %v3784_v21 }
  0xe6   :  { %v529_v24 = vpop.f32.mrb[5].mxu1  ;;  %v528_v53 = vadd.f32 %v527_v23, %v3784_v21  ;;  %v459_v56 = vadd.f32 %v458_v3, %v3784_v21 }
  0xe7   :  { %v530_v57 = vadd.f32 %v529_v24, %v3784_v21  ;;  %v682_v10 = vmax.f32 %v457_v52, 0.0 }
  0xe8   :  { %v3788_v27 = vpop.f32.mrb[6].mxu0  ;;  %v684_v11 = vmax.f32 %v528_v53, 0.0  ;;  %v683_v14 = vmax.f32 %v459_v56, 0.0 }
  0xe9   :  { %v3790_v15 = vpop.f32.mrb[6].mxu1  ;;  %v3796_v32 = vpop.f32.mrb[7].mxu0  ;;  %v685_v16 = vmax.f32 %v530_v57, 0.0  ;;  %v599_v31 = vadd.f32 %v3788_v27, %v3784_v21 }
  0xea   :  { %v3798_v33 = vpop.f32.mrb[7].mxu1  ;;  %v670_v34 = vadd.f32 %v3790_v15, %v3784_v21 }
  0xec   :  { %v837_v39 = vpop.f32.mrb[8].mxu0 }
  0xed   :  { %v908_v41 = vpop.f32.mrb[8].mxu1  ;;  %v838_v44 = vadd.f32 %v837_v39, %v3784_v21  ;;  %v839_v46 = vpop.f32.mrb[9].mxu0 }
  0xee   :  { %v909_v45 = vadd.f32 %v908_v41, %v3784_v21  ;;  %v910_v47 = vpop.f32.mrb[9].mxu1  ;;  %v840_v50 = vadd.f32 %v839_v46, %v3784_v21 }
  0xef   :  { %v911_v51 = vadd.f32 %v910_v47, %v3784_v21  ;;  %v1339_v54 = vmax.f32 %v838_v44, 0.0 }
  0xf0   :  { %v1341_v55 = vmax.f32 %v909_v45, 0.0  ;;  %v1340_v58 = vmax.f32 %v840_v50, 0.0  ;;  %v979_v60 = vpop.f32.mrb[10].mxu0  ;;  %v688_v50 = vmax.f32 %v670_v34, 0.0 }
  0xf1   :  { %v1342_v59 = vmax.f32 %v911_v51, 0.0  ;;  %v1050_v61 = vpop.f32.mrb[10].mxu1  ;;  %v3810_v62 = vmax.f32 %v674_v38, %v1339_v54  ;;  %v980_v0 = vadd.f32 %v979_v60, %v3784_v21  ;;  %v981_v4 = vpop.f32.mrb[11].mxu0  ;;  %v672_v38 = vadd.f32 %v3798_v33, %v3784_v21 }
  0xf2   :  { %v3812_v63 = vmax.f32 %v676_v40, %v1341_v55  ;;  %v1051_v1 = vadd.f32 %v1050_v61, %v3784_v21  ;;  %v1052_v5 = vpop.f32.mrb[11].mxu1  ;;  %v3816_v6 = vmax.f32 %v675_v36, %v1340_v58  ;;  %v982_v8 = vadd.f32 %v981_v4, %v3784_v21 }
  0xf3   :  { %v3818_v7 = vmax.f32 %v677_v37, %v1342_v59  ;;  %v1053_v9 = vadd.f32 %v1052_v5, %v3784_v21  ;;  %v1343_v12 = vmax.f32 %v980_v0, 0.0  ;;  %v601_v37 = vadd.f32 %v3796_v32, %v3784_v21 }
  0xf4   :  { %v1345_v13 = vmax.f32 %v1051_v1, 0.0  ;;  %v1344_v17 = vmax.f32 %v982_v8, 0.0  ;;  %v1121_v19 = vpop.f32.mrb[12].mxu0  ;;  %v689_v54 = vmax.f32 %v672_v38, 0.0 }
  0xf5   :  { %v1346_v18 = vmax.f32 %v1053_v9, 0.0  ;;  %v1192_v20 = vpop.f32.mrb[12].mxu1  ;;  %v3822_v2 = vmax.f32 %v678_v42, %v1343_v12  ;;  %v1122_v23 = vadd.f32 %v1121_v19, %v3784_v21  ;;  %v1123_v24 = vpop.f32.mrb[13].mxu0  ;;  %v687_v53 = vmax.f32 %v601_v37, 0.0 }
  0xf6   :  { %v3824_v22 = vmax.f32 %v680_v43, %v1345_v13  ;;  %v1193_v3 = vadd.f32 %v1192_v20, %v3784_v21  ;;  %v1194_v25 = vpop.f32.mrb[13].mxu1  ;;  %v3828_v26 = vmax.f32 %v679_v48, %v1344_v17  ;;  %v1124_v29 = vadd.f32 %v1123_v24, %v3784_v21 }
  0xf7   :  { %v3830_v28 = vmax.f32 %v681_v49, %v1346_v18  ;;  %v1195_v30 = vadd.f32 %v1194_v25, %v3784_v21  ;;  %v1347_v35 = vmax.f32 %v1122_v23, 0.0  ;;  %v686_v49 = vmax.f32 %v599_v31, 0.0 }
  0xf8   :  { %v1349_v36 = vmax.f32 %v1193_v3, 0.0  ;;  %v1348_v39 = vmax.f32 %v1124_v29, 0.0  ;;  %v1263_v41 = vpop.f32.mrb[14].mxu0 }
  0xf9   :  { %v1350_v40 = vmax.f32 %v1195_v30, 0.0  ;;  %v1334_v42 = vpop.f32.mrb[14].mxu1  ;;  %v3842_v43 = vmax.f32 %v682_v10, %v1347_v35  ;;  %v1264_v27 = vadd.f32 %v1263_v41, %v3784_v21  ;;  %v1265_v45 = vpop.f32.mrb[15].mxu0 }
  0xfa   :  { %v3844_v44 = vmax.f32 %v684_v11, %v1349_v36  ;;  %v1335_v15 = vadd.f32 %v1334_v42, %v3784_v21  ;;  %v1336_v46 = vpop.f32.mrb[15].mxu1  ;;  %v3848_v47 = vmax.f32 %v683_v14, %v1348_v39  ;;  %v1266_v33 = vadd.f32 %v1265_v45, %v3784_v21 }
  0xfb   :  { %v3850_v32 = vmax.f32 %v685_v16, %v1350_v40  ;;  %v1337_v48 = vadd.f32 %v1336_v46, %v3784_v21  ;;  %v1351_v51 = vmax.f32 %v1264_v27, 0.0 }
  0xfc   :  { %v1353_v52 = vmax.f32 %v1335_v15, 0.0  ;;  %v1352_v55 = vmax.f32 %v1266_v33, 0.0  ;;  %v1518_v57 = vpop.f32.mrb[16].mxu0 }
  0xfd   :  { %v1354_v56 = vmax.f32 %v1337_v48, 0.0  ;;  %v1589_v58 = vpop.f32.mrb[16].mxu1  ;;  %v3854_v59 = vmax.f32 %v686_v49, %v1351_v51  ;;  %v1519_v61 = vadd.f32 %v1518_v57, %v3784_v21  ;;  %v1520_v1 = vpop.f32.mrb[17].mxu0 }
  0xfe   :  { %v3856_v60 = vmax.f32 %v688_v50, %v1353_v52  ;;  %v1590_v0 = vadd.f32 %v1589_v58, %v3784_v21  ;;  %v1591_v4 = vpop.f32.mrb[17].mxu1  ;;  %v3860_v5 = vmax.f32 %v687_v53, %v1352_v55  ;;  %v1521_v9 = vadd.f32 %v1520_v1, %v3784_v21 }
  0xff   :  { %v3862_v8 = vmax.f32 %v689_v54, %v1354_v56  ;;  %v1592_v10 = vadd.f32 %v1591_v4, %v3784_v21  ;;  %v2020_v11 = vmax.f32 %v1519_v61, 0.0 }
 0x100   :  { %v2022_v12 = vmax.f32 %v1590_v0, 0.0  ;;  %v2021_v13 = vmax.f32 %v1521_v9, 0.0  ;;  %v1660_v16 = vpop.f32.mrb[18].mxu0 }
 0x101   :  { %v2023_v14 = vmax.f32 %v1592_v10, 0.0  ;;  %v1731_v17 = vpop.f32.mrb[18].mxu1  ;;  %v3867_v18 = vmax.f32 %v3810_v62, %v2020_v11  ;;  %v1661_v20 = vadd.f32 %v1660_v16, %v3784_v21  ;;  %v1662_v3 = vpop.f32.mrb[19].mxu0 }
 0x102   :  { %v3870_v19 = vmax.f32 %v3812_v63, %v2022_v12  ;;  %v1732_v23 = vadd.f32 %v1731_v17, %v3784_v21  ;;  %v1733_v24 = vpop.f32.mrb[19].mxu1  ;;  %v3875_v25 = vmax.f32 %v3816_v6, %v2021_v13  ;;  %v1663_v30 = vadd.f32 %v1662_v3, %v3784_v21 }
 0x103   :  { %v3878_v29 = vmax.f32 %v3818_v7, %v2023_v14  ;;  %v1734_v62 = vadd.f32 %v1733_v24, %v3784_v21  ;;  %v2024_v31 = vmax.f32 %v1661_v20, 0.0 }
 0x104   :  { %v2026_v34 = vmax.f32 %v1732_v23, 0.0  ;;  %v2025_v63 = vmax.f32 %v1663_v30, 0.0  ;;  %v1802_v36 = vpop.f32.mrb[20].mxu0 }
 0x105   :  { %v2027_v35 = vmax.f32 %v1734_v62, 0.0  ;;  %v1873_v37 = vpop.f32.mrb[20].mxu1  ;;  %v3883_v38 = vmax.f32 %v3822_v2, %v2024_v31  ;;  %v1803_v6 = vadd.f32 %v1802_v36, %v3784_v21  ;;  %v1804_v40 = vpop.f32.mrb[21].mxu0 }
 0x106   :  { %v3886_v39 = vmax.f32 %v3824_v22, %v2026_v34  ;;  %v1874_v7 = vadd.f32 %v1873_v37, %v3784_v21  ;;  %v1875_v41 = vpop.f32.mrb[21].mxu1  ;;  %v3891_v42 = vmax.f32 %v3828_v26, %v2025_v63  ;;  %v1805_v15 = vadd.f32 %v1804_v40, %v3784_v21 }
 0x107   :  { %v3894_v27 = vmax.f32 %v3830_v28, %v2027_v35  ;;  %v1876_v2 = vadd.f32 %v1875_v41, %v3784_v21  ;;  %v2028_v45 = vmax.f32 %v1803_v6, 0.0 }
 0x108   :  { %v2030_v46 = vmax.f32 %v1874_v7, 0.0  ;;  %v2029_v22 = vmax.f32 %v1805_v15, 0.0  ;;  %v1944_v48 = vpop.f32.mrb[22].mxu0 }
 0x109   :  { %v2031_v33 = vmax.f32 %v1876_v2, 0.0  ;;  %v2015_v49 = vpop.f32.mrb[22].mxu1  ;;  %v3899_v50 = vmax.f32 %v3842_v43, %v2028_v45  ;;  %v1945_v26 = vadd.f32 %v1944_v48, %v3784_v21  ;;  %v1946_v52 = vpop.f32.mrb[23].mxu0 }
 0x10a   :  { %v3902_v51 = vmax.f32 %v3844_v44, %v2030_v46  ;;  %v2016_v28 = vadd.f32 %v2015_v49, %v3784_v21  ;;  %v2017_v53 = vpop.f32.mrb[23].mxu1  ;;  %v3907_v54 = vmax.f32 %v3848_v47, %v2029_v22  ;;  %v1947_v56 = vadd.f32 %v1946_v52, %v3784_v21 }
 0x10b   :  { %v3910_v55 = vmax.f32 %v3850_v32, %v2031_v33  ;;  %v2018_v43 = vadd.f32 %v2017_v53, %v3784_v21  ;;  %v2032_v57 = vmax.f32 %v1945_v26, 0.0 }
 0x10c   :  { %v2034_v58 = vmax.f32 %v2016_v28, 0.0  ;;  %v2033_v44 = vmax.f32 %v1947_v56, 0.0  ;;  %v2199_v0 = vpop.f32.mrb[24].mxu0 }
 0x10d   :  { %v2035_v61 = vmax.f32 %v2018_v43, 0.0  ;;  %v2270_v1 = vpop.f32.mrb[24].mxu1  ;;  %v3915_v4 = vmax.f32 %v3854_v59, %v2032_v57  ;;  %v2200_v47 = vadd.f32 %v2199_v0, %v3784_v21  ;;  %v2201_v10 = vpop.f32.mrb[25].mxu0 }
 0x10e   :  { %v3918_v9 = vmax.f32 %v3856_v60, %v2034_v58  ;;  %v2271_v32 = vadd.f32 %v2270_v1, %v3784_v21  ;;  %v2272_v11 = vpop.f32.mrb[25].mxu1  ;;  %v3923_v12 = vmax.f32 %v3860_v5, %v2033_v44  ;;  %v2202_v14 = vadd.f32 %v2201_v10, %v3784_v21 }
 0x10f   :  { %v3926_v13 = vmax.f32 %v3862_v8, %v2035_v61  ;;  %v2273_v59 = vadd.f32 %v2272_v11, %v3784_v21  ;;  %v2701_v16 = vmax.f32 %v2200_v47, 0.0 }
 0x110   :  { %v2703_v17 = vmax.f32 %v2271_v32, 0.0  ;;  %v2702_v60 = vmax.f32 %v2202_v14, 0.0  ;;  %v2341_v23 = vpop.f32.mrb[26].mxu0 }
 0x111   :  { %v2704_v20 = vmax.f32 %v2273_v59, 0.0  ;;  %v2412_v3 = vpop.f32.mrb[26].mxu1  ;;  %v2717_v24 = vmax.f32 %v3867_v18, %v2701_v16  ;;  %v2342_v5 = vadd.f32 %v2341_v23, %v3784_v21  ;;  %v2343_v8 = vpop.f32.mrb[27].mxu0 }
 0x112   :  { %v2719_v30 = vmax.f32 %v3870_v19, %v2703_v17  ;;  %v2413_v62 = vadd.f32 %v2412_v3, %v3784_v21  ;;  %v2414_v31 = vpop.f32.mrb[27].mxu1  ;;  %v2718_v34 = vmax.f32 %v3875_v25, %v2702_v60  ;;  %v2344_v35 = vadd.f32 %v2343_v8, %v3784_v21 }
 0x113   :  { %v2720_v63 = vmax.f32 %v3878_v29, %v2704_v20  ;;  %v2415_v36 = vadd.f32 %v2414_v31, %v3784_v21  ;;  %2733 = vst [vmem:[%s4009_s3] sm:$0xff] %v2717_v24  ;;  %v2705_v18 = vmax.f32 %v2342_v5, 0.0 }
 0x114   :  { %2735 = vst [vmem:[%s4009_s3 + $0x10] sm:$0xff] %v2719_v30  ;;  %v2707_v19 = vmax.f32 %v2413_v62, 0.0  ;;  %2734 = vst [vmem:[%s4009_s3 + $0x8] sm:$0xff] %v2718_v34  ;;  %v2706_v25 = vmax.f32 %v2344_v35, 0.0  ;;  %v2483_v37 = vpop.f32.mrb[28].mxu0 }
 0x115   :  { %2736 = vst [vmem:[%s4009_s3 + $0x18] sm:$0xff] %v2720_v63  ;;  %v2708_v29 = vmax.f32 %v2415_v36, 0.0  ;;  %v2554_v6 = vpop.f32.mrb[28].mxu1  ;;  %v2721_v7 = vmax.f32 %v3883_v38, %v2705_v18  ;;  %v2484_v41 = vadd.f32 %v2483_v37, %v3784_v21  ;;  %v2485_v2 = vpop.f32.mrb[29].mxu0 }
 0x116   :  { %v2723_v40 = vmax.f32 %v3886_v39, %v2707_v19  ;;  %v2555_v15 = vadd.f32 %v2554_v6, %v3784_v21  ;;  %v2556_v45 = vpop.f32.mrb[29].mxu1  ;;  %v2722_v46 = vmax.f32 %v3891_v42, %v2706_v25  ;;  %v2486_v33 = vadd.f32 %v2485_v2, %v3784_v21 }
 0x117   :  { %v2724_v22 = vmax.f32 %v3894_v27, %v2708_v29  ;;  %v2557_v48 = vadd.f32 %v2556_v45, %v3784_v21  ;;  %2737 = vst [vmem:[%s4009_s3 + $0x20] sm:$0xff] %v2721_v7  ;;  %v2709_v38 = vmax.f32 %v2484_v41, 0.0 }
 0x118   :  { %2739 = vst [vmem:[%s4009_s3 + $0x30] sm:$0xff] %v2723_v40  ;;  %v2711_v39 = vmax.f32 %v2555_v15, 0.0  ;;  %2738 = vst [vmem:[%s4009_s3 + $0x28] sm:$0xff] %v2722_v46  ;;  %v2710_v42 = vmax.f32 %v2486_v33, 0.0  ;;  %v2625_v49 = vpop.f32.mrb[30].mxu0 }
 0x119   :  { %2740 = vst [vmem:[%s4009_s3 + $0x38] sm:$0xff] %v2724_v22  ;;  %v2712_v27 = vmax.f32 %v2557_v48, 0.0  ;;  %v2696_v26 = vpop.f32.mrb[30].mxu1  ;;  %v2725_v28 = vmax.f32 %v3899_v50, %v2709_v38  ;;  %v2626_v53 = vadd.f32 %v2625_v49, %v3784_v21  ;;  %v2627_v43 = vpop.f32.mrb[31].mxu0 }
 0x11a   :  { %v2727_v52 = vmax.f32 %v3902_v51, %v2711_v39  ;;  %v2697_v56 = vadd.f32 %v2696_v26, %v3784_v21  ;;  %v2698_v57 = vpop.f32.mrb[31].mxu1  ;;  %v2726_v58 = vmax.f32 %v3907_v54, %v2710_v42  ;;  %v2628_v61 = vadd.f32 %v2627_v43, %v3784_v21 }
 0x11b   :  { %v2728_v44 = vmax.f32 %v3910_v55, %v2712_v27  ;;  %v2699_v0 = vadd.f32 %v2698_v57, %v3784_v21  ;;  %2741 = vst [vmem:[%s4009_s3 + $0x40] sm:$0xff] %v2725_v28  ;;  %v2713_v50 = vmax.f32 %v2626_v53, 0.0 }
 0x11c   :  { %2743 = vst [vmem:[%s4009_s3 + $0x50] sm:$0xff] %v2727_v52  ;;  %v2715_v51 = vmax.f32 %v2697_v56, 0.0  ;;  %2742 = vst [vmem:[%s4009_s3 + $0x48] sm:$0xff] %v2726_v58  ;;  %v2714_v54 = vmax.f32 %v2628_v61, 0.0 }
 0x11d   :  { %2744 = vst [vmem:[%s4009_s3 + $0x58] sm:$0xff] %v2728_v44  ;;  %v2716_v21 = vmax.f32 %v2699_v0, 0.0  ;;  %v2729_v55 = vmax.f32 %v3915_v4, %v2713_v50 }
 0x11e   :  { %v2731_v1 = vmax.f32 %v3918_v9, %v2715_v51  ;;  %v2730_v47 = vmax.f32 %v3923_v12, %v2714_v54 }
 0x11f   :  { %v2732_v32 = vmax.f32 %v3926_v13, %v2716_v21  ;;  %2745 = vst [vmem:[%s4009_s3 + $0x60] sm:$0xff] %v2729_v55 }
 0x120   :  { %2747 = vst [vmem:[%s4009_s3 + $0x70] sm:$0xff] %v2731_v1  ;;  %2746 = vst [vmem:[%s4009_s3 + $0x68] sm:$0xff] %v2730_v47 }
 0x121   :  { %2748 = vst [vmem:[%s4009_s3 + $0x78] sm:$0xff] %v2732_v32 }

// kernel: net_forward.4
= control target key start
LH: loop header
LB: loop body
LE: loop exit
PB: predicated region body
PF: predicated region fallthrough
CT: control target
= control target key end

     0   :  { %v4353_v3 = vmov 0.0   ;;  %v4354_v8 = vmov 0   ;;  %vm172_vm0 = vcmask 588800   ;;  %s6847_s0 = inlined_call_operand.vmem [shape: f32[4,72,2048], index: 0, kind: input, shape index: {}]   ;;  %s6848_s1 = inlined_call_operand.vmem [shape: f32[16,72], index: 1, kind: input, shape index: {}]   ;;  %s6849_s2 = inlined_call_operand.vmem [shape: f32[16,1], index: 2, kind: input, shape index: {}]   ;;  %s6850_s3 = inlined_call_operand.vmem [shape: f32[16,2048], index: 3, kind: output, shape index: {}]  }
   0x1   :  { %v19_v0 = vld [vmem:[%s6847_s0 + $0x8] sm:$0xff]  ;;  %v21_v2 = vld [vmem:[%s6847_s0 + $0x18] sm:$0xff]  ;;  %243 = vmatprep.mubr.f32.mxu0 %v4353_v3  ;;  %320 = vmatprep.mubr.f32.mxu1 %v4353_v3  ;;  %v18_v6 = vld [vmem:[%s6847_s0] sm:$0xff] }
   0x2   :  { %v35_v1 = vld [vmem:[%s6847_s0 + $0x88] sm:$0xff]  ;;  %v37_v5 = vld [vmem:[%s6847_s0 + $0x98] sm:$0xff]  ;;  %v34_v7 = vld [vmem:[%s6847_s0 + $0x80] sm:$0xff]  ;;  %4348 = vset.pattern.permute.xlu0 %v4354_v8 }
   0x3   :  { %v3834_v4 = vpack.c.bf16 %v35_v1, %v19_v0  ;;  %v3850_v9 = vpack.c.bf16 %v37_v5, %v21_v2  ;;  %v3836_v10 = vpack.c.bf16 %v34_v7, %v18_v6  ;;  %v20_v11 = vld [vmem:[%s6847_s0 + $0x10] sm:$0xff]  ;;  %v51_v13 = vld [vmem:[%s6847_s0 + $0x108] sm:$0xff]  ;;  %v53_v16 = vld [vmem:[%s6847_s0 + $0x118] sm:$0xff] }
   0x4   :  { %v36_v12 = vld [vmem:[%s6847_s0 + $0x90] sm:$0xff]  ;;  %v67_v15 = vld [vmem:[%s6847_s0 + $0x188] sm:$0xff]  ;;  %v69_v17 = vld [vmem:[%s6847_s0 + $0x198] sm:$0xff] }
   0x5   :  { %3835 = vmatprep.subr.bf16.mxu0 %v3834_v4  ;;  %v3852_v14 = vpack.c.bf16 %v36_v12, %v20_v11  ;;  %3851 = vmatprep.subr.bf16.mxu1 %v3850_v9  ;;  %v3838_v18 = vpack.c.bf16 %v67_v15, %v51_v13  ;;  %v3854_v19 = vpack.c.bf16 %v69_v17, %v53_v16  ;;  %v50_v20 = vld [vmem:[%s6847_s0 + $0x100] sm:$0xff]  ;;  %v52_v22 = vld [vmem:[%s6847_s0 + $0x110] sm:$0xff]  ;;  %v83_v25 = vld [vmem:[%s6847_s0 + $0x208] sm:$0xff] }
   0x6   :  { %3837 = vmatpush1.bf16.msra.mxu0 %v3836_v10  ;;  %v66_v21 = vld [vmem:[%s6847_s0 + $0x180] sm:$0xff]  ;;  %v68_v24 = vld [vmem:[%s6847_s0 + $0x190] sm:$0xff]  ;;  %v99_v26 = vld [vmem:[%s6847_s0 + $0x288] sm:$0xff] }
   0x7   :  { %3853 = vmatpush1.bf16.msra.mxu1 %v3852_v14  ;;  %v3840_v23 = vpack.c.bf16 %v66_v21, %v50_v20  ;;  %3839 = vmatprep.subr.bf16.mxu0 %v3838_v18  ;;  %v3856_v27 = vpack.c.bf16 %v68_v24, %v52_v22  ;;  %v3842_v28 = vpack.c.bf16 %v99_v26, %v83_v25  ;;  %v85_v29 = vld [vmem:[%s6847_s0 + $0x218] sm:$0xff]  ;;  %v82_v31 = vld [vmem:[%s6847_s0 + $0x200] sm:$0xff]  ;;  %v84_v34 = vld [vmem:[%s6847_s0 + $0x210] sm:$0xff] }
   0x8   :  { %3855 = vmatprep.subr.bf16.mxu1 %v3854_v19  ;;  %v101_v30 = vld [vmem:[%s6847_s0 + $0x298] sm:$0xff]  ;;  %v98_v33 = vld [vmem:[%s6847_s0 + $0x280] sm:$0xff]  ;;  %v100_v35 = vld [vmem:[%s6847_s0 + $0x290] sm:$0xff] }
   0x9   :  { %v3858_v32 = vpack.c.bf16 %v101_v30, %v85_v29  ;;  %v3844_v36 = vpack.c.bf16 %v98_v33, %v82_v31  ;;  %v115_v37 = vld [vmem:[%s6847_s0 + $0x308] sm:$0xff]  ;;  %v117_v39 = vld [vmem:[%s6847_s0 + $0x318] sm:$0xff]  ;;  %v3860_v40 = vpack.c.bf16 %v100_v35, %v84_v34  ;;  %v114_v43 = vld [vmem:[%s6847_s0 + $0x300] sm:$0xff] }
   0xa   :  { %3841 = vmatpush1.bf16.msra.mxu0 %v3840_v23  ;;  %v131_v38 = vld [vmem:[%s6847_s0 + $0x388] sm:$0xff]  ;;  %v133_v42 = vld [vmem:[%s6847_s0 + $0x398] sm:$0xff]  ;;  %v130_v44 = vld [vmem:[%s6847_s0 + $0x380] sm:$0xff] }
   0xb   :  { %3857 = vmatpush1.bf16.msra.mxu1 %v3856_v27  ;;  %3843 = vmatprep.subr.bf16.mxu0 %v3842_v28  ;;  %v3846_v41 = vpack.c.bf16 %v131_v38, %v115_v37  ;;  %v3862_v45 = vpack.c.bf16 %v133_v42, %v117_v39  ;;  %v116_v46 = vld [vmem:[%s6847_s0 + $0x310] sm:$0xff]  ;;  %v3848_v48 = vpack.c.bf16 %v130_v44, %v114_v43  ;;  %v147_v50 = vld [vmem:[%s6847_s0 + $0x408] sm:$0xff]  ;;  %v149_v51 = vld [vmem:[%s6847_s0 + $0x418] sm:$0xff] }
   0xc   :  { %3859 = vmatprep.subr.bf16.mxu1 %v3858_v32  ;;  %v132_v47 = vld [vmem:[%s6847_s0 + $0x390] sm:$0xff]  ;;  %v23_v52 = vld [vmem:[%s6847_s0 + $0x28] sm:$0xff]  ;;  %v146_v53 = vld [vmem:[%s6847_s0 + $0x400] sm:$0xff] }
   0xd   :  { %v3864_v49 = vpack.c.bf16 %v132_v47, %v116_v46  ;;  %v39_v54 = vld [vmem:[%s6847_s0 + $0xa8] sm:$0xff]  ;;  %v25_v55 = vld [vmem:[%s6847_s0 + $0x38] sm:$0xff]  ;;  %v148_v57 = vld [vmem:[%s6847_s0 + $0x410] sm:$0xff] }
   0xe   :  { %3845 = vmatpush1.bf16.msra.mxu0 %v3844_v36  ;;  %v41_v56 = vld [vmem:[%s6847_s0 + $0xb8] sm:$0xff]  ;;  %v22_v58 = vld [vmem:[%s6847_s0 + $0x20] sm:$0xff]  ;;  %v24_v60 = vld [vmem:[%s6847_s0 + $0x30] sm:$0xff]  ;;  %v3866_v1 = vpack.c.bf16 %v39_v54, %v23_v52 }
   0xf   :  { %3861 = vmatpush1.bf16.msra.mxu1 %v3860_v40  ;;  %3847 = vmatprep.subr.bf16.mxu0 %v3846_v41  ;;  %v38_v59 = vld [vmem:[%s6847_s0 + $0xa0] sm:$0xff]  ;;  %v40_v61 = vld [vmem:[%s6847_s0 + $0xb0] sm:$0xff]  ;;  %v55_v62 = vld [vmem:[%s6847_s0 + $0x128] sm:$0xff]  ;;  %v3882_v5 = vpack.c.bf16 %v41_v56, %v25_v55 }
  0x10   :  { %3863 = vmatprep.subr.bf16.mxu1 %v3862_v45  ;;  %v71_v63 = vld [vmem:[%s6847_s0 + $0x1a8] sm:$0xff]  ;;  %v4518_v0 = vld [vmem:[%s6848_s1] sm:$0xff]  ;;  %v57_v2 = vld [vmem:[%s6847_s0 + $0x138] sm:$0xff]  ;;  %v3868_v6 = vpack.c.bf16 %v38_v59, %v22_v58  ;;  %v3884_v7 = vpack.c.bf16 %v40_v61, %v24_v60 }
  0x11   :  { %v73_v4 = vld [vmem:[%s6847_s0 + $0x1b8] sm:$0xff]  ;;  %v3870_v8 = vpack.c.bf16 %v71_v63, %v55_v62  ;;  %v54_v9 = vld [vmem:[%s6847_s0 + $0x120] sm:$0xff]  ;;  %v56_v11 = vld [vmem:[%s6847_s0 + $0x130] sm:$0xff] }
  0x12   :  { %3849 = vmatpush1.bf16.msra.mxu0 %v3848_v48  ;;  %v70_v10 = vld [vmem:[%s6847_s0 + $0x1a0] sm:$0xff]  ;;  %v3886_v12 = vpack.c.bf16 %v73_v4, %v57_v2  ;;  %v72_v13 = vld [vmem:[%s6847_s0 + $0x1b0] sm:$0xff]  ;;  %v87_v14 = vld [vmem:[%s6847_s0 + $0x228] sm:$0xff] }
  0x13   :  { %3865 = vmatpush1.bf16.msra.mxu1 %v3864_v49  ;;  %195 = vmatprep.subr.mxu0 %v147_v50  ;;  %v103_v15 = vld [vmem:[%s6847_s0 + $0x2a8] sm:$0xff]  ;;  %v89_v16 = vld [vmem:[%s6847_s0 + $0x238] sm:$0xff]  ;;  %v3872_v18 = vpack.c.bf16 %v70_v10, %v54_v9  ;;  %v3888_v20 = vpack.c.bf16 %v72_v13, %v56_v11  ;;  %v86_v22 = vld [vmem:[%s6847_s0 + $0x220] sm:$0xff] }
  0x14   :  { %272 = vmatprep.subr.mxu1 %v149_v51  ;;  %v105_v17 = vld [vmem:[%s6847_s0 + $0x2b8] sm:$0xff]  ;;  %v4557_v19 = vld [vmem:[%s6848_s1 + $0x8] sm:$0xff]  ;;  %v3874_v21 = vpack.c.bf16 %v103_v15, %v87_v14  ;;  %v102_v23 = vld [vmem:[%s6847_s0 + $0x2a0] sm:$0xff] }
  0x15   :  { %v88_v24 = vld [vmem:[%s6847_s0 + $0x230] sm:$0xff]  ;;  %v3890_v25 = vpack.c.bf16 %v105_v17, %v89_v16  ;;  %v119_v27 = vld [vmem:[%s6847_s0 + $0x328] sm:$0xff]  ;;  %v121_v29 = vld [vmem:[%s6847_s0 + $0x338] sm:$0xff]  ;;  %v3876_v31 = vpack.c.bf16 %v102_v23, %v86_v22 }
  0x16   :  { %196 = vmatpush1.msra.mxu0 %v146_v53  ;;  %v104_v26 = vld [vmem:[%s6847_s0 + $0x2b0] sm:$0xff]  ;;  %v135_v28 = vld [vmem:[%s6847_s0 + $0x3a8] sm:$0xff]  ;;  %v137_v30 = vld [vmem:[%s6847_s0 + $0x3b8] sm:$0xff] }
  0x17   :  { %273 = vmatpush1.msra.mxu1 %v148_v57  ;;  %3338 = vmatmul.mubr.msk.f32.vlgmr.msra.gmra.mrb[0].mxu0 %vm172_vm0, %v4518_v0  ;;  %v3892_v32 = vpack.c.bf16 %v104_v26, %v88_v24  ;;  %v3878_v33 = vpack.c.bf16 %v135_v28, %v119_v27  ;;  %v118_v34 = vld [vmem:[%s6847_s0 + $0x320] sm:$0xff]  ;;  %v3894_v36 = vpack.c.bf16 %v137_v30, %v121_v29  ;;  %v120_v37 = vld [vmem:[%s6847_s0 + $0x330] sm:$0xff]  ;;  %v151_v41 = vld [vmem:[%s6847_s0 + $0x428] sm:$0xff] }
  0x18   :  { %3340 = vmatmul.mubr.msk.f32.vlgmr.msra.gmra.mrb[0].mxu1 %vm172_vm0, %v4518_v0  ;;  %3867 = vmatprep.subr.bf16.mxu0 %v3866_v1  ;;  %v134_v35 = vld [vmem:[%s6847_s0 + $0x3a0] sm:$0xff]  ;;  %v136_v38 = vld [vmem:[%s6847_s0 + $0x3b0] sm:$0xff]  ;;  %v153_v42 = vld [vmem:[%s6847_s0 + $0x438] sm:$0xff] }
  0x19   :  { %3883 = vmatprep.subr.bf16.mxu1 %v3882_v5  ;;  %3869 = vmatpush1.bf16.msra.mxu0 %v3868_v6  ;;  %v3880_v39 = vpack.c.bf16 %v134_v35, %v118_v34  ;;  %v3896_v40 = vpack.c.bf16 %v136_v38, %v120_v37  ;;  %v27_v43 = vld [vmem:[%s6847_s0 + $0x48] sm:$0xff]  ;;  %v150_v44 = vld [vmem:[%s6847_s0 + $0x420] sm:$0xff]  ;;  %v29_v46 = vld [vmem:[%s6847_s0 + $0x58] sm:$0xff] }
  0x1a   :  { %3885 = vmatpush1.bf16.msra.mxu1 %v3884_v7  ;;  %3871 = vmatprep.subr.bf16.mxu0 %v3870_v8  ;;  %v43_v45 = vld [vmem:[%s6847_s0 + $0xc8] sm:$0xff]  ;;  %v45_v47 = vld [vmem:[%s6847_s0 + $0xd8] sm:$0xff]  ;;  %v26_v48 = vld [vmem:[%s6847_s0 + $0x40] sm:$0xff] }
  0x1b   :  { %3887 = vmatprep.subr.bf16.mxu1 %v3886_v12  ;;  %249 = vmatprep.mubr.f32.mxu0 %v4353_v3  ;;  %v42_v49 = vld [vmem:[%s6847_s0 + $0xc0] sm:$0xff]  ;;  %v28_v50 = vld [vmem:[%s6847_s0 + $0x50] sm:$0xff]  ;;  %v59_v52 = vld [vmem:[%s6847_s0 + $0x148] sm:$0xff]  ;;  %v3898_v55 = vpack.c.bf16 %v43_v45, %v27_v43  ;;  %v3914_v58 = vpack.c.bf16 %v45_v47, %v29_v46 }
  0x1c   :  { %326 = vmatprep.mubr.f32.mxu1 %v4353_v3  ;;  %3339 = vmatmul.mubr.msk.f32.gmra.mrb[2].mxu0 %vm172_vm0, %v4557_v19  ;;  %v44_v51 = vld [vmem:[%s6847_s0 + $0xd0] sm:$0xff]  ;;  %v75_v53 = vld [vmem:[%s6847_s0 + $0x1c8] sm:$0xff]  ;;  %v61_v56 = vld [vmem:[%s6847_s0 + $0x158] sm:$0xff]  ;;  %v3900_v59 = vpack.c.bf16 %v42_v49, %v26_v48 }
  0x1d   :  { %3873 = vmatpush1.bf16.msra.mxu0 %v3872_v18  ;;  %3341 = vmatmul.mubr.msk.f32.gmra.mrb[2].mxu1 %vm172_vm0, %v4557_v19  ;;  %v152_v54 = vld [vmem:[%s6847_s0 + $0x430] sm:$0xff]  ;;  %v77_v57 = vld [vmem:[%s6847_s0 + $0x1d8] sm:$0xff]  ;;  %v3916_v60 = vpack.c.bf16 %v44_v51, %v28_v50  ;;  %v3902_v61 = vpack.c.bf16 %v75_v53, %v59_v52  ;;  %v58_v62 = vld [vmem:[%s6847_s0 + $0x140] sm:$0xff] }
  0x1e   :  { %3889 = vmatpush1.bf16.msra.mxu1 %v3888_v20  ;;  %3875 = vmatprep.subr.bf16.mxu0 %v3874_v21  ;;  %v74_v63 = vld [vmem:[%s6847_s0 + $0x1c0] sm:$0xff]  ;;  %v60_v1 = vld [vmem:[%s6847_s0 + $0x150] sm:$0xff]  ;;  %v3918_v2 = vpack.c.bf16 %v77_v57, %v61_v56  ;;  %v91_v5 = vld [vmem:[%s6847_s0 + $0x248] sm:$0xff] }
  0x1f   :  { %3891 = vmatprep.subr.bf16.mxu1 %v3890_v25  ;;  %397 = vmatprep.mubr.f32.mxu0 %v4353_v3  ;;  %v76_v4 = vld [vmem:[%s6847_s0 + $0x1d0] sm:$0xff]  ;;  %v107_v6 = vld [vmem:[%s6847_s0 + $0x2c8] sm:$0xff]  ;;  %v93_v7 = vld [vmem:[%s6847_s0 + $0x258] sm:$0xff]  ;;  %v3904_v9 = vpack.c.bf16 %v74_v63, %v58_v62 }
  0x20   :  { %474 = vmatprep.mubr.f32.mxu1 %v4353_v3  ;;  %v109_v8 = vld [vmem:[%s6847_s0 + $0x2d8] sm:$0xff]  ;;  %v3920_v10 = vpack.c.bf16 %v76_v4, %v60_v1  ;;  %v3906_v11 = vpack.c.bf16 %v107_v6, %v91_v5  ;;  %v90_v12 = vld [vmem:[%s6847_s0 + $0x240] sm:$0xff]  ;;  %v92_v14 = vld [vmem:[%s6847_s0 + $0x250] sm:$0xff] }
  0x21   :  { %3877 = vmatpush1.bf16.msra.mxu0 %v3876_v31  ;;  %v106_v13 = vld [vmem:[%s6847_s0 + $0x2c0] sm:$0xff]  ;;  %v3922_v15 = vpack.c.bf16 %v109_v8, %v93_v7  ;;  %v108_v16 = vld [vmem:[%s6847_s0 + $0x2d0] sm:$0xff]  ;;  %v123_v17 = vld [vmem:[%s6847_s0 + $0x348] sm:$0xff] }
  0x22   :  { %3893 = vmatpush1.bf16.msra.mxu1 %v3892_v32  ;;  %3879 = vmatprep.subr.bf16.mxu0 %v3878_v33  ;;  %v139_v18 = vld [vmem:[%s6847_s0 + $0x3c8] sm:$0xff]  ;;  %v125_v20 = vld [vmem:[%s6847_s0 + $0x358] sm:$0xff]  ;;  %v3908_v22 = vpack.c.bf16 %v106_v13, %v90_v12  ;;  %v3924_v23 = vpack.c.bf16 %v108_v16, %v92_v14  ;;  %v122_v25 = vld [vmem:[%s6847_s0 + $0x340] sm:$0xff] }
  0x23   :  { %3895 = vmatprep.subr.bf16.mxu1 %v3894_v36  ;;  %v141_v21 = vld [vmem:[%s6847_s0 + $0x3d8] sm:$0xff]  ;;  %v3910_v24 = vpack.c.bf16 %v139_v18, %v123_v17  ;;  %v138_v26 = vld [vmem:[%s6847_s0 + $0x3c0] sm:$0xff]  ;;  %v124_v28 = vld [vmem:[%s6847_s0 + $0x350] sm:$0xff] }
  0x24   :  { %v3926_v27 = vpack.c.bf16 %v141_v21, %v125_v20  ;;  %v140_v29 = vld [vmem:[%s6847_s0 + $0x3d0] sm:$0xff]  ;;  %v3912_v30 = vpack.c.bf16 %v138_v26, %v122_v25  ;;  %v155_v32 = vld [vmem:[%s6847_s0 + $0x448] sm:$0xff]  ;;  %v157_v33 = vld [vmem:[%s6847_s0 + $0x458] sm:$0xff] }
  0x25   :  { %3881 = vmatpush1.bf16.msra.mxu0 %v3880_v39  ;;  %v3928_v31 = vpack.c.bf16 %v140_v29, %v124_v28  ;;  %v31_v34 = vld [vmem:[%s6847_s0 + $0x68] sm:$0xff]  ;;  %v154_v35 = vld [vmem:[%s6847_s0 + $0x440] sm:$0xff]  ;;  %v33_v37 = vld [vmem:[%s6847_s0 + $0x78] sm:$0xff] }
  0x26   :  { %3897 = vmatpush1.bf16.msra.mxu1 %v3896_v40  ;;  %349 = vmatprep.subr.mxu0 %v151_v41  ;;  %v47_v36 = vld [vmem:[%s6847_s0 + $0xe8] sm:$0xff]  ;;  %v49_v38 = vld [vmem:[%s6847_s0 + $0xf8] sm:$0xff]  ;;  %v30_v39 = vld [vmem:[%s6847_s0 + $0x60] sm:$0xff] }
  0x27   :  { %426 = vmatprep.subr.mxu1 %v153_v42  ;;  %v46_v40 = vld [vmem:[%s6847_s0 + $0xe0] sm:$0xff]  ;;  %v32_v41 = vld [vmem:[%s6847_s0 + $0x70] sm:$0xff]  ;;  %v63_v43 = vld [vmem:[%s6847_s0 + $0x168] sm:$0xff]  ;;  %v3930_v46 = vpack.c.bf16 %v47_v36, %v31_v34  ;;  %v3946_v49 = vpack.c.bf16 %v49_v38, %v33_v37 }
  0x28   :  { %v48_v42 = vld [vmem:[%s6847_s0 + $0xf0] sm:$0xff]  ;;  %v65_v47 = vld [vmem:[%s6847_s0 + $0x178] sm:$0xff]  ;;  %v3932_v50 = vpack.c.bf16 %v46_v40, %v30_v39  ;;  %v62_v53 = vld [vmem:[%s6847_s0 + $0x160] sm:$0xff] }
  0x29   :  { %350 = vmatpush1.msra.mxu0 %v150_v44  ;;  %v79_v44 = vld [vmem:[%s6847_s0 + $0x1e8] sm:$0xff]  ;;  %v156_v45 = vld [vmem:[%s6847_s0 + $0x450] sm:$0xff]  ;;  %v81_v48 = vld [vmem:[%s6847_s0 + $0x1f8] sm:$0xff]  ;;  %v3948_v51 = vpack.c.bf16 %v48_v42, %v32_v41 }
  0x2a   :  { %427 = vmatpush1.msra.mxu1 %v152_v54  ;;  %3342 = vmatmul.mubr.msk.f32.vlgmr.msra.gmra.mrb[4].mxu0 %vm172_vm0, %v4518_v0  ;;  %v3934_v52 = vpack.c.bf16 %v79_v44, %v63_v43  ;;  %v78_v54 = vld [vmem:[%s6847_s0 + $0x1e0] sm:$0xff]  ;;  %v3950_v56 = vpack.c.bf16 %v81_v48, %v65_v47  ;;  %v80_v57 = vld [vmem:[%s6847_s0 + $0x1f0] sm:$0xff]  ;;  %v127_v8 = vld [vmem:[%s6847_s0 + $0x368] sm:$0xff] }
  0x2b   :  { %3344 = vmatmul.mubr.msk.f32.vlgmr.msra.gmra.mrb[4].mxu1 %vm172_vm0, %v4518_v0  ;;  %3899 = vmatprep.subr.bf16.mxu0 %v3898_v55  ;;  %v64_v55 = vld [vmem:[%s6847_s0 + $0x170] sm:$0xff]  ;;  %v3936_v62 = vpack.c.bf16 %v78_v54, %v62_v53  ;;  %v110_v4 = vld [vmem:[%s6847_s0 + $0x2e0] sm:$0xff]  ;;  %v161_v25 = vld [vmem:[%s6847_s0 + $0x478] sm:$0xff] }
  0x2c   :  { %3915 = vmatprep.subr.bf16.mxu1 %v3914_v58  ;;  %3901 = vmatpush1.bf16.msra.mxu0 %v3900_v59  ;;  %v95_v58 = vld [vmem:[%s6847_s0 + $0x268] sm:$0xff]  ;;  %v3952_v63 = vpack.c.bf16 %v80_v57, %v64_v55  ;;  %v96_v5 = vld [vmem:[%s6847_s0 + $0x270] sm:$0xff]  ;;  %v142_v16 = vld [vmem:[%s6847_s0 + $0x3e0] sm:$0xff] }
  0x2d   :  { %3917 = vmatpush1.bf16.msra.mxu1 %v3916_v60  ;;  %3903 = vmatprep.subr.bf16.mxu0 %v3902_v61  ;;  %v111_v59 = vld [vmem:[%s6847_s0 + $0x2e8] sm:$0xff]  ;;  %v97_v60 = vld [vmem:[%s6847_s0 + $0x278] sm:$0xff]  ;;  %v112_v7 = vld [vmem:[%s6847_s0 + $0x2f0] sm:$0xff] }
  0x2e   :  { %3919 = vmatprep.subr.bf16.mxu1 %v3918_v2  ;;  %403 = vmatprep.mubr.f32.mxu0 %v4353_v3  ;;  %v113_v61 = vld [vmem:[%s6847_s0 + $0x2f8] sm:$0xff]  ;;  %v3938_v1 = vpack.c.bf16 %v111_v59, %v95_v58  ;;  %v94_v2 = vld [vmem:[%s6847_s0 + $0x260] sm:$0xff]  ;;  %v3956_v13 = vpack.c.bf16 %v112_v7, %v96_v5  ;;  %v128_v18 = vld [vmem:[%s6847_s0 + $0x370] sm:$0xff] }
  0x2f   :  { %480 = vmatprep.mubr.f32.mxu1 %v4353_v3  ;;  %3343 = vmatmul.mubr.msk.f32.gmra.mrb[6].mxu0 %vm172_vm0, %v4557_v19  ;;  %v3954_v6 = vpack.c.bf16 %v113_v61, %v97_v60  ;;  %v3940_v12 = vpack.c.bf16 %v110_v4, %v94_v2  ;;  %v144_v20 = vld [vmem:[%s6847_s0 + $0x3f0] sm:$0xff]  ;;  %v3355_v26 = vld [vmem:[%s6847_s0 + $0x488] sm:$0xff]  ;;  %v3357_v29 = vld [vmem:[%s6847_s0 + $0x498] sm:$0xff] }
  0x30   :  { %3905 = vmatpush1.bf16.msra.mxu0 %v3904_v9  ;;  %3345 = vmatmul.mubr.msk.f32.gmra.mrb[6].mxu1 %vm172_vm0, %v4557_v19  ;;  %v143_v9 = vld [vmem:[%s6847_s0 + $0x3e8] sm:$0xff]  ;;  %v3372_v34 = vld [vmem:[%s6847_s0 + $0x510] sm:$0xff]  ;;  %v3389_v39 = vld [vmem:[%s6847_s0 + $0x598] sm:$0xff] }
  0x31   :  { %3921 = vmatpush1.bf16.msra.mxu1 %v3920_v10  ;;  %3907 = vmatprep.subr.bf16.mxu0 %v3906_v11  ;;  %v129_v10 = vld [vmem:[%s6847_s0 + $0x378] sm:$0xff]  ;;  %v3942_v14 = vpack.c.bf16 %v143_v9, %v127_v8  ;;  %v3371_v28 = vld [vmem:[%s6847_s0 + $0x508] sm:$0xff]  ;;  %v160_v37 = vld [vmem:[%s6847_s0 + $0x470] sm:$0xff] }
  0x32   :  { %3923 = vmatprep.subr.bf16.mxu1 %v3922_v15  ;;  %551 = vmatprep.mubr.f32.mxu0 %v4353_v3  ;;  %v145_v11 = vld [vmem:[%s6847_s0 + $0x3f8] sm:$0xff]  ;;  %v126_v15 = vld [vmem:[%s6847_s0 + $0x360] sm:$0xff]  ;;  %v3403_v36 = vld [vmem:[%s6847_s0 + $0x608] sm:$0xff]  ;;  %v3962_v38 = vpack.c.bf16 %v3371_v28, %v3355_v26 }
  0x33   :  { %628 = vmatprep.mubr.f32.mxu1 %v4353_v3  ;;  %v3958_v17 = vpack.c.bf16 %v145_v11, %v129_v10  ;;  %v3944_v21 = vpack.c.bf16 %v142_v16, %v126_v15  ;;  %v3405_v40 = vld [vmem:[%s6847_s0 + $0x618] sm:$0xff]  ;;  %v3388_v47 = vld [vmem:[%s6847_s0 + $0x590] sm:$0xff]  ;;  %v3418_v57 = vld [vmem:[%s6847_s0 + $0x680] sm:$0xff] }
  0x34   :  { %3909 = vmatpush1.bf16.msra.mxu0 %v3908_v22  ;;  %v3960_v22 = vpack.c.bf16 %v144_v20, %v128_v18  ;;  %v3982_v48 = vpack.c.bf16 %v3405_v40, %v3389_v39  ;;  %v3437_v53 = vld [vmem:[%s6847_s0 + $0x718] sm:$0xff]  ;;  %v3434_v58 = vld [vmem:[%s6847_s0 + $0x700] sm:$0xff]  ;;  %v3420_v59 = vld [vmem:[%s6847_s0 + $0x690] sm:$0xff] }
  0x35   :  { %3925 = vmatpush1.bf16.msra.mxu1 %v3924_v23  ;;  %3911 = vmatprep.subr.bf16.mxu0 %v3910_v24  ;;  %v16_v23 = vld [vmem:[%s6849_s2] sm:$0xff]  ;;  %v159_v24 = vld [vmem:[%s6847_s0 + $0x468] sm:$0xff]  ;;  %v3436_v61 = vld [vmem:[%s6847_s0 + $0x710] sm:$0xff]  ;;  %v3972_v4 = vpack.c.bf16 %v3434_v58, %v3418_v57 }
  0x36   :  { %3927 = vmatprep.subr.bf16.mxu1 %v3926_v27  ;;  %164 = vperm.xlu0 %4348, %v16_v23   ;;  %v158_v27 = vld [vmem:[%s6847_s0 + $0x460] sm:$0xff]  ;;  %v3469_v2 = vld [vmem:[%s6847_s0 + $0x818] sm:$0xff]  ;;  %v17_v5 = vld [vmem:[%s6849_s2 + $0x8] sm:$0xff] }
  0x37   :  { %v3450_v8 = vld [vmem:[%s6847_s0 + $0x780] sm:$0xff]  ;;  %v3452_v11 = vld [vmem:[%s6847_s0 + $0x790] sm:$0xff]  ;;  %v3483_v15 = vld [vmem:[%s6847_s0 + $0x888] sm:$0xff] }
  0x38   :  { %3913 = vmatpush1.bf16.msra.mxu0 %v3912_v30  ;;  %v3373_v30 = vld [vmem:[%s6847_s0 + $0x518] sm:$0xff]  ;;  %v3466_v9 = vld [vmem:[%s6847_s0 + $0x800] sm:$0xff]  ;;  %v3375_v18 = vld [vmem:[%s6847_s0 + $0x528] sm:$0xff] }
  0x39   :  { %3929 = vmatpush1.bf16.msra.mxu1 %v3928_v31  ;;  %503 = vmatprep.subr.mxu0 %v155_v32  ;;  %v3354_v31 = vld [vmem:[%s6847_s0 + $0x480] sm:$0xff]  ;;  %v3978_v41 = vpack.c.bf16 %v3373_v30, %v3357_v29  ;;  %v3485_v16 = vld [vmem:[%s6847_s0 + $0x898] sm:$0xff]  ;;  %v3376_v26 = vld [vmem:[%s6847_s0 + $0x530] sm:$0xff] }
  0x3a   :  { %580 = vmatprep.subr.mxu1 %v157_v33  ;;  %v3370_v32 = vld [vmem:[%s6847_s0 + $0x500] sm:$0xff]  ;;  %v3356_v33 = vld [vmem:[%s6847_s0 + $0x490] sm:$0xff]  ;;  %169 = vperm.xlu0 %4348, %v17_v5   ;;  %v3361_v20 = vld [vmem:[%s6847_s0 + $0x4b8] sm:$0xff] }
  0x3b   :  { %v3964_v42 = vpack.c.bf16 %v3370_v32, %v3354_v31  ;;  %v3980_v43 = vpack.c.bf16 %v3372_v34, %v3356_v33  ;;  %v3374_v23 = vld [vmem:[%s6847_s0 + $0x520] sm:$0xff]  ;;  %v3391_v29 = vld [vmem:[%s6847_s0 + $0x5a8] sm:$0xff]  ;;  %v3393_v33 = vld [vmem:[%s6847_s0 + $0x5b8] sm:$0xff] }
  0x3c   :  { %504 = vmatpush1.msra.mxu0 %v154_v35  ;;  %v3387_v35 = vld [vmem:[%s6847_s0 + $0x588] sm:$0xff]  ;;  %v3409_v34 = vld [vmem:[%s6847_s0 + $0x638] sm:$0xff]  ;;  %v3408_v39 = vld [vmem:[%s6847_s0 + $0x630] sm:$0xff] }
  0x3d   :  { %581 = vmatpush1.msra.mxu1 %v156_v45  ;;  %3346 = vmatmul.mubr.msk.f32.vlgmr.msra.gmra.mrb[8].mxu0 %vm172_vm0, %v4518_v0  ;;  %v3966_v44 = vpack.c.bf16 %v3403_v36, %v3387_v35  ;;  %v3386_v45 = vld [vmem:[%s6847_s0 + $0x580] sm:$0xff]  ;;  %v3407_v32 = vld [vmem:[%s6847_s0 + $0x628] sm:$0xff]  ;;  %v3473_v57 = vld [vmem:[%s6847_s0 + $0x838] sm:$0xff] }
  0x3e   :  { %3348 = vmatmul.mubr.msk.f32.vlgmr.msra.gmra.mrb[8].mxu1 %vm172_vm0, %v4518_v0  ;;  %3931 = vmatprep.subr.bf16.mxu0 %v3930_v46  ;;  %v3402_v46 = vld [vmem:[%s6847_s0 + $0x600] sm:$0xff]  ;;  %v3423_v40 = vld [vmem:[%s6847_s0 + $0x6a8] sm:$0xff] }
  0x3f   :  { %3947 = vmatprep.subr.bf16.mxu1 %v3946_v49  ;;  %3933 = vmatpush1.bf16.msra.mxu0 %v3932_v50  ;;  %v3404_v49 = vld [vmem:[%s6847_s0 + $0x610] sm:$0xff]  ;;  %v3419_v50 = vld [vmem:[%s6847_s0 + $0x688] sm:$0xff]  ;;  %v3968_v54 = vpack.c.bf16 %v3402_v46, %v3386_v45  ;;  %v3390_v36 = vld [vmem:[%s6847_s0 + $0x5a0] sm:$0xff]  ;;  %v4014_v45 = vpack.c.bf16 %v3409_v34, %v3393_v33 }
  0x40   :  { %3949 = vmatpush1.bf16.msra.mxu1 %v3948_v51  ;;  %3935 = vmatprep.subr.bf16.mxu0 %v3934_v52  ;;  %v3435_v51 = vld [vmem:[%s6847_s0 + $0x708] sm:$0xff]  ;;  %v3421_v52 = vld [vmem:[%s6847_s0 + $0x698] sm:$0xff]  ;;  %v3984_v55 = vpack.c.bf16 %v3404_v49, %v3388_v47  ;;  %v3422_v49 = vld [vmem:[%s6847_s0 + $0x6a0] sm:$0xff] }
  0x41   :  { %3951 = vmatprep.subr.bf16.mxu1 %v3950_v56  ;;  %557 = vmatprep.mubr.f32.mxu0 %v4353_v3  ;;  %v3970_v56 = vpack.c.bf16 %v3435_v51, %v3419_v50  ;;  %v3986_v60 = vpack.c.bf16 %v3437_v53, %v3421_v52  ;;  %v3438_v50 = vld [vmem:[%s6847_s0 + $0x720] sm:$0xff]  ;;  %v3424_v51 = vld [vmem:[%s6847_s0 + $0x6b0] sm:$0xff]  ;;  %v3429_v34 = vld [vmem:[%s6847_s0 + $0x6d8] sm:$0xff] }
  0x42   :  { %634 = vmatprep.mubr.f32.mxu1 %v4353_v3  ;;  %3347 = vmatmul.mubr.msk.f32.gmra.mrb[10].mxu0 %vm172_vm0, %v4557_v19  ;;  %v3440_v53 = vld [vmem:[%s6847_s0 + $0x730] sm:$0xff]  ;;  %v4004_v58 = vpack.c.bf16 %v3438_v50, %v3422_v49 }
  0x43   :  { %3937 = vmatpush1.bf16.msra.mxu0 %v3936_v62  ;;  %3349 = vmatmul.mubr.msk.f32.gmra.mrb[10].mxu1 %vm172_vm0, %v4557_v19  ;;  %v3451_v62 = vld [vmem:[%s6847_s0 + $0x788] sm:$0xff] }
  0x44   :  { %3953 = vmatpush1.bf16.msra.mxu1 %v3952_v63  ;;  %3939 = vmatprep.subr.bf16.mxu0 %v3938_v1  ;;  %v3467_v63 = vld [vmem:[%s6847_s0 + $0x808] sm:$0xff]  ;;  %v3453_v1 = vld [vmem:[%s6847_s0 + $0x798] sm:$0xff] }
  0x45   :  { %3955 = vmatprep.subr.bf16.mxu1 %v3954_v6  ;;  %705 = vmatprep.mubr.f32.mxu0 %v4353_v3  ;;  %v3988_v6 = vpack.c.bf16 %v3436_v61, %v3420_v59  ;;  %v3974_v7 = vpack.c.bf16 %v3467_v63, %v3451_v62  ;;  %v3990_v10 = vpack.c.bf16 %v3469_v2, %v3453_v1  ;;  %v3454_v61 = vld [vmem:[%s6847_s0 + $0x7a0] sm:$0xff]  ;;  %v3456_v1 = vld [vmem:[%s6847_s0 + $0x7b0] sm:$0xff] }
  0x46   :  { %782 = vmatprep.mubr.f32.mxu1 %v4353_v3  ;;  %v4020_v59 = vpack.c.bf16 %v3440_v53, %v3424_v51  ;;  %v3470_v62 = vld [vmem:[%s6847_s0 + $0x820] sm:$0xff]  ;;  %v3472_v2 = vld [vmem:[%s6847_s0 + $0x830] sm:$0xff] }
  0x47   :  { %3941 = vmatpush1.bf16.msra.mxu0 %v3940_v12  ;;  %v3468_v12 = vld [vmem:[%s6847_s0 + $0x810] sm:$0xff]  ;;  %v4024_v5 = vpack.c.bf16 %v3472_v2, %v3456_v1  ;;  %v3474_v53 = vld [vmem:[%s6847_s0 + $0x840] sm:$0xff]  ;;  %v3385_v1 = vld [vmem:[%s6847_s0 + $0x578] sm:$0xff] }
  0x48   :  { %3957 = vmatpush1.bf16.msra.mxu1 %v3956_v13  ;;  %3943 = vmatprep.subr.bf16.mxu0 %v3942_v14  ;;  %v3976_v13 = vpack.c.bf16 %v3466_v9, %v3450_v8  ;;  %v3992_v14 = vpack.c.bf16 %v3468_v12, %v3452_v11  ;;  %v3363_v8 = vld [vmem:[%s6847_s0 + $0x4c8] sm:$0xff]  ;;  %v3381_v11 = vld [vmem:[%s6847_s0 + $0x558] sm:$0xff]  ;;  %v3362_v12 = vld [vmem:[%s6847_s0 + $0x4c0] sm:$0xff] }
  0x49   :  { %3959 = vmatprep.subr.bf16.mxu1 %v3958_v17  ;;  %v3359_v17 = vld [vmem:[%s6847_s0 + $0x4a8] sm:$0xff]  ;;  %v3366_v2 = vld [vmem:[%s6847_s0 + $0x4e0] sm:$0xff] }
  0x4a   :  { %v3994_v28 = vpack.c.bf16 %v3375_v18, %v3359_v17  ;;  %v3379_v9 = vld [vmem:[%s6847_s0 + $0x548] sm:$0xff]  ;;  %v3488_v17 = vld [vmem:[%s6847_s0 + $0x8b0] sm:$0xff] }
  0x4b   :  { %3945 = vmatpush1.bf16.msra.mxu0 %v3944_v21  ;;  %v3377_v21 = vld [vmem:[%s6847_s0 + $0x538] sm:$0xff]  ;;  %v4026_v18 = vpack.c.bf16 %v3379_v9, %v3363_v8  ;;  %v3492_v8 = vld [vmem:[%s6847_s0 + $0x8d0] sm:$0xff] }
  0x4c   :  { %3961 = vmatpush1.bf16.msra.mxu1 %v3960_v22  ;;  %657 = vmatprep.subr.mxu0 %v159_v24  ;;  %v3358_v22 = vld [vmem:[%s6847_s0 + $0x4a0] sm:$0xff]  ;;  %v4010_v30 = vpack.c.bf16 %v3377_v21, %v3361_v20  ;;  %v3395_v20 = vld [vmem:[%s6847_s0 + $0x5c8] sm:$0xff] }
  0x4d   :  { %734 = vmatprep.subr.mxu1 %v161_v25  ;;  %v3482_v24 = vld [vmem:[%s6847_s0 + $0x880] sm:$0xff]  ;;  %v3360_v25 = vld [vmem:[%s6847_s0 + $0x4b0] sm:$0xff]  ;;  %v3996_v31 = vpack.c.bf16 %v3374_v23, %v3358_v22  ;;  %v3411_v23 = vld [vmem:[%s6847_s0 + $0x648] sm:$0xff] }
  0x4e   :  { %v4012_v35 = vpack.c.bf16 %v3376_v26, %v3360_v25  ;;  %v3413_v25 = vld [vmem:[%s6847_s0 + $0x658] sm:$0xff]  ;;  %v4030_v33 = vpack.c.bf16 %v3411_v23, %v3395_v20  ;;  %v3400_v20 = vld [vmem:[%s6847_s0 + $0x5f0] sm:$0xff]  ;;  %v3447_v23 = vld [vmem:[%s6847_s0 + $0x768] sm:$0xff] }
  0x4f   :  { %658 = vmatpush1.msra.mxu0 %v158_v27  ;;  %v3484_v27 = vld [vmem:[%s6847_s0 + $0x890] sm:$0xff] }
  0x50   :  { %735 = vmatpush1.msra.mxu1 %v160_v37  ;;  %3350 = vmatmul.mubr.msk.f32.vlgmr.msra.gmra.mrb[12].mxu0 %vm172_vm0, %v4518_v0  ;;  %v3406_v37 = vld [vmem:[%s6847_s0 + $0x620] sm:$0xff] }
  0x51   :  { %3352 = vmatmul.mubr.msk.f32.vlgmr.msra.gmra.mrb[12].mxu1 %vm172_vm0, %v4518_v0  ;;  %3963 = vmatprep.subr.bf16.mxu0 %v3962_v38  ;;  %v3392_v38 = vld [vmem:[%s6847_s0 + $0x5b0] sm:$0xff]  ;;  %v4000_v46 = vpack.c.bf16 %v3406_v37, %v3390_v36 }
  0x52   :  { %3979 = vmatprep.subr.bf16.mxu1 %v3978_v41  ;;  %3965 = vmatpush1.bf16.msra.mxu0 %v3964_v42  ;;  %v3439_v41 = vld [vmem:[%s6847_s0 + $0x728] sm:$0xff]  ;;  %v3998_v42 = vpack.c.bf16 %v3407_v32, %v3391_v29  ;;  %v4016_v47 = vpack.c.bf16 %v3408_v39, %v3392_v38  ;;  %v3396_v29 = vld [vmem:[%s6847_s0 + $0x5d0] sm:$0xff] }
  0x53   :  { %3981 = vmatpush1.bf16.msra.mxu1 %v3980_v43  ;;  %3967 = vmatprep.subr.bf16.mxu0 %v3966_v44  ;;  %v3425_v43 = vld [vmem:[%s6847_s0 + $0x6b8] sm:$0xff]  ;;  %v3443_v32 = vld [vmem:[%s6847_s0 + $0x748] sm:$0xff] }
  0x54   :  { %3983 = vmatprep.subr.bf16.mxu1 %v3982_v48  ;;  %711 = vmatprep.mubr.f32.mxu0 %v4353_v3  ;;  %v3441_v44 = vld [vmem:[%s6847_s0 + $0x738] sm:$0xff]  ;;  %v4002_v48 = vpack.c.bf16 %v3439_v41, %v3423_v40  ;;  %v3426_v40 = vld [vmem:[%s6847_s0 + $0x6c0] sm:$0xff] }
  0x55   :  { %788 = vmatprep.mubr.f32.mxu1 %v4353_v3  ;;  %3351 = vmatmul.mubr.msk.f32.gmra.mrb[14].mxu0 %vm172_vm0, %v4557_v19  ;;  %v4018_v52 = vpack.c.bf16 %v3441_v44, %v3425_v43  ;;  %v3442_v41 = vld [vmem:[%s6847_s0 + $0x740] sm:$0xff]  ;;  %v3444_v44 = vld [vmem:[%s6847_s0 + $0x750] sm:$0xff] }
  0x56   :  { %3969 = vmatpush1.bf16.msra.mxu0 %v3968_v54  ;;  %3353 = vmatmul.mubr.msk.f32.gmra.mrb[14].mxu1 %vm172_vm0, %v4557_v19  ;;  %v3455_v54 = vld [vmem:[%s6847_s0 + $0x7a8] sm:$0xff]  ;;  %v4036_v49 = vpack.c.bf16 %v3442_v41, %v3426_v40 }
  0x57   :  { %3985 = vmatpush1.bf16.msra.mxu1 %v3984_v55  ;;  %3971 = vmatprep.subr.bf16.mxu0 %v3970_v56  ;;  %v3471_v55 = vld [vmem:[%s6847_s0 + $0x828] sm:$0xff]  ;;  %v3457_v56 = vld [vmem:[%s6847_s0 + $0x7b8] sm:$0xff] }
  0x58   :  { %3987 = vmatprep.subr.bf16.mxu1 %v3986_v60  ;;  %1036 = vmatprep.mubr.f32.mxu0 %v4353_v3  ;;  %v4006_v60 = vpack.c.bf16 %v3471_v55, %v3455_v54  ;;  %v4022_v63 = vpack.c.bf16 %v3473_v57, %v3457_v56  ;;  %v3460_v55 = vld [vmem:[%s6847_s0 + $0x7d0] sm:$0xff] }
  0x59   :  { %1113 = vmatprep.mubr.f32.mxu1 %v4353_v3  ;;  %v3476_v56 = vld [vmem:[%s6847_s0 + $0x850] sm:$0xff] }
  0x5a   :  { %3973 = vmatpush1.bf16.msra.mxu0 %v3972_v4  ;;  %v4008_v4 = vpack.c.bf16 %v3470_v62, %v3454_v61  ;;  %v3367_v61 = vld [vmem:[%s6847_s0 + $0x4e8] sm:$0xff] }
  0x5b   :  { %3989 = vmatpush1.bf16.msra.mxu1 %v3988_v6  ;;  %3975 = vmatprep.subr.bf16.mxu0 %v3974_v7  ;;  %v3487_v6 = vld [vmem:[%s6847_s0 + $0x8a8] sm:$0xff]  ;;  %v3489_v7 = vld [vmem:[%s6847_s0 + $0x8b8] sm:$0xff] }
  0x5c   :  { %3991 = vmatprep.subr.bf16.mxu1 %v3990_v10  ;;  %v3365_v10 = vld [vmem:[%s6847_s0 + $0x4d8] sm:$0xff]  ;;  %v3383_v62 = vld [vmem:[%s6847_s0 + $0x568] sm:$0xff] }
  0x5d   :  { %v4042_v21 = vpack.c.bf16 %v3381_v11, %v3365_v10  ;;  %v4058_v9 = vpack.c.bf16 %v3383_v62, %v3367_v61  ;;  %v3399_v10 = vld [vmem:[%s6847_s0 + $0x5e8] sm:$0xff] }
  0x5e   :  { %3977 = vmatpush1.bf16.msra.mxu0 %v3976_v13  ;;  %v3378_v13 = vld [vmem:[%s6847_s0 + $0x540] sm:$0xff]  ;;  %v3547_v61 = vld [vmem:[%s6847_s0 + $0xa08] sm:$0xff] }
  0x5f   :  { %3993 = vmatpush1.bf16.msra.mxu1 %v3992_v14  ;;  %988 = vmatprep.subr.mxu0 %v3483_v15  ;;  %v3486_v14 = vld [vmem:[%s6847_s0 + $0x8a0] sm:$0xff]  ;;  %v3364_v15 = vld [vmem:[%s6847_s0 + $0x4d0] sm:$0xff]  ;;  %v4028_v22 = vpack.c.bf16 %v3378_v13, %v3362_v12  ;;  %v3415_v13 = vld [vmem:[%s6847_s0 + $0x668] sm:$0xff] }
  0x60   :  { %1065 = vmatprep.subr.mxu1 %v3485_v16  ;;  %v3380_v16 = vld [vmem:[%s6847_s0 + $0x550] sm:$0xff] }
  0x61   :  { %v4044_v26 = vpack.c.bf16 %v3380_v16, %v3364_v15  ;;  %v3417_v15 = vld [vmem:[%s6847_s0 + $0x678] sm:$0xff] }
  0x62   :  { %989 = vmatpush1.msra.mxu0 %v3482_v24  ;;  %v3397_v24 = vld [vmem:[%s6847_s0 + $0x5d8] sm:$0xff] }
  0x63   :  { %1066 = vmatpush1.msra.mxu1 %v3484_v27  ;;  %3498 = vmatmul.mubr.msk.f32.vlgmr.msra.gmra.mrb[16].mxu0 %vm172_vm0, %v4518_v0  ;;  %v3394_v27 = vld [vmem:[%s6847_s0 + $0x5c0] sm:$0xff]  ;;  %v4046_v36 = vpack.c.bf16 %v3413_v25, %v3397_v24  ;;  %v4062_v24 = vpack.c.bf16 %v3415_v13, %v3399_v10  ;;  %v3433_v25 = vld [vmem:[%s6847_s0 + $0x6f8] sm:$0xff]  ;;  %v3564_v10 = vld [vmem:[%s6847_s0 + $0xa90] sm:$0xff] }
  0x64   :  { %3500 = vmatmul.mubr.msk.f32.vlgmr.msra.gmra.mrb[16].mxu1 %vm172_vm0, %v4518_v0  ;;  %3995 = vmatprep.subr.bf16.mxu0 %v3994_v28  ;;  %v3410_v28 = vld [vmem:[%s6847_s0 + $0x640] sm:$0xff] }
  0x65   :  { %4011 = vmatprep.subr.bf16.mxu1 %v4010_v30  ;;  %3997 = vmatpush1.bf16.msra.mxu0 %v3996_v31  ;;  %v3412_v30 = vld [vmem:[%s6847_s0 + $0x650] sm:$0xff]  ;;  %v3427_v31 = vld [vmem:[%s6847_s0 + $0x6c8] sm:$0xff]  ;;  %v4032_v37 = vpack.c.bf16 %v3410_v28, %v3394_v27 }
  0x66   :  { %4013 = vmatpush1.bf16.msra.mxu1 %v4012_v35  ;;  %1042 = vmatprep.mubr.f32.mxu0 %v4353_v3  ;;  %v3445_v35 = vld [vmem:[%s6847_s0 + $0x758] sm:$0xff]  ;;  %v4048_v38 = vpack.c.bf16 %v3412_v30, %v3396_v29  ;;  %v4034_v39 = vpack.c.bf16 %v3443_v32, %v3427_v31  ;;  %v3446_v31 = vld [vmem:[%s6847_s0 + $0x760] sm:$0xff]  ;;  %v3432_v32 = vld [vmem:[%s6847_s0 + $0x6f0] sm:$0xff] }
  0x67   :  { %1119 = vmatprep.mubr.f32.mxu1 %v4353_v3  ;;  %3499 = vmatmul.mubr.msk.f32.gmra.mrb[18].mxu0 %vm172_vm0, %v4557_v19  ;;  %v4050_v43 = vpack.c.bf16 %v3445_v35, %v3429_v34  ;;  %v3448_v34 = vld [vmem:[%s6847_s0 + $0x770] sm:$0xff]  ;;  %v3463_v35 = vld [vmem:[%s6847_s0 + $0x7e8] sm:$0xff] }
  0x68   :  { %3501 = vmatmul.mubr.msk.f32.gmra.mrb[18].mxu1 %vm172_vm0, %v4557_v19  ;;  %3999 = vmatprep.subr.bf16.mxu0 %v3998_v42  ;;  %v3428_v42 = vld [vmem:[%s6847_s0 + $0x6d0] sm:$0xff]  ;;  %v4084_v40 = vpack.c.bf16 %v3448_v34, %v3432_v32  ;;  %v3626_v34 = vld [vmem:[%s6847_s0 + $0xc80] sm:$0xff] }
  0x69   :  { %4015 = vmatprep.subr.bf16.mxu1 %v4014_v45  ;;  %4001 = vmatpush1.bf16.msra.mxu0 %v4000_v46  ;;  %v3459_v45 = vld [vmem:[%s6847_s0 + $0x7c8] sm:$0xff]  ;;  %v4052_v50 = vpack.c.bf16 %v3444_v44, %v3428_v42  ;;  %v3478_v42 = vld [vmem:[%s6847_s0 + $0x860] sm:$0xff]  ;;  %v3464_v44 = vld [vmem:[%s6847_s0 + $0x7f0] sm:$0xff] }
  0x6a   :  { %4017 = vmatpush1.bf16.msra.mxu1 %v4016_v47  ;;  %4003 = vmatprep.subr.bf16.mxu0 %v4002_v48  ;;  %v3475_v46 = vld [vmem:[%s6847_s0 + $0x848] sm:$0xff]  ;;  %v3461_v47 = vld [vmem:[%s6847_s0 + $0x7d8] sm:$0xff] }
  0x6b   :  { %4019 = vmatprep.subr.bf16.mxu1 %v4018_v52  ;;  %1190 = vmatprep.mubr.f32.mxu0 %v4353_v3  ;;  %v3477_v48 = vld [vmem:[%s6847_s0 + $0x858] sm:$0xff]  ;;  %v4038_v51 = vpack.c.bf16 %v3475_v46, %v3459_v45  ;;  %v3458_v52 = vld [vmem:[%s6847_s0 + $0x7c0] sm:$0xff]  ;;  %v3480_v45 = vld [vmem:[%s6847_s0 + $0x870] sm:$0xff] }
  0x6c   :  { %1267 = vmatprep.mubr.f32.mxu1 %v4353_v3  ;;  %v4054_v54 = vpack.c.bf16 %v3477_v48, %v3461_v47  ;;  %v4040_v57 = vpack.c.bf16 %v3474_v53, %v3458_v52  ;;  %v4088_v47 = vpack.c.bf16 %v3480_v45, %v3464_v44  ;;  %v3495_v48 = vld [vmem:[%s6847_s0 + $0x8e8] sm:$0xff]  ;;  %v3517_v52 = vld [vmem:[%s6847_s0 + $0x918] sm:$0xff]  ;;  %v3518_v45 = vld [vmem:[%s6847_s0 + $0x920] sm:$0xff] }
  0x6d   :  { %4005 = vmatpush1.bf16.msra.mxu0 %v4004_v58  ;;  %v4056_v58 = vpack.c.bf16 %v3476_v56, %v3460_v55  ;;  %v3533_v53 = vld [vmem:[%s6847_s0 + $0x998] sm:$0xff]  ;;  %v3530_v55 = vld [vmem:[%s6847_s0 + $0x980] sm:$0xff] }
  0x6e   :  { %4021 = vmatpush1.bf16.msra.mxu1 %v4020_v59  ;;  %4007 = vmatprep.subr.bf16.mxu0 %v4006_v60  ;;  %v3491_v59 = vld [vmem:[%s6847_s0 + $0x8c8] sm:$0xff]  ;;  %v3493_v60 = vld [vmem:[%s6847_s0 + $0x8d8] sm:$0xff]  ;;  %v3494_v56 = vld [vmem:[%s6847_s0 + $0x8e0] sm:$0xff]  ;;  %v4106_v62 = vpack.c.bf16 %v3533_v53, %v3517_v52 }
  0x6f   :  { %4023 = vmatprep.subr.bf16.mxu1 %v4022_v63  ;;  %v3369_v63 = vld [vmem:[%s6847_s0 + $0x4f8] sm:$0xff]  ;;  %v3551_v52 = vld [vmem:[%s6847_s0 + $0xa28] sm:$0xff] }
  0x70   :  { %v4074_v11 = vpack.c.bf16 %v3385_v1, %v3369_v63  ;;  %v3563_v1 = vld [vmem:[%s6847_s0 + $0xa88] sm:$0xff]  ;;  %v3537_v44 = vld [vmem:[%s6847_s0 + $0x9b8] sm:$0xff] }
  0x71   :  { %4009 = vmatpush1.bf16.msra.mxu0 %v4008_v4  ;;  %v3382_v4 = vld [vmem:[%s6847_s0 + $0x560] sm:$0xff]  ;;  %v4094_v13 = vpack.c.bf16 %v3563_v1, %v3547_v61  ;;  %v3552_v61 = vld [vmem:[%s6847_s0 + $0xa30] sm:$0xff]  ;;  %v3599_v1 = vld [vmem:[%s6847_s0 + $0xba8] sm:$0xff] }
  0x72   :  { %4025 = vmatpush1.bf16.msra.mxu1 %v4024_v5  ;;  %1142 = vmatprep.subr.mxu0 %v3487_v6  ;;  %v3490_v5 = vld [vmem:[%s6847_s0 + $0x8c0] sm:$0xff]  ;;  %v3368_v6 = vld [vmem:[%s6847_s0 + $0x4f0] sm:$0xff]  ;;  %v4060_v12 = vpack.c.bf16 %v3382_v4, %v3366_v2  ;;  %v3549_v2 = vld [vmem:[%s6847_s0 + $0xa18] sm:$0xff] }
  0x73   :  { %1219 = vmatprep.subr.mxu1 %v3489_v7  ;;  %v3384_v7 = vld [vmem:[%s6847_s0 + $0x570] sm:$0xff]  ;;  %v3565_v4 = vld [vmem:[%s6847_s0 + $0xa98] sm:$0xff] }
  0x74   :  { %v4076_v16 = vpack.c.bf16 %v3384_v7, %v3368_v6  ;;  %v3546_v6 = vld [vmem:[%s6847_s0 + $0xa00] sm:$0xff] }
  0x75   :  { %1143 = vmatpush1.msra.mxu0 %v3486_v14  ;;  %v3401_v14 = vld [vmem:[%s6847_s0 + $0x5f8] sm:$0xff]  ;;  %v3562_v7 = vld [vmem:[%s6847_s0 + $0xa80] sm:$0xff] }
  0x76   :  { %1220 = vmatpush1.msra.mxu1 %v3488_v17  ;;  %3502 = vmatmul.mubr.msk.f32.vlgmr.msra.gmra.mrb[20].mxu0 %vm172_vm0, %v4518_v0  ;;  %v3398_v17 = vld [vmem:[%s6847_s0 + $0x5e0] sm:$0xff]  ;;  %v4078_v27 = vpack.c.bf16 %v3417_v15, %v3401_v14  ;;  %v3581_v14 = vld [vmem:[%s6847_s0 + $0xb18] sm:$0xff] }
  0x77   :  { %3504 = vmatmul.mubr.msk.f32.vlgmr.msra.gmra.mrb[20].mxu1 %vm172_vm0, %v4518_v0  ;;  %4027 = vmatprep.subr.bf16.mxu0 %v4026_v18  ;;  %v3414_v18 = vld [vmem:[%s6847_s0 + $0x660] sm:$0xff]  ;;  %v3597_v15 = vld [vmem:[%s6847_s0 + $0xb98] sm:$0xff] }
  0x78   :  { %4043 = vmatprep.subr.bf16.mxu1 %v4042_v21  ;;  %4029 = vmatpush1.bf16.msra.mxu0 %v4028_v22  ;;  %v3416_v21 = vld [vmem:[%s6847_s0 + $0x670] sm:$0xff]  ;;  %v3431_v22 = vld [vmem:[%s6847_s0 + $0x6e8] sm:$0xff]  ;;  %v4064_v28 = vpack.c.bf16 %v3414_v18, %v3398_v17  ;;  %v4096_v17 = vpack.c.bf16 %v3562_v7, %v3546_v6 }
  0x79   :  { %4045 = vmatpush1.bf16.msra.mxu1 %v4044_v26  ;;  %1196 = vmatprep.mubr.f32.mxu0 %v4353_v3  ;;  %v3449_v26 = vld [vmem:[%s6847_s0 + $0x778] sm:$0xff]  ;;  %v4080_v29 = vpack.c.bf16 %v3416_v21, %v3400_v20  ;;  %v4066_v30 = vpack.c.bf16 %v3447_v23, %v3431_v22  ;;  %v3578_v21 = vld [vmem:[%s6847_s0 + $0xb00] sm:$0xff]  ;;  %v3580_v23 = vld [vmem:[%s6847_s0 + $0xb10] sm:$0xff] }
  0x7a   :  { %1273 = vmatprep.mubr.f32.mxu1 %v4353_v3  ;;  %3503 = vmatmul.mubr.msk.f32.gmra.mrb[22].mxu0 %vm172_vm0, %v4557_v19  ;;  %v3594_v22 = vld [vmem:[%s6847_s0 + $0xb80] sm:$0xff] }
  0x7b   :  { %3505 = vmatmul.mubr.msk.f32.gmra.mrb[22].mxu1 %vm172_vm0, %v4557_v19  ;;  %4031 = vmatprep.subr.bf16.mxu0 %v4030_v33  ;;  %v4082_v33 = vpack.c.bf16 %v3449_v26, %v3433_v25  ;;  %v4114_v25 = vpack.c.bf16 %v3597_v15, %v3581_v14  ;;  %v3596_v26 = vld [vmem:[%s6847_s0 + $0xb90] sm:$0xff] }
  0x7c   :  { %4047 = vmatprep.subr.bf16.mxu1 %v4046_v36  ;;  %4033 = vmatpush1.bf16.msra.mxu0 %v4032_v37  ;;  %v3479_v36 = vld [vmem:[%s6847_s0 + $0x868] sm:$0xff]  ;;  %v3465_v37 = vld [vmem:[%s6847_s0 + $0x7f8] sm:$0xff]  ;;  %v3600_v15 = vld [vmem:[%s6847_s0 + $0xbb0] sm:$0xff] }
  0x7d   :  { %4049 = vmatpush1.bf16.msra.mxu1 %v4048_v38  ;;  %4035 = vmatprep.subr.bf16.mxu0 %v4034_v39  ;;  %v3481_v38 = vld [vmem:[%s6847_s0 + $0x878] sm:$0xff]  ;;  %v4070_v41 = vpack.c.bf16 %v3479_v36, %v3463_v35  ;;  %v3612_v36 = vld [vmem:[%s6847_s0 + $0xc10] sm:$0xff] }
  0x7e   :  { %4051 = vmatprep.subr.bf16.mxu1 %v4050_v43  ;;  %1344 = vmatprep.mubr.f32.mxu0 %v4353_v3  ;;  %v4086_v43 = vpack.c.bf16 %v3481_v38, %v3465_v37  ;;  %v3628_v37 = vld [vmem:[%s6847_s0 + $0xc90] sm:$0xff] }
  0x7f   :  { %1421 = vmatprep.mubr.f32.mxu1 %v4353_v3 }
  0x80   :  { %4037 = vmatpush1.bf16.msra.mxu0 %v4036_v49  ;;  %v3497_v49 = vld [vmem:[%s6847_s0 + $0x8f8] sm:$0xff] }
  0x81   :  { %4053 = vmatpush1.bf16.msra.mxu1 %v4052_v50  ;;  %4039 = vmatprep.subr.bf16.mxu0 %v4038_v51  ;;  %v3515_v50 = vld [vmem:[%s6847_s0 + $0x908] sm:$0xff] }
  0x82   :  { %4055 = vmatprep.subr.bf16.mxu1 %v4054_v54  ;;  %v3531_v51 = vld [vmem:[%s6847_s0 + $0x988] sm:$0xff]  ;;  %v3514_v54 = vld [vmem:[%s6847_s0 + $0x900] sm:$0xff] }
  0x83   :  { %v4092_v63 = vpack.c.bf16 %v3530_v55, %v3514_v54  ;;  %v3567_v55 = vld [vmem:[%s6847_s0 + $0xaa8] sm:$0xff] }
  0x84   :  { %4041 = vmatpush1.bf16.msra.mxu0 %v4040_v57  ;;  %v3516_v57 = vld [vmem:[%s6847_s0 + $0x910] sm:$0xff] }
  0x85   :  { %4057 = vmatpush1.bf16.msra.mxu1 %v4056_v58  ;;  %1296 = vmatprep.subr.mxu0 %v3491_v59  ;;  %v3532_v58 = vld [vmem:[%s6847_s0 + $0x990] sm:$0xff] }
  0x86   :  { %1373 = vmatprep.subr.mxu1 %v3493_v60  ;;  %v3496_v59 = vld [vmem:[%s6847_s0 + $0x8f0] sm:$0xff]  ;;  %v4090_v60 = vpack.c.bf16 %v3531_v51, %v3515_v50 }
  0x87   :  { %v3644_v50 = vld [vmem:[%s6847_s0 + $0xd10] sm:$0xff] }
  0x88   :  { %1297 = vmatpush1.msra.mxu0 %v3490_v5  ;;  %v4108_v5 = vpack.c.bf16 %v3532_v58, %v3516_v57  ;;  %v3569_v57 = vld [vmem:[%s6847_s0 + $0xab8] sm:$0xff] }
  0x89   :  { %1374 = vmatpush1.msra.mxu1 %v3492_v8  ;;  %3506 = vmatmul.mubr.msk.f32.vlgmr.msra.gmra.mrb[24].mxu0 %vm172_vm0, %v4518_v0  ;;  %v3548_v8 = vld [vmem:[%s6847_s0 + $0xa10] sm:$0xff] }
  0x8a   :  { %3508 = vmatmul.mubr.msk.f32.vlgmr.msra.gmra.mrb[24].mxu1 %vm172_vm0, %v4518_v0  ;;  %4059 = vmatprep.subr.bf16.mxu0 %v4058_v9  ;;  %v3430_v0 = vld [vmem:[%s6847_s0 + $0x6e0] sm:$0xff]  ;;  %v4112_v18 = vpack.c.bf16 %v3564_v10, %v3548_v8 }
  0x8b   :  { %4075 = vmatprep.subr.bf16.mxu1 %v4074_v11  ;;  %4061 = vmatpush1.bf16.msra.mxu0 %v4060_v12  ;;  %v4068_v39 = vpack.c.bf16 %v3446_v31, %v3430_v0  ;;  %v5389_v9 = vld [vmem:[%s6848_s1] sm:$0xff]  ;;  %v3579_v11 = vld [vmem:[%s6847_s0 + $0xb08] sm:$0xff]  ;;  %v4100_v0 = vpack.c.bf16 %v3594_v22, %v3578_v21  ;;  %v4116_v31 = vpack.c.bf16 %v3596_v26, %v3580_v23 }
  0x8c   :  { %4077 = vmatpush1.bf16.msra.mxu1 %v4076_v16  ;;  %1350 = vmatprep.mubr.f32.mxu0 %v4353_v3  ;;  %v3595_v12 = vld [vmem:[%s6847_s0 + $0xb88] sm:$0xff]  ;;  %v4110_v16 = vpack.c.bf16 %v3565_v4, %v3549_v2  ;;  %v4126_v2 = vpack.c.bf16 %v3567_v55, %v3551_v52  ;;  %v3585_v4 = vld [vmem:[%s6847_s0 + $0xb38] sm:$0xff]  ;;  %v3630_v26 = vld [vmem:[%s6847_s0 + $0xca0] sm:$0xff] }
  0x8d   :  { %1427 = vmatprep.mubr.f32.mxu1 %v4353_v3  ;;  %3507 = vmatmul.mubr.msk.f32.gmra.mrb[26].mxu0 %vm172_vm0, %v4557_v19  ;;  %v4098_v20 = vpack.c.bf16 %v3595_v12, %v3579_v11  ;;  %v3582_v11 = vld [vmem:[%s6847_s0 + $0xb20] sm:$0xff]  ;;  %v3556_v52 = vld [vmem:[%s6847_s0 + $0xa50] sm:$0xff]  ;;  %v3603_v55 = vld [vmem:[%s6847_s0 + $0xbc8] sm:$0xff] }
  0x8e   :  { %3509 = vmatmul.mubr.msk.f32.gmra.mrb[26].mxu1 %vm172_vm0, %v4557_v19  ;;  %4063 = vmatprep.subr.bf16.mxu0 %v4062_v24  ;;  %v3462_v19 = vld [vmem:[%s6847_s0 + $0x7e0] sm:$0xff]  ;;  %v5424_v24 = vld [vmem:[%s6848_s1 + $0x8] sm:$0xff] }
  0x8f   :  { %4079 = vmatprep.subr.bf16.mxu1 %v4078_v27  ;;  %4065 = vmatpush1.bf16.msra.mxu0 %v4064_v28  ;;  %v4072_v46 = vpack.c.bf16 %v3478_v42, %v3462_v19  ;;  %v3611_v27 = vld [vmem:[%s6847_s0 + $0xc08] sm:$0xff]  ;;  %v3598_v12 = vld [vmem:[%s6847_s0 + $0xba0] sm:$0xff] }
  0x90   :  { %4081 = vmatpush1.bf16.msra.mxu1 %v4080_v29  ;;  %4067 = vmatprep.subr.bf16.mxu0 %v4066_v30  ;;  %v3627_v28 = vld [vmem:[%s6847_s0 + $0xc88] sm:$0xff]  ;;  %v3613_v29 = vld [vmem:[%s6847_s0 + $0xc18] sm:$0xff]  ;;  %v4132_v21 = vpack.c.bf16 %v3598_v12, %v3582_v11 }
  0x91   :  { %4083 = vmatprep.subr.bf16.mxu1 %v4082_v33  ;;  %1498 = vmatprep.mubr.f32.mxu0 %v4353_v3  ;;  %v3629_v30 = vld [vmem:[%s6847_s0 + $0xc98] sm:$0xff]  ;;  %v4102_v32 = vpack.c.bf16 %v3627_v28, %v3611_v27  ;;  %v3610_v33 = vld [vmem:[%s6847_s0 + $0xc00] sm:$0xff]  ;;  %v3519_v19 = vld [vmem:[%s6847_s0 + $0x928] sm:$0xff] }
  0x92   :  { %1575 = vmatprep.mubr.f32.mxu1 %v4353_v3  ;;  %v4118_v35 = vpack.c.bf16 %v3629_v30, %v3613_v29  ;;  %v4104_v38 = vpack.c.bf16 %v3626_v34, %v3610_v33  ;;  %v3535_v42 = vld [vmem:[%s6847_s0 + $0x9a8] sm:$0xff]  ;;  %v3616_v28 = vld [vmem:[%s6847_s0 + $0xc30] sm:$0xff] }
  0x93   :  { %4069 = vmatpush1.bf16.msra.mxu0 %v4068_v39  ;;  %v4120_v39 = vpack.c.bf16 %v3628_v37, %v3612_v36  ;;  %v4122_v51 = vpack.c.bf16 %v3535_v42, %v3519_v19  ;;  %v3632_v29 = vld [vmem:[%s6847_s0 + $0xcb0] sm:$0xff]  ;;  %v3523_v33 = vld [vmem:[%s6847_s0 + $0x948] sm:$0xff]  ;;  %v3541_v36 = vld [vmem:[%s6847_s0 + $0x9d8] sm:$0xff] }
  0x94   :  { %4085 = vmatpush1.bf16.msra.mxu1 %v4084_v40  ;;  %4071 = vmatprep.subr.bf16.mxu0 %v4070_v41  ;;  %v3643_v40 = vld [vmem:[%s6847_s0 + $0xd08] sm:$0xff]  ;;  %v3645_v41 = vld [vmem:[%s6847_s0 + $0xd18] sm:$0xff]  ;;  %v3522_v37 = vld [vmem:[%s6847_s0 + $0x940] sm:$0xff] }
  0x95   :  { %4087 = vmatprep.subr.bf16.mxu1 %v4086_v43  ;;  %v3521_v43 = vld [vmem:[%s6847_s0 + $0x938] sm:$0xff]  ;;  %v3539_v34 = vld [vmem:[%s6847_s0 + $0x9c8] sm:$0xff]  ;;  %v3648_v19 = vld [vmem:[%s6847_s0 + $0xd30] sm:$0xff] }
  0x96   :  { %v4138_v53 = vpack.c.bf16 %v3537_v44, %v3521_v43  ;;  %v4154_v42 = vpack.c.bf16 %v3539_v34, %v3523_v33  ;;  %v3555_v43 = vld [vmem:[%s6847_s0 + $0xa48] sm:$0xff]  ;;  %v3652_v33 = vld [vmem:[%s6847_s0 + $0xd50] sm:$0xff] }
  0x97   :  { %4073 = vmatpush1.bf16.msra.mxu0 %v4072_v46  ;;  %v3534_v46 = vld [vmem:[%s6847_s0 + $0x9a0] sm:$0xff] }
  0x98   :  { %4089 = vmatpush1.bf16.msra.mxu1 %v4088_v47  ;;  %1450 = vmatprep.subr.mxu0 %v3495_v48  ;;  %v3642_v47 = vld [vmem:[%s6847_s0 + $0xd00] sm:$0xff]  ;;  %v3520_v48 = vld [vmem:[%s6847_s0 + $0x930] sm:$0xff]  ;;  %v4124_v54 = vpack.c.bf16 %v3534_v46, %v3518_v45  ;;  %v3571_v46 = vld [vmem:[%s6847_s0 + $0xac8] sm:$0xff] }
  0x99   :  { %1527 = vmatprep.subr.mxu1 %v3497_v49  ;;  %v3536_v49 = vld [vmem:[%s6847_s0 + $0x9b0] sm:$0xff] }
  0x9a   :  { %v4140_v58 = vpack.c.bf16 %v3536_v49, %v3520_v48  ;;  %v3573_v48 = vld [vmem:[%s6847_s0 + $0xad8] sm:$0xff] }
  0x9b   :  { %1451 = vmatpush1.msra.mxu0 %v3494_v56  ;;  %v3553_v56 = vld [vmem:[%s6847_s0 + $0xa38] sm:$0xff] }
  0x9c   :  { %1528 = vmatpush1.msra.mxu1 %v3496_v59  ;;  %3510 = vmatmul.mubr.msk.f32.vlgmr.msra.gmra.mrb[28].mxu0 %vm172_vm0, %v5389_v9  ;;  %v3550_v59 = vld [vmem:[%s6847_s0 + $0xa20] sm:$0xff]  ;;  %v4142_v6 = vpack.c.bf16 %v3569_v57, %v3553_v56  ;;  %v4158_v56 = vpack.c.bf16 %v3571_v46, %v3555_v43  ;;  %v3589_v57 = vld [vmem:[%s6847_s0 + $0xb58] sm:$0xff]  ;;  %v3560_v43 = vld [vmem:[%s6847_s0 + $0xa70] sm:$0xff] }
  0x9d   :  { %3512 = vmatmul.mubr.msk.f32.vlgmr.msra.gmra.mrb[28].mxu1 %vm172_vm0, %v5389_v9  ;;  %4091 = vmatprep.subr.bf16.mxu0 %v4090_v60  ;;  %v3566_v60 = vld [vmem:[%s6847_s0 + $0xaa0] sm:$0xff]  ;;  %v3607_v46 = vld [vmem:[%s6847_s0 + $0xbe8] sm:$0xff] }
  0x9e   :  { %4107 = vmatprep.subr.bf16.mxu1 %v4106_v62  ;;  %4093 = vmatpush1.bf16.msra.mxu0 %v4092_v63  ;;  %v3568_v62 = vld [vmem:[%s6847_s0 + $0xab0] sm:$0xff]  ;;  %v3583_v63 = vld [vmem:[%s6847_s0 + $0xb28] sm:$0xff]  ;;  %v4128_v7 = vpack.c.bf16 %v3566_v60, %v3550_v59 }
  0x9f   :  { %4109 = vmatpush1.bf16.msra.mxu1 %v4108_v5  ;;  %1504 = vmatprep.mubr.f32.mxu0 %v4353_v3  ;;  %v3601_v5 = vld [vmem:[%s6847_s0 + $0xbb8] sm:$0xff]  ;;  %v4144_v8 = vpack.c.bf16 %v3568_v62, %v3552_v61  ;;  %v4130_v10 = vpack.c.bf16 %v3599_v1, %v3583_v63  ;;  %v3586_v63 = vld [vmem:[%s6847_s0 + $0xb40] sm:$0xff] }
  0xa0   :  { %1581 = vmatprep.mubr.f32.mxu1 %v4353_v3  ;;  %3511 = vmatmul.mubr.msk.f32.gmra.mrb[30].mxu0 %vm172_vm0, %v5424_v24  ;;  %v4146_v14 = vpack.c.bf16 %v3601_v5, %v3585_v4  ;;  %v3602_v1 = vld [vmem:[%s6847_s0 + $0xbc0] sm:$0xff]  ;;  %v3604_v5 = vld [vmem:[%s6847_s0 + $0xbd0] sm:$0xff] }
  0xa1   :  { %3513 = vmatmul.mubr.msk.f32.gmra.mrb[30].mxu1 %vm172_vm0, %v5424_v24  ;;  %4095 = vmatprep.subr.bf16.mxu0 %v4094_v13  ;;  %v3584_v13 = vld [vmem:[%s6847_s0 + $0xb30] sm:$0xff]  ;;  %v4164_v11 = vpack.c.bf16 %v3602_v1, %v3586_v63 }
  0xa2   :  { %4111 = vmatprep.subr.bf16.mxu1 %v4110_v16  ;;  %4097 = vmatpush1.bf16.msra.mxu0 %v4096_v17  ;;  %v3615_v16 = vld [vmem:[%s6847_s0 + $0xc28] sm:$0xff]  ;;  %v4148_v22 = vpack.c.bf16 %v3600_v15, %v3584_v13  ;;  %v3634_v15 = vld [vmem:[%s6847_s0 + $0xcc0] sm:$0xff] }
  0xa3   :  { %4113 = vmatpush1.bf16.msra.mxu1 %v4112_v18  ;;  %4099 = vmatprep.subr.bf16.mxu0 %v4098_v20  ;;  %v3631_v17 = vld [vmem:[%s6847_s0 + $0xca8] sm:$0xff]  ;;  %v3617_v18 = vld [vmem:[%s6847_s0 + $0xc38] sm:$0xff] }
  0xa4   :  { %4115 = vmatprep.subr.bf16.mxu1 %v4114_v25  ;;  %1861 = vmatprep.mubr.f32.mxu0 %v4353_v3  ;;  %v3633_v20 = vld [vmem:[%s6847_s0 + $0xcb8] sm:$0xff]  ;;  %v4134_v23 = vpack.c.bf16 %v3631_v17, %v3615_v16  ;;  %v3614_v25 = vld [vmem:[%s6847_s0 + $0xc20] sm:$0xff]  ;;  %v3620_v17 = vld [vmem:[%s6847_s0 + $0xc50] sm:$0xff] }
  0xa5   :  { %1938 = vmatprep.mubr.f32.mxu1 %v4353_v3  ;;  %v4150_v27 = vpack.c.bf16 %v3633_v20, %v3617_v18  ;;  %v4136_v30 = vpack.c.bf16 %v3630_v26, %v3614_v25  ;;  %v3636_v18 = vld [vmem:[%s6847_s0 + $0xcd0] sm:$0xff]  ;;  %v3527_v25 = vld [vmem:[%s6847_s0 + $0x968] sm:$0xff] }
  0xa6   :  { %4101 = vmatpush1.bf16.msra.mxu0 %v4100_v0  ;;  %v4152_v0 = vpack.c.bf16 %v3632_v29, %v3616_v28  ;;  %v3543_v26 = vld [vmem:[%s6847_s0 + $0x9e8] sm:$0xff]  ;;  %v3545_v28 = vld [vmem:[%s6847_s0 + $0x9f8] sm:$0xff]  ;;  %v3526_v29 = vld [vmem:[%s6847_s0 + $0x960] sm:$0xff] }
  0xa7   :  { %4117 = vmatpush1.bf16.msra.mxu1 %v4116_v31  ;;  %4103 = vmatprep.subr.bf16.mxu0 %v4102_v32  ;;  %v3647_v31 = vld [vmem:[%s6847_s0 + $0xd28] sm:$0xff]  ;;  %v3649_v32 = vld [vmem:[%s6847_s0 + $0xd38] sm:$0xff]  ;;  %v4186_v34 = vpack.c.bf16 %v3543_v26, %v3527_v25  ;;  %v3656_v25 = vld [vmem:[%s6847_s0 + $0xd70] sm:$0xff] }
  0xa8   :  { %4119 = vmatprep.subr.bf16.mxu1 %v4118_v35  ;;  %v3525_v35 = vld [vmem:[%s6847_s0 + $0x958] sm:$0xff] }
  0xa9   :  { %v4170_v44 = vpack.c.bf16 %v3541_v36, %v3525_v35  ;;  %v3559_v35 = vld [vmem:[%s6847_s0 + $0xa68] sm:$0xff] }
  0xaa   :  { %4105 = vmatpush1.bf16.msra.mxu0 %v4104_v38  ;;  %v3538_v38 = vld [vmem:[%s6847_s0 + $0x9c0] sm:$0xff] }
  0xab   :  { %4121 = vmatpush1.bf16.msra.mxu1 %v4120_v39  ;;  %1813 = vmatprep.subr.mxu0 %v3643_v40  ;;  %v3646_v39 = vld [vmem:[%s6847_s0 + $0xd20] sm:$0xff]  ;;  %v3524_v40 = vld [vmem:[%s6847_s0 + $0x950] sm:$0xff]  ;;  %v4156_v45 = vpack.c.bf16 %v3538_v38, %v3522_v37  ;;  %v3575_v38 = vld [vmem:[%s6847_s0 + $0xae8] sm:$0xff] }
  0xac   :  { %1890 = vmatprep.subr.mxu1 %v3645_v41  ;;  %v3540_v41 = vld [vmem:[%s6847_s0 + $0x9d0] sm:$0xff] }
  0xad   :  { %v4172_v49 = vpack.c.bf16 %v3540_v41, %v3524_v40  ;;  %v3577_v40 = vld [vmem:[%s6847_s0 + $0xaf8] sm:$0xff] }
  0xae   :  { %1814 = vmatpush1.msra.mxu0 %v3642_v47  ;;  %v3557_v47 = vld [vmem:[%s6847_s0 + $0xa58] sm:$0xff] }
  0xaf   :  { %1891 = vmatpush1.msra.mxu1 %v3644_v50  ;;  %3658 = vmatmul.mubr.msk.f32.vlgmr.msra.gmra.mrb[32].mxu0 %vm172_vm0, %v5389_v9  ;;  %v3554_v50 = vld [vmem:[%s6847_s0 + $0xa40] sm:$0xff]  ;;  %v4174_v59 = vpack.c.bf16 %v3573_v48, %v3557_v47  ;;  %v4190_v47 = vpack.c.bf16 %v3575_v38, %v3559_v35  ;;  %v3593_v48 = vld [vmem:[%s6847_s0 + $0xb78] sm:$0xff]  ;;  %v3708_v35 = vld [vmem:[%s6847_s0 + $0xe90] sm:$0xff] }
  0xb0   :  { %3660 = vmatmul.mubr.msk.f32.vlgmr.msra.gmra.mrb[32].mxu1 %vm172_vm0, %v5389_v9  ;;  %4123 = vmatprep.subr.bf16.mxu0 %v4122_v51  ;;  %v3570_v51 = vld [vmem:[%s6847_s0 + $0xac0] sm:$0xff]  ;;  %v3755_v38 = vld [vmem:[%s6847_s0 + $0x1008] sm:$0xff] }
  0xb1   :  { %4139 = vmatprep.subr.bf16.mxu1 %v4138_v53  ;;  %4125 = vmatpush1.bf16.msra.mxu0 %v4124_v54  ;;  %v3572_v53 = vld [vmem:[%s6847_s0 + $0xad0] sm:$0xff]  ;;  %v3587_v54 = vld [vmem:[%s6847_s0 + $0xb48] sm:$0xff]  ;;  %v4160_v60 = vpack.c.bf16 %v3570_v51, %v3554_v50 }
  0xb2   :  { %4141 = vmatpush1.bf16.msra.mxu1 %v4140_v58  ;;  %1867 = vmatprep.mubr.f32.mxu0 %v4353_v3  ;;  %v3605_v58 = vld [vmem:[%s6847_s0 + $0xbd8] sm:$0xff]  ;;  %v4176_v61 = vpack.c.bf16 %v3572_v53, %v3556_v52  ;;  %v4162_v62 = vpack.c.bf16 %v3603_v55, %v3587_v54  ;;  %v3590_v54 = vld [vmem:[%s6847_s0 + $0xb60] sm:$0xff] }
  0xb3   :  { %1944 = vmatprep.mubr.f32.mxu1 %v4353_v3  ;;  %3659 = vmatmul.mubr.msk.f32.gmra.mrb[34].mxu0 %vm172_vm0, %v5424_v24  ;;  %v4178_v4 = vpack.c.bf16 %v3605_v58, %v3589_v57  ;;  %v3606_v55 = vld [vmem:[%s6847_s0 + $0xbe0] sm:$0xff]  ;;  %v3608_v58 = vld [vmem:[%s6847_s0 + $0xbf0] sm:$0xff] }
  0xb4   :  { %3661 = vmatmul.mubr.msk.f32.gmra.mrb[34].mxu1 %vm172_vm0, %v5424_v24  ;;  %4127 = vmatprep.subr.bf16.mxu0 %v4126_v2  ;;  %v3588_v2 = vld [vmem:[%s6847_s0 + $0xb50] sm:$0xff]  ;;  %v4196_v63 = vpack.c.bf16 %v3606_v55, %v3590_v54  ;;  %v3787_v54 = vld [vmem:[%s6847_s0 + $0x1108] sm:$0xff] }
  0xb5   :  { %4143 = vmatprep.subr.bf16.mxu1 %v4142_v6  ;;  %4129 = vmatpush1.bf16.msra.mxu0 %v4128_v7  ;;  %v3619_v6 = vld [vmem:[%s6847_s0 + $0xc48] sm:$0xff]  ;;  %v4180_v12 = vpack.c.bf16 %v3604_v5, %v3588_v2  ;;  %v3638_v5 = vld [vmem:[%s6847_s0 + $0xce0] sm:$0xff] }
  0xb6   :  { %4145 = vmatpush1.bf16.msra.mxu1 %v4144_v8  ;;  %4131 = vmatprep.subr.bf16.mxu0 %v4130_v10  ;;  %v3635_v7 = vld [vmem:[%s6847_s0 + $0xcc8] sm:$0xff]  ;;  %v3621_v8 = vld [vmem:[%s6847_s0 + $0xc58] sm:$0xff] }
  0xb7   :  { %4147 = vmatprep.subr.bf16.mxu1 %v4146_v14  ;;  %2015 = vmatprep.mubr.f32.mxu0 %v4353_v3  ;;  %v3637_v10 = vld [vmem:[%s6847_s0 + $0xcd8] sm:$0xff]  ;;  %v4166_v13 = vpack.c.bf16 %v3635_v7, %v3619_v6  ;;  %v3618_v14 = vld [vmem:[%s6847_s0 + $0xc40] sm:$0xff]  ;;  %v3624_v7 = vld [vmem:[%s6847_s0 + $0xc70] sm:$0xff] }
  0xb8   :  { %2092 = vmatprep.mubr.f32.mxu1 %v4353_v3  ;;  %v4182_v16 = vpack.c.bf16 %v3637_v10, %v3621_v8  ;;  %v4168_v20 = vpack.c.bf16 %v3634_v15, %v3618_v14  ;;  %v3640_v8 = vld [vmem:[%s6847_s0 + $0xcf0] sm:$0xff]  ;;  %v3675_v14 = vld [vmem:[%s6847_s0 + $0xd88] sm:$0xff] }
  0xb9   :  { %4133 = vmatpush1.bf16.msra.mxu0 %v4132_v21  ;;  %v4184_v21 = vpack.c.bf16 %v3636_v18, %v3620_v17  ;;  %v3691_v15 = vld [vmem:[%s6847_s0 + $0xe08] sm:$0xff]  ;;  %v3693_v17 = vld [vmem:[%s6847_s0 + $0xe18] sm:$0xff]  ;;  %v3674_v18 = vld [vmem:[%s6847_s0 + $0xd80] sm:$0xff] }
  0xba   :  { %4149 = vmatpush1.bf16.msra.mxu1 %v4148_v22  ;;  %4135 = vmatprep.subr.bf16.mxu0 %v4134_v23  ;;  %v3651_v22 = vld [vmem:[%s6847_s0 + $0xd48] sm:$0xff]  ;;  %v3653_v23 = vld [vmem:[%s6847_s0 + $0xd58] sm:$0xff]  ;;  %v4218_v26 = vpack.c.bf16 %v3691_v15, %v3675_v14 }
  0xbb   :  { %4151 = vmatprep.subr.bf16.mxu1 %v4150_v27  ;;  %v3529_v27 = vld [vmem:[%s6847_s0 + $0x978] sm:$0xff]  ;;  %v3695_v14 = vld [vmem:[%s6847_s0 + $0xe28] sm:$0xff] }
  0xbc   :  { %v4202_v36 = vpack.c.bf16 %v3545_v28, %v3529_v27  ;;  %v3707_v27 = vld [vmem:[%s6847_s0 + $0xe88] sm:$0xff]  ;;  %v3681_v15 = vld [vmem:[%s6847_s0 + $0xdb8] sm:$0xff] }
  0xbd   :  { %4137 = vmatpush1.bf16.msra.mxu0 %v4136_v30  ;;  %v3542_v30 = vld [vmem:[%s6847_s0 + $0x9e0] sm:$0xff] }
  0xbe   :  { %4153 = vmatpush1.bf16.msra.mxu1 %v4152_v0  ;;  %1967 = vmatprep.subr.mxu0 %v3647_v31  ;;  %v3650_v0 = vld [vmem:[%s6847_s0 + $0xd40] sm:$0xff]  ;;  %v3528_v31 = vld [vmem:[%s6847_s0 + $0x970] sm:$0xff]  ;;  %v4188_v37 = vpack.c.bf16 %v3542_v30, %v3526_v29  ;;  %v3723_v30 = vld [vmem:[%s6847_s0 + $0xf08] sm:$0xff] }
  0xbf   :  { %2044 = vmatprep.subr.mxu1 %v3649_v32  ;;  %v3544_v32 = vld [vmem:[%s6847_s0 + $0x9f0] sm:$0xff] }
  0xc0   :  { %v4204_v41 = vpack.c.bf16 %v3544_v32, %v3528_v31  ;;  %v3725_v31 = vld [vmem:[%s6847_s0 + $0xf18] sm:$0xff] }
  0xc1   :  { %1968 = vmatpush1.msra.mxu0 %v3646_v39  ;;  %v3561_v39 = vld [vmem:[%s6847_s0 + $0xa78] sm:$0xff] }
  0xc2   :  { %2045 = vmatpush1.msra.mxu1 %v3648_v19  ;;  %3662 = vmatmul.mubr.msk.f32.vlgmr.msra.gmra.mrb[36].mxu0 %vm172_vm0, %v5389_v9  ;;  %v3558_v19 = vld [vmem:[%s6847_s0 + $0xa60] sm:$0xff]  ;;  %v4206_v50 = vpack.c.bf16 %v3577_v40, %v3561_v39  ;;  %v4222_v39 = vpack.c.bf16 %v3723_v30, %v3707_v27  ;;  %v3741_v40 = vld [vmem:[%s6847_s0 + $0xf98] sm:$0xff] }
  0xc3   :  { %3664 = vmatmul.mubr.msk.f32.vlgmr.msra.gmra.mrb[36].mxu1 %vm172_vm0, %v5389_v9  ;;  %4155 = vmatprep.subr.bf16.mxu0 %v4154_v42  ;;  %v3574_v42 = vld [vmem:[%s6847_s0 + $0xae0] sm:$0xff]  ;;  %v3713_v30 = vld [vmem:[%s6847_s0 + $0xeb8] sm:$0xff] }
  0xc4   :  { %4171 = vmatprep.subr.bf16.mxu1 %v4170_v44  ;;  %4157 = vmatpush1.bf16.msra.mxu0 %v4156_v45  ;;  %v3576_v44 = vld [vmem:[%s6847_s0 + $0xaf0] sm:$0xff]  ;;  %v3591_v45 = vld [vmem:[%s6847_s0 + $0xb68] sm:$0xff]  ;;  %v4192_v51 = vpack.c.bf16 %v3574_v42, %v3558_v19 }
  0xc5   :  { %4173 = vmatpush1.bf16.msra.mxu1 %v4172_v49  ;;  %2021 = vmatprep.mubr.f32.mxu0 %v4353_v3  ;;  %v3609_v49 = vld [vmem:[%s6847_s0 + $0xbf8] sm:$0xff]  ;;  %v4208_v52 = vpack.c.bf16 %v3576_v44, %v3560_v43  ;;  %v4194_v53 = vpack.c.bf16 %v3607_v46, %v3591_v45  ;;  %v3738_v46 = vld [vmem:[%s6847_s0 + $0xf80] sm:$0xff] }
  0xc6   :  { %2098 = vmatprep.mubr.f32.mxu1 %v4353_v3  ;;  %3663 = vmatmul.mubr.msk.f32.gmra.mrb[38].mxu0 %vm172_vm0, %v5424_v24  ;;  %v4210_v57 = vpack.c.bf16 %v3609_v49, %v3593_v48  ;;  %v3740_v48 = vld [vmem:[%s6847_s0 + $0xf90] sm:$0xff] }
  0xc7   :  { %3665 = vmatmul.mubr.msk.f32.gmra.mrb[38].mxu1 %vm172_vm0, %v5424_v24  ;;  %4159 = vmatprep.subr.bf16.mxu0 %v4158_v56  ;;  %v3592_v56 = vld [vmem:[%s6847_s0 + $0xb70] sm:$0xff] }
  0xc8   :  { %4175 = vmatprep.subr.bf16.mxu1 %v4174_v59  ;;  %4161 = vmatpush1.bf16.msra.mxu0 %v4160_v60  ;;  %v3623_v59 = vld [vmem:[%s6847_s0 + $0xc68] sm:$0xff]  ;;  %v4212_v1 = vpack.c.bf16 %v3608_v58, %v3592_v56  ;;  %v3773_v56 = vld [vmem:[%s6847_s0 + $0x1098] sm:$0xff] }
  0xc9   :  { %4177 = vmatpush1.bf16.msra.mxu1 %v4176_v61  ;;  %4163 = vmatprep.subr.bf16.mxu0 %v4162_v62  ;;  %v3639_v60 = vld [vmem:[%s6847_s0 + $0xce8] sm:$0xff]  ;;  %v3625_v61 = vld [vmem:[%s6847_s0 + $0xc78] sm:$0xff] }
  0xca   :  { %4179 = vmatprep.subr.bf16.mxu1 %v4178_v4  ;;  %2169 = vmatprep.mubr.f32.mxu0 %v4353_v3  ;;  %v3641_v62 = vld [vmem:[%s6847_s0 + $0xcf8] sm:$0xff]  ;;  %v4198_v2 = vpack.c.bf16 %v3639_v60, %v3623_v59  ;;  %v3622_v4 = vld [vmem:[%s6847_s0 + $0xc60] sm:$0xff] }
  0xcb   :  { %2246 = vmatprep.mubr.f32.mxu1 %v4353_v3  ;;  %v4214_v6 = vpack.c.bf16 %v3641_v62, %v3625_v61  ;;  %v4200_v10 = vpack.c.bf16 %v3638_v5, %v3622_v4  ;;  %v3770_v61 = vld [vmem:[%s6847_s0 + $0x1080] sm:$0xff]  ;;  %v3788_v4 = vld [vmem:[%s6847_s0 + $0x1110] sm:$0xff] }
  0xcc   :  { %4165 = vmatpush1.bf16.msra.mxu0 %v4164_v11  ;;  %v4216_v11 = vpack.c.bf16 %v3640_v8, %v3624_v7  ;;  %v3786_v62 = vld [vmem:[%s6847_s0 + $0x1100] sm:$0xff] }
  0xcd   :  { %4181 = vmatpush1.bf16.msra.mxu1 %v4180_v12  ;;  %4167 = vmatprep.subr.bf16.mxu0 %v4166_v13  ;;  %v3655_v12 = vld [vmem:[%s6847_s0 + $0xd68] sm:$0xff]  ;;  %v3657_v13 = vld [vmem:[%s6847_s0 + $0xd78] sm:$0xff]  ;;  %v4232_v8 = vpack.c.bf16 %v3786_v62, %v3770_v61 }
  0xce   :  { %4183 = vmatprep.subr.bf16.mxu1 %v4182_v16  ;;  %v3677_v16 = vld [vmem:[%s6847_s0 + $0xd98] sm:$0xff] }
  0xcf   :  { %v4234_v28 = vpack.c.bf16 %v3693_v17, %v3677_v16  ;;  %v3697_v16 = vld [vmem:[%s6847_s0 + $0xe38] sm:$0xff]  ;;  %v3678_v17 = vld [vmem:[%s6847_s0 + $0xda0] sm:$0xff] }
  0xd0   :  { %4169 = vmatpush1.bf16.msra.mxu0 %v4168_v20  ;;  %v3690_v20 = vld [vmem:[%s6847_s0 + $0xe00] sm:$0xff]  ;;  %v4266_v27 = vpack.c.bf16 %v3697_v16, %v3681_v15 }
  0xd1   :  { %4185 = vmatpush1.bf16.msra.mxu1 %v4184_v21  ;;  %2121 = vmatprep.subr.mxu0 %v3651_v22  ;;  %v3654_v21 = vld [vmem:[%s6847_s0 + $0xd60] sm:$0xff]  ;;  %v3676_v22 = vld [vmem:[%s6847_s0 + $0xd90] sm:$0xff]  ;;  %v4220_v29 = vpack.c.bf16 %v3690_v20, %v3674_v18 }
  0xd2   :  { %2198 = vmatprep.subr.mxu1 %v3653_v23  ;;  %v3692_v23 = vld [vmem:[%s6847_s0 + $0xe10] sm:$0xff]  ;;  %v3694_v18 = vld [vmem:[%s6847_s0 + $0xe20] sm:$0xff] }
  0xd3   :  { %v4236_v32 = vpack.c.bf16 %v3692_v23, %v3676_v22  ;;  %v3802_v20 = vld [vmem:[%s6847_s0 + $0x1180] sm:$0xff]  ;;  %v3696_v22 = vld [vmem:[%s6847_s0 + $0xe30] sm:$0xff] }
  0xd4   :  { %2122 = vmatpush1.msra.mxu0 %v3650_v0  ;;  %v3709_v0 = vld [vmem:[%s6847_s0 + $0xe98] sm:$0xff]  ;;  %v3804_v23 = vld [vmem:[%s6847_s0 + $0x1190] sm:$0xff] }
  0xd5   :  { %2199 = vmatpush1.msra.mxu1 %v3652_v33  ;;  %3666 = vmatmul.mubr.msk.f32.vlgmr.msra.gmra.mrb[40].mxu0 %vm172_vm0, %v5389_v9  ;;  %v3706_v33 = vld [vmem:[%s6847_s0 + $0xe80] sm:$0xff]  ;;  %v4238_v19 = vpack.c.bf16 %v3725_v31, %v3709_v0  ;;  %v3729_v0 = vld [vmem:[%s6847_s0 + $0xf38] sm:$0xff] }
  0xd6   :  { %3668 = vmatmul.mubr.msk.f32.vlgmr.msra.gmra.mrb[40].mxu1 %vm172_vm0, %v5389_v9  ;;  %4187 = vmatprep.subr.bf16.mxu0 %v4186_v34  ;;  %v3722_v34 = vld [vmem:[%s6847_s0 + $0xf00] sm:$0xff] }
  0xd7   :  { %4203 = vmatprep.subr.bf16.mxu1 %v4202_v36  ;;  %4189 = vmatpush1.bf16.msra.mxu0 %v4188_v37  ;;  %v3724_v36 = vld [vmem:[%s6847_s0 + $0xf10] sm:$0xff]  ;;  %v3739_v37 = vld [vmem:[%s6847_s0 + $0xf88] sm:$0xff]  ;;  %v4224_v42 = vpack.c.bf16 %v3722_v34, %v3706_v33  ;;  %v3726_v33 = vld [vmem:[%s6847_s0 + $0xf20] sm:$0xff] }
  0xd8   :  { %4205 = vmatpush1.bf16.msra.mxu1 %v4204_v41  ;;  %2175 = vmatprep.mubr.f32.mxu0 %v4353_v3  ;;  %v3757_v41 = vld [vmem:[%s6847_s0 + $0x1018] sm:$0xff]  ;;  %v4240_v44 = vpack.c.bf16 %v3724_v36, %v3708_v35  ;;  %v4226_v45 = vpack.c.bf16 %v3755_v38, %v3739_v37  ;;  %v3712_v34 = vld [vmem:[%s6847_s0 + $0xeb0] sm:$0xff]  ;;  %v3743_v36 = vld [vmem:[%s6847_s0 + $0xfa8] sm:$0xff] }
  0xd9   :  { %2252 = vmatprep.mubr.f32.mxu1 %v4353_v3  ;;  %3667 = vmatmul.mubr.msk.f32.gmra.mrb[42].mxu0 %vm172_vm0, %v5424_v24  ;;  %v3728_v35 = vld [vmem:[%s6847_s0 + $0xf30] sm:$0xff]  ;;  %v3759_v37 = vld [vmem:[%s6847_s0 + $0x1028] sm:$0xff] }
  0xda   :  { %3669 = vmatmul.mubr.msk.f32.gmra.mrb[42].mxu1 %vm172_vm0, %v5424_v24  ;;  %4191 = vmatprep.subr.bf16.mxu0 %v4190_v47  ;;  %v3754_v47 = vld [vmem:[%s6847_s0 + $0x1000] sm:$0xff] }
  0xdb   :  { %4207 = vmatprep.subr.bf16.mxu1 %v4206_v50  ;;  %4193 = vmatpush1.bf16.msra.mxu0 %v4192_v51  ;;  %v4242_v51 = vpack.c.bf16 %v3757_v41, %v3741_v40  ;;  %v4228_v58 = vpack.c.bf16 %v3754_v47, %v3738_v46  ;;  %v3761_v40 = vld [vmem:[%s6847_s0 + $0x1038] sm:$0xff]  ;;  %v4270_v41 = vpack.c.bf16 %v3729_v0, %v3713_v30  ;;  %v3742_v46 = vld [vmem:[%s6847_s0 + $0xfa0] sm:$0xff]  ;;  %v3700_v30 = vld [vmem:[%s6847_s0 + $0xe50] sm:$0xff] }
  0xdc   :  { %4209 = vmatpush1.bf16.msra.mxu1 %v4208_v52  ;;  %4195 = vmatprep.subr.bf16.mxu0 %v4194_v53  ;;  %v3756_v52 = vld [vmem:[%s6847_s0 + $0x1010] sm:$0xff]  ;;  %v3771_v53 = vld [vmem:[%s6847_s0 + $0x1088] sm:$0xff]  ;;  %v3758_v47 = vld [vmem:[%s6847_s0 + $0x1020] sm:$0xff] }
  0xdd   :  { %4211 = vmatprep.subr.bf16.mxu1 %v4210_v57  ;;  %2323 = vmatprep.mubr.f32.mxu0 %v4353_v3  ;;  %v3789_v57 = vld [vmem:[%s6847_s0 + $0x1118] sm:$0xff]  ;;  %v4244_v59 = vpack.c.bf16 %v3756_v52, %v3740_v48  ;;  %v4230_v60 = vpack.c.bf16 %v3787_v54, %v3771_v53  ;;  %v3744_v48 = vld [vmem:[%s6847_s0 + $0xfb0] sm:$0xff]  ;;  %v4260_v61 = vpack.c.bf16 %v3758_v47, %v3742_v46 }
  0xde   :  { %2400 = vmatprep.mubr.f32.mxu1 %v4353_v3  ;;  %v3760_v54 = vld [vmem:[%s6847_s0 + $0x1030] sm:$0xff]  ;;  %v3749_v47 = vld [vmem:[%s6847_s0 + $0xfd8] sm:$0xff] }
  0xdf   :  { %4197 = vmatpush1.bf16.msra.mxu0 %v4196_v63  ;;  %v4276_v62 = vpack.c.bf16 %v3760_v54, %v3744_v48  ;;  %v3808_v0 = vld [vmem:[%s6847_s0 + $0x11b0] sm:$0xff]  ;;  %v3765_v48 = vld [vmem:[%s6847_s0 + $0x1058] sm:$0xff] }
  0xe0   :  { %4213 = vmatpush1.bf16.msra.mxu1 %v4212_v1  ;;  %4199 = vmatprep.subr.bf16.mxu0 %v4198_v2  ;;  %v4246_v1 = vpack.c.bf16 %v3789_v57, %v3773_v56  ;;  %v3772_v2 = vld [vmem:[%s6847_s0 + $0x1090] sm:$0xff]  ;;  %v3775_v56 = vld [vmem:[%s6847_s0 + $0x10a8] sm:$0xff] }
  0xe1   :  { %4215 = vmatprep.subr.bf16.mxu1 %v4214_v6  ;;  %v3791_v57 = vld [vmem:[%s6847_s0 + $0x1128] sm:$0xff] }
  0xe3   :  { %4201 = vmatpush1.bf16.msra.mxu0 %v4200_v10  ;;  %v4248_v10 = vpack.c.bf16 %v3788_v4, %v3772_v2  ;;  %v3774_v2 = vld [vmem:[%s6847_s0 + $0x10a0] sm:$0xff] }
  0xe4   :  { %4217 = vmatpush1.bf16.msra.mxu1 %v4216_v11  ;;  %2275 = vmatprep.subr.mxu0 %v3655_v12  ;;  %v3803_v11 = vld [vmem:[%s6847_s0 + $0x1188] sm:$0xff]  ;;  %v3805_v12 = vld [vmem:[%s6847_s0 + $0x1198] sm:$0xff]  ;;  %v3790_v4 = vld [vmem:[%s6847_s0 + $0x1120] sm:$0xff] }
  0xe5   :  { %2352 = vmatprep.subr.mxu1 %v3657_v13  ;;  %v3679_v13 = vld [vmem:[%s6847_s0 + $0xda8] sm:$0xff]  ;;  %v4264_v16 = vpack.c.bf16 %v3790_v4, %v3774_v2  ;;  %v4306_v2 = vpack.c.bf16 %v3765_v48, %v3749_v47  ;;  %v3764_v4 = vld [vmem:[%s6847_s0 + $0x1050] sm:$0xff] }
  0xe7   :  { %2276 = vmatpush1.msra.mxu0 %v3654_v21  ;;  %v3680_v21 = vld [vmem:[%s6847_s0 + $0xdb0] sm:$0xff] }
  0xe8   :  { %2353 = vmatpush1.msra.mxu1 %v3656_v25  ;;  %3670 = vmatmul.mubr.msk.f32.vlgmr.msra.gmra.mrb[44].mxu0 %vm172_vm0, %v5389_v9  ;;  %v4250_v25 = vpack.c.bf16 %v3695_v14, %v3679_v13  ;;  %v4268_v31 = vpack.c.bf16 %v3696_v22, %v3680_v21  ;;  %v3683_v21 = vld [vmem:[%s6847_s0 + $0xdc8] sm:$0xff] }
  0xe9   :  { %3672 = vmatmul.mubr.msk.f32.vlgmr.msra.gmra.mrb[44].mxu1 %vm172_vm0, %v5389_v9  ;;  %4219 = vmatprep.subr.bf16.mxu0 %v4218_v26  ;;  %v3711_v26 = vld [vmem:[%s6847_s0 + $0xea8] sm:$0xff] }
  0xea   :  { %4235 = vmatprep.subr.bf16.mxu1 %v4234_v28  ;;  %4221 = vmatpush1.bf16.msra.mxu0 %v4220_v29  ;;  %v5895_v43 = vpop.f32.mrb[0].mxu0  ;;  %v4252_v28 = vpack.c.bf16 %v3694_v18, %v3678_v17  ;;  %v3727_v29 = vld [vmem:[%s6847_s0 + $0xf28] sm:$0xff] }
  0xeb   :  { %4237 = vmatpush1.bf16.msra.mxu1 %v4236_v32  ;;  %2329 = vmatprep.mubr.f32.mxu0 %v4353_v3  ;;  %v5907_v49 = vpop.f32.mrb[0].mxu1  ;;  %v5909_v50 = vpop.f32.mrb[1].mxu0  ;;  %v3710_v32 = vld [vmem:[%s6847_s0 + $0xea0] sm:$0xff]  ;;  %v4254_v38 = vpack.c.bf16 %v3727_v29, %v3711_v26  ;;  %v3807_v18 = vld [vmem:[%s6847_s0 + $0x11a8] sm:$0xff]  ;;  %v3684_v29 = vld [vmem:[%s6847_s0 + $0xdd0] sm:$0xff] }
  0xec   :  { %2406 = vmatprep.mubr.f32.mxu1 %v4353_v3  ;;  %3671 = vmatmul.mubr.msk.f32.gmra.mrb[46].mxu0 %vm172_vm0, %v5424_v24  ;;  %v5923_v55 = vpop.f32.mrb[1].mxu1  ;;  %v3699_v22 = vld [vmem:[%s6847_s0 + $0xe48] sm:$0xff]  ;;  %v3682_v26 = vld [vmem:[%s6847_s0 + $0xdc0] sm:$0xff] }
  0xed   :  { %3673 = vmatmul.mubr.msk.f32.gmra.mrb[46].mxu1 %vm172_vm0, %v5424_v24  ;;  %4223 = vmatprep.subr.bf16.mxu0 %v4222_v39  ;;  %v3745_v39 = vld [vmem:[%s6847_s0 + $0xfb8] sm:$0xff] }
  0xee   :  { %4239 = vmatprep.subr.bf16.mxu1 %v4238_v19  ;;  %4225 = vmatpush1.bf16.msra.mxu0 %v4224_v42  ;;  %v4256_v19 = vpack.c.bf16 %v3726_v33, %v3710_v32  ;;  %v4274_v53 = vpack.c.bf16 %v3761_v40, %v3745_v39  ;;  %v3715_v32 = vld [vmem:[%s6847_s0 + $0xec8] sm:$0xff]  ;;  %v3714_v39 = vld [vmem:[%s6847_s0 + $0xec0] sm:$0xff] }
  0xef   :  { %4241 = vmatpush1.bf16.msra.mxu1 %v4240_v44  ;;  %4227 = vmatprep.subr.bf16.mxu0 %v4226_v45  ;;  %v5939_v63 = vpop.f32.mrb[2].mxu0  ;;  %v4272_v44 = vpack.c.bf16 %v3728_v35, %v3712_v34  ;;  %v4258_v45 = vpack.c.bf16 %v3759_v37, %v3743_v36  ;;  %v3731_v35 = vld [vmem:[%s6847_s0 + $0xf48] sm:$0xff]  ;;  %v3717_v36 = vld [vmem:[%s6847_s0 + $0xed8] sm:$0xff]  ;;  %v3730_v40 = vld [vmem:[%s6847_s0 + $0xf40] sm:$0xff] }
  0xf0   :  { %4243 = vmatprep.subr.bf16.mxu1 %v4242_v51  ;;  %2686 = vmatprep.mubr.f32.mxu0 %v4353_v3  ;;  %v5948_v5 = vpop.f32.mrb[2].mxu1  ;;  %v5950_v6 = vpop.f32.mrb[3].mxu0  ;;  %v3733_v37 = vld [vmem:[%s6847_s0 + $0xf58] sm:$0xff]  ;;  %v4286_v46 = vpack.c.bf16 %v3731_v35, %v3715_v32  ;;  %v4288_v54 = vpack.c.bf16 %v3730_v40, %v3714_v39  ;;  %v3811_v32 = vld [vmem:[%s6847_s0 + $0x11c8] sm:$0xff]  ;;  %v3702_v39 = vld [vmem:[%s6847_s0 + $0xe60] sm:$0xff] }
  0xf1   :  { %2763 = vmatprep.mubr.f32.mxu1 %v4353_v3  ;;  %v5953_v7 = vpop.f32.mrb[3].mxu1  ;;  %v3703_v35 = vld [vmem:[%s6847_s0 + $0xe68] sm:$0xff]  ;;  %v3810_v40 = vld [vmem:[%s6847_s0 + $0x11c0] sm:$0xff] }
  0xf2   :  { %4229 = vmatpush1.bf16.msra.mxu0 %v4228_v58 }
  0xf3   :  { %4245 = vmatpush1.bf16.msra.mxu1 %v4244_v59  ;;  %4231 = vmatprep.subr.bf16.mxu0 %v4230_v60  ;;  %v3777_v59 = vld [vmem:[%s6847_s0 + $0x10b8] sm:$0xff] }
  0xf4   :  { %4247 = vmatprep.subr.bf16.mxu1 %v4246_v1  ;;  %v3793_v60 = vld [vmem:[%s6847_s0 + $0x1138] sm:$0xff]  ;;  %v4262_v1 = vpack.c.bf16 %v3791_v57, %v3775_v56 }
  0xf6   :  { %4233 = vmatpush1.bf16.msra.mxu0 %v4232_v8 }
  0xf7   :  { %4249 = vmatpush1.bf16.msra.mxu1 %v4248_v10  ;;  %2638 = vmatprep.subr.mxu0 %v3803_v11  ;;  %v4278_v10 = vpack.c.bf16 %v3793_v60, %v3777_v59  ;;  %v3776_v11 = vld [vmem:[%s6847_s0 + $0x10b0] sm:$0xff]  ;;  %v3746_v59 = vld [vmem:[%s6847_s0 + $0xfc0] sm:$0xff] }
  0xf8   :  { %2715 = vmatprep.subr.mxu1 %v3805_v12  ;;  %v3792_v12 = vld [vmem:[%s6847_s0 + $0x1130] sm:$0xff]  ;;  %v3762_v60 = vld [vmem:[%s6847_s0 + $0x1040] sm:$0xff] }
  0xf9   :  { %v4280_v17 = vpack.c.bf16 %v3792_v12, %v3776_v11  ;;  %v3795_v11 = vld [vmem:[%s6847_s0 + $0x1148] sm:$0xff] }
  0xfa   :  { %2639 = vmatpush1.msra.mxu0 %v3802_v20  ;;  %v3809_v20 = vld [vmem:[%s6847_s0 + $0x11b8] sm:$0xff] }
  0xfb   :  { %2716 = vmatpush1.msra.mxu1 %v3804_v23  ;;  %3818 = vmatmul.mubr.msk.f32.vlgmr.msra.gmra.mrb[48].mxu0 %vm172_vm0, %v5389_v9  ;;  %v3685_v23 = vld [vmem:[%s6847_s0 + $0xdd8] sm:$0xff] }
  0xfc   :  { %3820 = vmatmul.mubr.msk.f32.vlgmr.msra.gmra.mrb[48].mxu1 %vm172_vm0, %v5389_v9  ;;  %4251 = vmatprep.subr.bf16.mxu0 %v4250_v25  ;;  %v3701_v25 = vld [vmem:[%s6847_s0 + $0xe58] sm:$0xff] }
  0xfd   :  { %4267 = vmatprep.subr.bf16.mxu1 %v4266_v27  ;;  %4253 = vmatpush1.bf16.msra.mxu0 %v4252_v28  ;;  %v6031_v42 = vpop.f32.mrb[4].mxu0  ;;  %v3698_v27 = vld [vmem:[%s6847_s0 + $0xe40] sm:$0xff]  ;;  %v4298_v33 = vpack.c.bf16 %v3701_v25, %v3685_v23 }
  0xfe   :  { %4269 = vmatpush1.bf16.msra.mxu1 %v4268_v31  ;;  %2692 = vmatprep.mubr.f32.mxu0 %v4353_v3  ;;  %v6043_v51 = vpop.f32.mrb[4].mxu1  ;;  %v6045_v52 = vpop.f32.mrb[5].mxu0  ;;  %v3806_v28 = vld [vmem:[%s6847_s0 + $0x11a0] sm:$0xff]  ;;  %v4282_v31 = vpack.c.bf16 %v3699_v22, %v3683_v21  ;;  %v4284_v34 = vpack.c.bf16 %v3698_v27, %v3682_v26  ;;  %v3780_v26 = vld [vmem:[%s6847_s0 + $0x10d0] sm:$0xff] }
  0xff   :  { %2769 = vmatprep.mubr.f32.mxu1 %v4353_v3  ;;  %3819 = vmatmul.mubr.msk.f32.gmra.mrb[50].mxu0 %vm172_vm0, %v5424_v24  ;;  %v6059_v58 = vpop.f32.mrb[5].mxu1  ;;  %v3794_v22 = vld [vmem:[%s6847_s0 + $0x1140] sm:$0xff]  ;;  %v3796_v27 = vld [vmem:[%s6847_s0 + $0x1150] sm:$0xff] }
 0x100   :  { %3821 = vmatmul.mubr.msk.f32.gmra.mrb[50].mxu1 %vm172_vm0, %v5424_v24  ;;  %4255 = vmatprep.subr.bf16.mxu0 %v4254_v38  ;;  %v4300_v38 = vpack.c.bf16 %v3700_v30, %v3684_v29 }
 0x101   :  { %4271 = vmatprep.subr.bf16.mxu1 %v4270_v41  ;;  %4257 = vmatpush1.bf16.msra.mxu0 %v4256_v19  ;;  %v3716_v41 = vld [vmem:[%s6847_s0 + $0xed0] sm:$0xff] }
 0x102   :  { %4273 = vmatpush1.bf16.msra.mxu1 %v4272_v44  ;;  %4259 = vmatprep.subr.bf16.mxu0 %v4258_v45  ;;  %v6075_v8 = vpop.f32.mrb[6].mxu0  ;;  %v3732_v19 = vld [vmem:[%s6847_s0 + $0xf50] sm:$0xff]  ;;  %v3747_v44 = vld [vmem:[%s6847_s0 + $0xfc8] sm:$0xff] }
 0x103   :  { %4275 = vmatprep.subr.bf16.mxu1 %v4274_v53  ;;  %2840 = vmatprep.mubr.f32.mxu0 %v4353_v3  ;;  %v6084_v13 = vpop.f32.mrb[6].mxu1  ;;  %v6086_v14 = vpop.f32.mrb[7].mxu0  ;;  %v3763_v45 = vld [vmem:[%s6847_s0 + $0x1048] sm:$0xff]  ;;  %v4302_v53 = vpack.c.bf16 %v3733_v37, %v3717_v36  ;;  %v3689_v36 = vld [vmem:[%s6847_s0 + $0xdf8] sm:$0xff] }
 0x104   :  { %2917 = vmatprep.mubr.f32.mxu1 %v4353_v3  ;;  %v6089_v15 = vpop.f32.mrb[7].mxu1  ;;  %v4290_v57 = vpack.c.bf16 %v3763_v45, %v3747_v44  ;;  %v3705_v37 = vld [vmem:[%s6847_s0 + $0xe78] sm:$0xff]  ;;  %v3812_v44 = vld [vmem:[%s6847_s0 + $0x11d0] sm:$0xff] }
 0x105   :  { %4261 = vmatpush1.bf16.msra.mxu0 %v4260_v61  ;;  %v3748_v61 = vld [vmem:[%s6847_s0 + $0xfd0] sm:$0xff]  ;;  %v4330_v47 = vpack.c.bf16 %v3705_v37, %v3689_v36  ;;  %v3783_v36 = vld [vmem:[%s6847_s0 + $0x10e8] sm:$0xff] }
 0x106   :  { %4277 = vmatpush1.bf16.msra.mxu1 %v4276_v62  ;;  %4263 = vmatprep.subr.bf16.mxu0 %v4262_v1  ;;  %v3799_v37 = vld [vmem:[%s6847_s0 + $0x1168] sm:$0xff] }
 0x107   :  { %4279 = vmatprep.subr.bf16.mxu1 %v4278_v10  ;;  %v3779_v10 = vld [vmem:[%s6847_s0 + $0x10c8] sm:$0xff] }
 0x108   :  { %v4294_v21 = vpack.c.bf16 %v3795_v11, %v3779_v10  ;;  %v3751_v10 = vld [vmem:[%s6847_s0 + $0xfe8] sm:$0xff] }
 0x109   :  { %4265 = vmatpush1.bf16.msra.mxu0 %v4264_v16  ;;  %v3781_v16 = vld [vmem:[%s6847_s0 + $0x10d8] sm:$0xff]  ;;  %v3767_v11 = vld [vmem:[%s6847_s0 + $0x1068] sm:$0xff] }
 0x10a   :  { %4281 = vmatpush1.bf16.msra.mxu1 %v4280_v17  ;;  %2792 = vmatprep.subr.mxu0 %v3807_v18  ;;  %v3797_v17 = vld [vmem:[%s6847_s0 + $0x1158] sm:$0xff]  ;;  %v4292_v18 = vpack.c.bf16 %v3762_v60, %v3746_v59  ;;  %v3718_v59 = vld [vmem:[%s6847_s0 + $0xee0] sm:$0xff] }
 0x10b   :  { %2869 = vmatprep.subr.mxu1 %v3809_v20  ;;  %v4308_v20 = vpack.c.bf16 %v3764_v4, %v3748_v61  ;;  %v4310_v25 = vpack.c.bf16 %v3797_v17, %v3781_v16  ;;  %v3734_v60 = vld [vmem:[%s6847_s0 + $0xf60] sm:$0xff]  ;;  %v3720_v61 = vld [vmem:[%s6847_s0 + $0xef0] sm:$0xff]  ;;  %v3753_v17 = vld [vmem:[%s6847_s0 + $0xff8] sm:$0xff] }
 0x10c   :  { %v3736_v4 = vld [vmem:[%s6847_s0 + $0xf70] sm:$0xff] }
 0x10d   :  { %2793 = vmatpush1.msra.mxu0 %v3806_v28 }
 0x10e   :  { %2870 = vmatpush1.msra.mxu1 %v3808_v0  ;;  %3822 = vmatmul.mubr.msk.f32.vlgmr.msra.gmra.mrb[52].mxu0 %vm172_vm0, %v5389_v9 }
 0x10f   :  { %3824 = vmatmul.mubr.msk.f32.vlgmr.msra.gmra.mrb[52].mxu1 %vm172_vm0, %v5389_v9  ;;  %4283 = vmatprep.subr.bf16.mxu0 %v4282_v31  ;;  %v4304_v9 = vpack.c.bf16 %v3732_v19, %v3716_v41  ;;  %v4312_v31 = vpack.c.bf16 %v3796_v27, %v3780_v26  ;;  %v3688_v41 = vld [vmem:[%s6847_s0 + $0xdf0] sm:$0xff]  ;;  %v3750_v26 = vld [vmem:[%s6847_s0 + $0xfe0] sm:$0xff] }
 0x110   :  { %4299 = vmatprep.subr.bf16.mxu1 %v4298_v33  ;;  %4285 = vmatpush1.bf16.msra.mxu0 %v4284_v34  ;;  %v6167_v56 = vpop.f32.mrb[8].mxu0  ;;  %v3813_v33 = vld [vmem:[%s6847_s0 + $0x11d8] sm:$0xff]  ;;  %v3687_v34 = vld [vmem:[%s6847_s0 + $0xde8] sm:$0xff]  ;;  %v3704_v19 = vld [vmem:[%s6847_s0 + $0xe70] sm:$0xff] }
 0x111   :  { %4301 = vmatpush1.bf16.msra.mxu1 %v4300_v38  ;;  %2846 = vmatprep.mubr.f32.mxu0 %v4353_v3  ;;  %v6179_v62 = vpop.f32.mrb[8].mxu1  ;;  %v6181_v1 = vpop.f32.mrb[9].mxu0  ;;  %v3686_v38 = vld [vmem:[%s6847_s0 + $0xde0] sm:$0xff]  ;;  %v4314_v45 = vpack.c.bf16 %v3703_v35, %v3687_v34  ;;  %v3768_v35 = vld [vmem:[%s6847_s0 + $0x1070] sm:$0xff] }
 0x112   :  { %2923 = vmatprep.mubr.f32.mxu1 %v4353_v3  ;;  %3823 = vmatmul.mubr.msk.f32.gmra.mrb[54].mxu0 %vm172_vm0, %v5424_v24  ;;  %v6195_v12 = vpop.f32.mrb[9].mxu1  ;;  %v4316_v48 = vpack.c.bf16 %v3702_v39, %v3686_v38  ;;  %v3766_v27 = vld [vmem:[%s6847_s0 + $0x1060] sm:$0xff]  ;;  %v3785_v39 = vld [vmem:[%s6847_s0 + $0x10f8] sm:$0xff] }
 0x113   :  { %3825 = vmatmul.mubr.msk.f32.gmra.mrb[54].mxu1 %vm172_vm0, %v5424_v24  ;;  %4287 = vmatprep.subr.bf16.mxu0 %v4286_v46  ;;  %v3778_v24 = vld [vmem:[%s6847_s0 + $0x10c0] sm:$0xff]  ;;  %v3719_v46 = vld [vmem:[%s6847_s0 + $0xee8] sm:$0xff] }
 0x114   :  { %4303 = vmatprep.subr.bf16.mxu1 %v4302_v53  ;;  %4289 = vmatpush1.bf16.msra.mxu0 %v4288_v54  ;;  %v4296_v0 = vpack.c.bf16 %v3794_v22, %v3778_v24  ;;  %v3735_v53 = vld [vmem:[%s6847_s0 + $0xf68] sm:$0xff]  ;;  %v3721_v54 = vld [vmem:[%s6847_s0 + $0xef8] sm:$0xff]  ;;  %v4336_v22 = vpack.c.bf16 %v3736_v4, %v3720_v61 }
 0x115   :  { %4305 = vmatpush1.bf16.msra.mxu1 %v4304_v9  ;;  %4291 = vmatprep.subr.bf16.mxu0 %v4290_v57  ;;  %v6211_v23 = vpop.f32.mrb[10].mxu0  ;;  %v3737_v9 = vld [vmem:[%s6847_s0 + $0xf78] sm:$0xff]  ;;  %v4332_v57 = vpack.c.bf16 %v3704_v19, %v3688_v41  ;;  %v4318_v16 = vpack.c.bf16 %v3735_v53, %v3719_v46  ;;  %v4324_v41 = vpack.c.bf16 %v3766_v27, %v3750_v26  ;;  %v3798_v46 = vld [vmem:[%s6847_s0 + $0x1160] sm:$0xff]  ;;  %v3784_v53 = vld [vmem:[%s6847_s0 + $0x10f0] sm:$0xff] }
 0x116   :  { %4307 = vmatprep.subr.bf16.mxu1 %v4306_v2  ;;  %2994 = vmatprep.mubr.f32.mxu0 %v4353_v3  ;;  %v6220_v28 = vpop.f32.mrb[10].mxu1  ;;  %v6222_v29 = vpop.f32.mrb[11].mxu0  ;;  %v6287_v2 = vld [vmem:[%s6848_s1] sm:$0xff]  ;;  %v3815_v4 = vld [vmem:[%s6847_s0 + $0x11e8] sm:$0xff] }
 0x117   :  { %3071 = vmatprep.mubr.f32.mxu1 %v4353_v3  ;;  %v6225_v30 = vpop.f32.mrb[11].mxu1 }
 0x118   :  { %4293 = vmatpush1.bf16.msra.mxu0 %v4292_v18  ;;  %v3769_v18 = vld [vmem:[%s6847_s0 + $0x1078] sm:$0xff] }
 0x119   :  { %4309 = vmatpush1.bf16.msra.mxu1 %v4308_v20  ;;  %4295 = vmatprep.subr.bf16.mxu0 %v4294_v21  ;;  %v4334_v20 = vpack.c.bf16 %v3737_v9, %v3721_v54  ;;  %v4320_v21 = vpack.c.bf16 %v3734_v60, %v3718_v59  ;;  %v4338_v34 = vpack.c.bf16 %v3769_v18, %v3753_v17  ;;  %v3800_v54 = vld [vmem:[%s6847_s0 + $0x1170] sm:$0xff] }
 0x11a   :  { %4311 = vmatprep.subr.bf16.mxu1 %v4310_v25  ;;  %v4322_v25 = vpack.c.bf16 %v3767_v11, %v3751_v10  ;;  %v4344_v61 = vpack.c.bf16 %v3800_v54, %v3784_v53  ;;  %v3817_v10 = vld [vmem:[%s6847_s0 + $0x11f8] sm:$0xff]  ;;  %v6379_v11 = vpop.permute.xlu0 %164  ;;  %v3816_v17 = vld [vmem:[%s6847_s0 + $0x11f0] sm:$0xff] }
 0x11b   :  { %v246_v18 = vadd.f32 %v5895_v43, %v6379_v11 }
 0x11c   :  { %4297 = vmatpush1.bf16.msra.mxu0 %v4296_v0  ;;  %v3752_v0 = vld [vmem:[%s6847_s0 + $0xff0] sm:$0xff] }
 0x11d   :  { %4313 = vmatpush1.bf16.msra.mxu1 %v4312_v31  ;;  %2946 = vmatprep.subr.mxu0 %v3811_v32  ;;  %v4340_v19 = vpack.c.bf16 %v3768_v35, %v3752_v0 }
 0x11e   :  { %3023 = vmatprep.subr.mxu1 %v3813_v33  ;;  %v6328_v33 = vld [vmem:[%s6848_s1 + $0x8] sm:$0xff] }
 0x120   :  { %2947 = vmatpush1.msra.mxu0 %v3810_v40  ;;  %v3801_v40 = vld [vmem:[%s6847_s0 + $0x1178] sm:$0xff] }
 0x121   :  { %3024 = vmatpush1.msra.mxu1 %v3812_v44  ;;  %3826 = vmatmul.mubr.msk.f32.vlgmr.msra.gmra.mrb[56].mxu0 %vm172_vm0, %v6287_v2  ;;  %v4326_v44 = vpack.c.bf16 %v3799_v37, %v3783_v36 }
 0x122   :  { %3828 = vmatmul.mubr.msk.f32.vlgmr.msra.gmra.mrb[56].mxu1 %vm172_vm0, %v6287_v2  ;;  %4315 = vmatprep.subr.bf16.mxu0 %v4314_v45  ;;  %v3782_v45 = vld [vmem:[%s6847_s0 + $0x10e0] sm:$0xff] }
 0x123   :  { %4331 = vmatprep.subr.bf16.mxu1 %v4330_v47  ;;  %4317 = vmatpush1.bf16.msra.mxu0 %v4316_v48  ;;  %v6308_v24 = vpop.f32.mrb[12].mxu0  ;;  %v4342_v48 = vpack.c.bf16 %v3801_v40, %v3785_v39  ;;  %v4328_v60 = vpack.c.bf16 %v3798_v46, %v3782_v45 }
 0x124   :  { %4333 = vmatpush1.bf16.msra.mxu1 %v4332_v57  ;;  %3000 = vmatprep.mubr.f32.mxu0 %v4353_v3  ;;  %v6320_v31 = vpop.f32.mrb[12].mxu1  ;;  %v6322_v32 = vpop.f32.mrb[13].mxu0 }
 0x125   :  { %3077 = vmatprep.mubr.f32.mxu1 %v4353_v3  ;;  %3827 = vmatmul.mubr.msk.f32.gmra.mrb[58].mxu0 %vm172_vm0, %v6328_v33  ;;  %v6341_v38 = vpop.f32.mrb[13].mxu1 }
 0x126   :  { %3829 = vmatmul.mubr.msk.f32.gmra.mrb[58].mxu1 %vm172_vm0, %v6328_v33  ;;  %4319 = vmatprep.subr.bf16.mxu0 %v4318_v16  ;;  %v3814_v16 = vld [vmem:[%s6847_s0 + $0x11e0] sm:$0xff] }
 0x127   :  { %4335 = vmatprep.subr.bf16.mxu1 %v4334_v20  ;;  %4321 = vmatpush1.bf16.msra.mxu0 %v4320_v21  ;;  %v248_v20 = vadd.f32 %v5909_v50, %v6379_v11  ;;  %v323_v21 = vadd.f32 %v5907_v49, %v6379_v11  ;;  %v795_v50 = vmax.f32 %v246_v18, 0.0 }
 0x128   :  { %4337 = vmatpush1.bf16.msra.mxu1 %v4336_v22  ;;  %4323 = vmatprep.subr.bf16.mxu0 %v4322_v25  ;;  %v6357_v47 = vpop.f32.mrb[14].mxu0  ;;  %v325_v22 = vadd.f32 %v5923_v55, %v6379_v11  ;;  %v6400_v25 = vpop.permute.xlu0 %169 }
 0x129   :  { %4339 = vmatprep.subr.bf16.mxu1 %v4338_v34  ;;  %3148 = vmatprep.mubr.f32.mxu0 %v4353_v3  ;;  %v6366_v9 = vpop.f32.mrb[14].mxu1  ;;  %v6368_v57 = vpop.f32.mrb[15].mxu0  ;;  %v796_v34 = vmax.f32 %v248_v20, 0.0  ;;  %v797_v49 = vmax.f32 %v323_v21, 0.0  ;;  %v252_v39 = vadd.f32 %v5939_v63, %v6400_v25  ;;  %v254_v40 = vadd.f32 %v5950_v6, %v6400_v25 }
 0x12a   :  { %3225 = vmatprep.mubr.f32.mxu1 %v4353_v3  ;;  %v6371_v59 = vpop.f32.mrb[15].mxu1  ;;  %v798_v36 = vmax.f32 %v325_v22, 0.0  ;;  %v329_v45 = vadd.f32 %v5948_v5, %v6400_v25  ;;  %v331_v46 = vadd.f32 %v5953_v7, %v6400_v25 }
 0x12b   :  { %4325 = vmatpush1.bf16.msra.mxu0 %v4324_v41  ;;  %v812_v18 = vmax.f32 %v254_v40, 0.0 }
 0x12c   :  { %4341 = vmatpush1.bf16.msra.mxu1 %v4340_v19  ;;  %4327 = vmatprep.subr.bf16.mxu0 %v4326_v44  ;;  %v813_v20 = vmax.f32 %v329_v45, 0.0 }
 0x12d   :  { %4343 = vmatprep.subr.bf16.mxu1 %v4342_v48 }
 0x12f   :  { %4329 = vmatpush1.bf16.msra.mxu0 %v4328_v60 }
 0x130   :  { %4345 = vmatpush1.bf16.msra.mxu1 %v4344_v61  ;;  %3100 = vmatprep.subr.mxu0 %v3815_v4 }
 0x131   :  { %3177 = vmatprep.subr.mxu1 %v3817_v10 }
 0x133   :  { %3101 = vmatpush1.msra.mxu0 %v3814_v16  ;;  %v811_v16 = vmax.f32 %v252_v39, 0.0 }
 0x134   :  { %3178 = vmatpush1.msra.mxu1 %v3816_v17  ;;  %3830 = vmatmul.mubr.msk.f32.vlgmr.msra.gmra.mrb[60].mxu0 %vm172_vm0, %v6287_v2 }
 0x135   :  { %3832 = vmatmul.mubr.msk.f32.vlgmr.msra.gmra.mrb[60].mxu1 %vm172_vm0, %v6287_v2  ;;  %3154 = vmatprep.mubr.f32.mxu0 %v4353_v3 }
 0x136   :  { %3231 = vmatprep.mubr.f32.mxu1 %v4353_v3  ;;  %v1038_v43 = vpop.f32.mrb[16].mxu0 }
 0x137   :  { %v1039_v26 = vadd.f32 %v1038_v43, %v6379_v11  ;;  %v1115_v27 = vpop.f32.mrb[16].mxu1  ;;  %v1040_v0 = vpop.f32.mrb[17].mxu0  ;;  %v814_v43 = vmax.f32 %v331_v46, 0.0 }
 0x138   :  { %3831 = vmatmul.mubr.msk.f32.gmra.mrb[62].mxu0 %vm172_vm0, %v6328_v33  ;;  %v1116_v55 = vadd.f32 %v1115_v27, %v6379_v11  ;;  %v1041_v2 = vadd.f32 %v1040_v0, %v6379_v11  ;;  %v1117_v35 = vpop.f32.mrb[17].mxu1 }
 0x139   :  { %3833 = vmatmul.mubr.msk.f32.gmra.mrb[62].mxu1 %vm172_vm0, %v6328_v33  ;;  %v1588_v3 = vmax.f32 %v1039_v26, 0.0  ;;  %v1118_v37 = vadd.f32 %v1117_v35, %v6379_v11  ;;  %v479_v35 = vadd.f32 %v6059_v58, %v6379_v11 }
 0x13a   :  { %v1590_v41 = vmax.f32 %v1116_v55, 0.0  ;;  %v1589_v19 = vmax.f32 %v1041_v2, 0.0  ;;  %v1044_v44 = vpop.f32.mrb[18].mxu0  ;;  %v477_v55 = vadd.f32 %v6043_v51, %v6379_v11  ;;  %v402_v2 = vadd.f32 %v6045_v52, %v6379_v11 }
 0x13b   :  { %v6419_v48 = vmax.f32 %v795_v50, %v1588_v3  ;;  %v1591_v33 = vmax.f32 %v1118_v37, 0.0  ;;  %v1045_v53 = vadd.f32 %v1044_v44, %v6400_v25  ;;  %v1121_v54 = vpop.f32.mrb[18].mxu1  ;;  %v1046_v60 = vpop.f32.mrb[19].mxu0  ;;  %v802_v51 = vmax.f32 %v479_v35, 0.0 }
 0x13c   :  { %v6422_v63 = vmax.f32 %v797_v49, %v1590_v41  ;;  %v6424_v61 = vmax.f32 %v796_v34, %v1589_v19  ;;  %v1122_v6 = vadd.f32 %v1121_v54, %v6400_v25  ;;  %v1047_v4 = vadd.f32 %v1046_v60, %v6400_v25  ;;  %v1123_v10 = vpop.f32.mrb[19].mxu1 }
 0x13d   :  { %v6428_v5 = vmax.f32 %v798_v36, %v1591_v33  ;;  %v1604_v7 = vmax.f32 %v1045_v53, 0.0  ;;  %v1124_v17 = vadd.f32 %v1123_v10, %v6400_v25  ;;  %v400_v49 = vadd.f32 %v6031_v42, %v6379_v11 }
 0x13e   :  { %v1606_v21 = vmax.f32 %v1122_v6, 0.0  ;;  %v1605_v22 = vmax.f32 %v1047_v4, 0.0  ;;  %v801_v41 = vmax.f32 %v477_v55, 0.0  ;;  %v800_v19 = vmax.f32 %v402_v2, 0.0 }
 0x13f   :  { %v6431_v50 = vmax.f32 %v811_v16, %v1604_v7  ;;  %v1607_v26 = vmax.f32 %v1124_v17, 0.0  ;;  %v799_v3 = vmax.f32 %v400_v49, 0.0  ;;  %v406_v52 = vadd.f32 %v6075_v8, %v6400_v25 }
 0x140   :  { %v6433_v27 = vmax.f32 %v813_v20, %v1606_v21  ;;  %v6435_v0 = vmax.f32 %v812_v18, %v1605_v22  ;;  %v483_v33 = vadd.f32 %v6084_v13, %v6400_v25  ;;  %v408_v53 = vadd.f32 %v6086_v14, %v6400_v25 }
 0x141   :  { %v6437_v34 = vmax.f32 %v814_v43, %v1607_v26  ;;  %v485_v4 = vadd.f32 %v6089_v15, %v6400_v25  ;;  %v815_v22 = vmax.f32 %v406_v52, 0.0 }
 0x142   :  { %v817_v49 = vmax.f32 %v483_v33, 0.0  ;;  %v816_v55 = vmax.f32 %v408_v53, 0.0 }
 0x149   :  { %v1192_v36 = vpop.f32.mrb[20].mxu0 }
 0x14a   :  { %v1193_v37 = vadd.f32 %v1192_v36, %v6379_v11  ;;  %v1269_v39 = vpop.f32.mrb[20].mxu1  ;;  %v1194_v40 = vpop.f32.mrb[21].mxu0  ;;  %v818_v36 = vmax.f32 %v485_v4, 0.0 }
 0x14b   :  { %v1270_v44 = vadd.f32 %v1269_v39, %v6379_v11  ;;  %v1195_v42 = vadd.f32 %v1194_v40, %v6379_v11  ;;  %v1271_v45 = vpop.f32.mrb[21].mxu1 }
 0x14c   :  { %v1592_v46 = vmax.f32 %v1193_v37, 0.0  ;;  %v1272_v58 = vadd.f32 %v1271_v45, %v6379_v11  ;;  %v633_v45 = vadd.f32 %v6195_v12, %v6379_v11 }
 0x14d   :  { %v1594_v54 = vmax.f32 %v1270_v44, 0.0  ;;  %v1593_v60 = vmax.f32 %v1195_v42, 0.0  ;;  %v1198_v6 = vpop.f32.mrb[22].mxu0  ;;  %v631_v44 = vadd.f32 %v6179_v62, %v6379_v11  ;;  %v556_v42 = vadd.f32 %v6181_v1, %v6379_v11 }
 0x14e   :  { %v6459_v10 = vmax.f32 %v799_v3, %v1592_v46  ;;  %v1595_v16 = vmax.f32 %v1272_v58, 0.0  ;;  %v1199_v8 = vadd.f32 %v1198_v6, %v6400_v25  ;;  %v1275_v7 = vpop.f32.mrb[22].mxu1  ;;  %v1200_v17 = vpop.f32.mrb[23].mxu0  ;;  %v806_v62 = vmax.f32 %v633_v45, 0.0 }
 0x14f   :  { %v6462_v18 = vmax.f32 %v801_v41, %v1594_v54  ;;  %v6464_v20 = vmax.f32 %v800_v19, %v1593_v60  ;;  %v1276_v13 = vadd.f32 %v1275_v7, %v6400_v25  ;;  %v1201_v14 = vadd.f32 %v1200_v17, %v6400_v25  ;;  %v1277_v21 = vpop.f32.mrb[23].mxu1 }
 0x150   :  { %v6468_v43 = vmax.f32 %v802_v51, %v1595_v16  ;;  %v1608_v15 = vmax.f32 %v1199_v8, 0.0  ;;  %v1278_v26 = vadd.f32 %v1277_v21, %v6400_v25  ;;  %v554_v19 = vadd.f32 %v6167_v56, %v6379_v11 }
 0x151   :  { %v1610_v2 = vmax.f32 %v1276_v13, 0.0  ;;  %v1609_v35 = vmax.f32 %v1201_v14, 0.0  ;;  %v805_v53 = vmax.f32 %v631_v44, 0.0  ;;  %v804_v54 = vmax.f32 %v556_v42, 0.0 }
 0x152   :  { %v6471_v3 = vmax.f32 %v815_v22, %v1608_v15  ;;  %v1611_v37 = vmax.f32 %v1278_v26, 0.0  ;;  %v803_v52 = vmax.f32 %v554_v19, 0.0  ;;  %v560_v1 = vadd.f32 %v6211_v23, %v6400_v25 }
 0x153   :  { %v6473_v39 = vmax.f32 %v817_v49, %v1610_v2  ;;  %v6475_v40 = vmax.f32 %v816_v55, %v1609_v35  ;;  %v637_v16 = vadd.f32 %v6220_v28, %v6400_v25  ;;  %v562_v8 = vadd.f32 %v6222_v29, %v6400_v25 }
 0x154   :  { %v6477_v41 = vmax.f32 %v818_v36, %v1611_v37  ;;  %v639_v14 = vadd.f32 %v6225_v30, %v6400_v25  ;;  %v819_v35 = vmax.f32 %v560_v1, 0.0 }
 0x155   :  { %v821_v19 = vmax.f32 %v637_v16, 0.0  ;;  %v820_v44 = vmax.f32 %v562_v8, 0.0 }
 0x15c   :  { %v1346_v51 = vpop.f32.mrb[24].mxu0 }
 0x15d   :  { %v1347_v46 = vadd.f32 %v1346_v51, %v6379_v11  ;;  %v1423_v58 = vpop.f32.mrb[24].mxu1  ;;  %v1348_v33 = vpop.f32.mrb[25].mxu0  ;;  %v822_v51 = vmax.f32 %v639_v14, 0.0 }
 0x15e   :  { %v1424_v60 = vadd.f32 %v1423_v58, %v6379_v11  ;;  %v1349_v56 = vadd.f32 %v1348_v33, %v6379_v11  ;;  %v1425_v6 = vpop.f32.mrb[25].mxu1 }
 0x15f   :  { %v1596_v4 = vmax.f32 %v1347_v46, 0.0  ;;  %v1426_v12 = vadd.f32 %v1425_v6, %v6379_v11  ;;  %v787_v6 = vadd.f32 %v6341_v38, %v6379_v11 }
 0x160   :  { %v1598_v7 = vmax.f32 %v1424_v60, 0.0  ;;  %v1597_v17 = vmax.f32 %v1349_v56, 0.0  ;;  %v1352_v13 = vpop.f32.mrb[26].mxu0  ;;  %v785_v60 = vadd.f32 %v6320_v31, %v6379_v11  ;;  %v710_v56 = vadd.f32 %v6322_v32, %v6379_v11 }
 0x161   :  { %v6499_v21 = vmax.f32 %v803_v52, %v1596_v4  ;;  %v1599_v22 = vmax.f32 %v1426_v12, 0.0  ;;  %v1353_v23 = vadd.f32 %v1352_v13, %v6400_v25  ;;  %v1429_v15 = vpop.f32.mrb[26].mxu1  ;;  %v1354_v26 = vpop.f32.mrb[27].mxu0  ;;  %v810_v31 = vmax.f32 %v787_v6, 0.0 }
 0x162   :  { %v6502_v49 = vmax.f32 %v805_v53, %v1598_v7  ;;  %v6504_v55 = vmax.f32 %v804_v54, %v1597_v17  ;;  %v1430_v28 = vadd.f32 %v1429_v15, %v6400_v25  ;;  %v1355_v29 = vadd.f32 %v1354_v26, %v6400_v25  ;;  %v1431_v2 = vpop.f32.mrb[27].mxu1 }
 0x163   :  { %v6508_v36 = vmax.f32 %v806_v62, %v1599_v22  ;;  %v1612_v30 = vmax.f32 %v1353_v23, 0.0  ;;  %v1432_v37 = vadd.f32 %v1431_v2, %v6400_v25  ;;  %v708_v54 = vadd.f32 %v6308_v24, %v6379_v11 }
 0x164   :  { %v1614_v42 = vmax.f32 %v1430_v28, 0.0  ;;  %v1613_v45 = vmax.f32 %v1355_v29, 0.0  ;;  %v809_v8 = vmax.f32 %v785_v60, 0.0  ;;  %v808_v7 = vmax.f32 %v710_v56, 0.0 }
 0x165   :  { %v6511_v52 = vmax.f32 %v819_v35, %v1612_v30  ;;  %v1615_v46 = vmax.f32 %v1432_v37, 0.0  ;;  %v807_v1 = vmax.f32 %v708_v54, 0.0  ;;  %v714_v32 = vadd.f32 %v6357_v47, %v6400_v25 }
 0x166   :  { %v6513_v58 = vmax.f32 %v821_v19, %v1614_v42  ;;  %v6515_v33 = vmax.f32 %v820_v44, %v1613_v45  ;;  %v791_v22 = vadd.f32 %v6366_v9, %v6400_v25  ;;  %v716_v23 = vadd.f32 %v6368_v57, %v6400_v25 }
 0x167   :  { %v6517_v53 = vmax.f32 %v822_v51, %v1615_v46  ;;  %v793_v29 = vadd.f32 %v6371_v59, %v6400_v25  ;;  %v823_v45 = vmax.f32 %v714_v32, 0.0 }
 0x168   :  { %v825_v54 = vmax.f32 %v791_v22, 0.0  ;;  %v824_v60 = vmax.f32 %v716_v23, 0.0 }
 0x16f   :  { %v1500_v62 = vpop.f32.mrb[28].mxu0 }
 0x170   :  { %v1501_v4 = vadd.f32 %v1500_v62, %v6379_v11  ;;  %v1577_v12 = vpop.f32.mrb[28].mxu1  ;;  %v1502_v16 = vpop.f32.mrb[29].mxu0  ;;  %v826_v62 = vmax.f32 %v793_v29, 0.0 }
 0x171   :  { %v1578_v17 = vadd.f32 %v1577_v12, %v6379_v11  ;;  %v1503_v24 = vadd.f32 %v1502_v16, %v6379_v11  ;;  %v1579_v13 = vpop.f32.mrb[29].mxu1 }
 0x172   :  { %v1600_v14 = vmax.f32 %v1501_v4, 0.0  ;;  %v1580_v38 = vadd.f32 %v1579_v13, %v6379_v11 }
 0x173   :  { %v1602_v15 = vmax.f32 %v1578_v17, 0.0  ;;  %v1601_v26 = vmax.f32 %v1503_v24, 0.0  ;;  %v1506_v28 = vpop.f32.mrb[30].mxu0 }
 0x174   :  { %v6539_v2 = vmax.f32 %v807_v1, %v1600_v14  ;;  %v1603_v35 = vmax.f32 %v1580_v38, 0.0  ;;  %v1507_v47 = vadd.f32 %v1506_v28, %v6400_v25  ;;  %v1583_v30 = vpop.f32.mrb[30].mxu1  ;;  %v1508_v37 = vpop.f32.mrb[31].mxu0 }
 0x175   :  { %v6542_v19 = vmax.f32 %v809_v8, %v1602_v15  ;;  %v6544_v44 = vmax.f32 %v808_v7, %v1601_v26  ;;  %v1584_v9 = vadd.f32 %v1583_v30, %v6400_v25  ;;  %v1509_v57 = vadd.f32 %v1508_v37, %v6400_v25  ;;  %v1585_v42 = vpop.f32.mrb[31].mxu1 }
 0x176   :  { %v6548_v51 = vmax.f32 %v810_v31, %v1603_v35  ;;  %v1616_v59 = vmax.f32 %v1507_v47, 0.0  ;;  %v1586_v46 = vadd.f32 %v1585_v42, %v6400_v25 }
 0x177   :  { %v1618_v56 = vmax.f32 %v1584_v9, 0.0  ;;  %v1617_v6 = vmax.f32 %v1509_v57, 0.0 }
 0x178   :  { %v6551_v1 = vmax.f32 %v823_v45, %v1616_v59  ;;  %v1619_v4 = vmax.f32 %v1586_v46, 0.0 }
 0x179   :  { %v6553_v12 = vmax.f32 %v825_v54, %v1618_v56  ;;  %v6555_v16 = vmax.f32 %v824_v60, %v1617_v6 }
 0x17a   :  { %v6557_v8 = vmax.f32 %v826_v62, %v1619_v4 }
 0x182   :  { %v1863_v7 = vpop.f32.mrb[32].mxu0 }
 0x183   :  { %v1864_v17 = vadd.f32 %v1863_v7, %v6379_v11  ;;  %v1940_v24 = vpop.f32.mrb[32].mxu1  ;;  %v1865_v13 = vpop.f32.mrb[33].mxu0 }
 0x184   :  { %v1941_v31 = vadd.f32 %v1940_v24, %v6379_v11  ;;  %v1866_v32 = vadd.f32 %v1865_v13, %v6379_v11  ;;  %v1942_v14 = vpop.f32.mrb[33].mxu1 }
 0x185   :  { %v2413_v38 = vmax.f32 %v1864_v17, 0.0  ;;  %v1943_v22 = vadd.f32 %v1942_v14, %v6379_v11 }
 0x186   :  { %v2415_v23 = vmax.f32 %v1941_v31, 0.0  ;;  %v2414_v15 = vmax.f32 %v1866_v32, 0.0  ;;  %v1869_v26 = vpop.f32.mrb[34].mxu0 }
 0x187   :  { %v6564_v28 = vmax.f32 %v6419_v48, %v2413_v38  ;;  %v2416_v29 = vmax.f32 %v1943_v22, 0.0  ;;  %v1870_v35 = vadd.f32 %v1869_v26, %v6400_v25  ;;  %v1946_v47 = vpop.f32.mrb[34].mxu1  ;;  %v1871_v30 = vpop.f32.mrb[35].mxu0 }
 0x188   :  { %v6568_v37 = vmax.f32 %v6422_v63, %v2415_v23  ;;  %v6571_v9 = vmax.f32 %v6424_v61, %v2414_v15  ;;  %v1947_v57 = vadd.f32 %v1946_v47, %v6400_v25  ;;  %v1872_v42 = vadd.f32 %v1871_v30, %v6400_v25  ;;  %v1948_v45 = vpop.f32.mrb[35].mxu1 }
 0x189   :  { %v6576_v59 = vmax.f32 %v6428_v5, %v2416_v29  ;;  %v2429_v48 = vmax.f32 %v1870_v35, 0.0  ;;  %v1949_v46 = vadd.f32 %v1948_v45, %v6400_v25 }
 0x18a   :  { %v2431_v54 = vmax.f32 %v1947_v57, 0.0  ;;  %v2430_v60 = vmax.f32 %v1872_v42, 0.0 }
 0x18b   :  { %v6580_v56 = vmax.f32 %v6431_v50, %v2429_v48  ;;  %v2432_v63 = vmax.f32 %v1949_v46, 0.0 }
 0x18c   :  { %v6583_v61 = vmax.f32 %v6433_v27, %v2431_v54  ;;  %v6586_v6 = vmax.f32 %v6435_v0, %v2430_v60 }
 0x18d   :  { %v6589_v62 = vmax.f32 %v6437_v34, %v2432_v63 }
 0x195   :  { %v2017_v5 = vpop.f32.mrb[36].mxu0 }
 0x196   :  { %v2018_v4 = vadd.f32 %v2017_v5, %v6379_v11  ;;  %v2094_v7 = vpop.f32.mrb[36].mxu1  ;;  %v2019_v17 = vpop.f32.mrb[37].mxu0 }
 0x197   :  { %v2095_v24 = vadd.f32 %v2094_v7, %v6379_v11  ;;  %v2020_v50 = vadd.f32 %v2019_v17, %v6379_v11  ;;  %v2096_v13 = vpop.f32.mrb[37].mxu1 }
 0x198   :  { %v2417_v31 = vmax.f32 %v2018_v4, 0.0  ;;  %v2097_v27 = vadd.f32 %v2096_v13, %v6379_v11 }
 0x199   :  { %v2419_v32 = vmax.f32 %v2095_v24, 0.0  ;;  %v2418_v14 = vmax.f32 %v2020_v50, 0.0  ;;  %v2023_v0 = vpop.f32.mrb[38].mxu0 }
 0x19a   :  { %v6596_v38 = vmax.f32 %v6459_v10, %v2417_v31  ;;  %v2420_v34 = vmax.f32 %v2097_v27, 0.0  ;;  %v2024_v22 = vadd.f32 %v2023_v0, %v6400_v25  ;;  %v2100_v23 = vpop.f32.mrb[38].mxu1  ;;  %v2025_v15 = vpop.f32.mrb[39].mxu0 }
 0x19b   :  { %v6600_v26 = vmax.f32 %v6462_v18, %v2419_v32  ;;  %v6603_v29 = vmax.f32 %v6464_v20, %v2418_v14  ;;  %v2101_v35 = vadd.f32 %v2100_v23, %v6400_v25  ;;  %v2026_v47 = vadd.f32 %v2025_v15, %v6400_v25  ;;  %v2102_v30 = vpop.f32.mrb[39].mxu1 }
 0x19c   :  { %v6608_v57 = vmax.f32 %v6468_v43, %v2420_v34  ;;  %v2433_v10 = vmax.f32 %v2024_v22, 0.0  ;;  %v2103_v42 = vadd.f32 %v2102_v30, %v6400_v25 }
 0x19d   :  { %v2435_v45 = vmax.f32 %v2101_v35, 0.0  ;;  %v2434_v48 = vmax.f32 %v2026_v47, 0.0 }
 0x19e   :  { %v6612_v46 = vmax.f32 %v6471_v3, %v2433_v10  ;;  %v2436_v18 = vmax.f32 %v2103_v42, 0.0 }
 0x19f   :  { %v6615_v20 = vmax.f32 %v6473_v39, %v2435_v45  ;;  %v6618_v54 = vmax.f32 %v6475_v40, %v2434_v48 }
 0x1a0   :  { %v6621_v60 = vmax.f32 %v6477_v41, %v2436_v18 }
 0x1a8   :  { %v2171_v43 = vpop.f32.mrb[40].mxu0 }
 0x1a9   :  { %v2172_v63 = vadd.f32 %v2171_v43, %v6379_v11  ;;  %v2248_v5 = vpop.f32.mrb[40].mxu1  ;;  %v2173_v4 = vpop.f32.mrb[41].mxu0 }
 0x1aa   :  { %v2249_v7 = vadd.f32 %v2248_v5, %v6379_v11  ;;  %v2174_v3 = vadd.f32 %v2173_v4, %v6379_v11  ;;  %v2250_v17 = vpop.f32.mrb[41].mxu1 }
 0x1ab   :  { %v2421_v24 = vmax.f32 %v2172_v63, 0.0  ;;  %v2251_v39 = vadd.f32 %v2250_v17, %v6379_v11 }
 0x1ac   :  { %v2423_v50 = vmax.f32 %v2249_v7, 0.0  ;;  %v2422_v13 = vmax.f32 %v2174_v3, 0.0  ;;  %v2177_v40 = vpop.f32.mrb[42].mxu0 }
 0x1ad   :  { %v6628_v31 = vmax.f32 %v6499_v21, %v2421_v24  ;;  %v2424_v41 = vmax.f32 %v2251_v39, 0.0  ;;  %v2178_v27 = vadd.f32 %v2177_v40, %v6400_v25  ;;  %v2254_v32 = vpop.f32.mrb[42].mxu1  ;;  %v2179_v14 = vpop.f32.mrb[43].mxu0 }
 0x1ae   :  { %v6632_v0 = vmax.f32 %v6502_v49, %v2423_v50  ;;  %v6635_v34 = vmax.f32 %v6504_v55, %v2422_v13  ;;  %v2255_v22 = vadd.f32 %v2254_v32, %v6400_v25  ;;  %v2180_v23 = vadd.f32 %v2179_v14, %v6400_v25  ;;  %v2256_v15 = vpop.f32.mrb[43].mxu1 }
 0x1af   :  { %v6640_v35 = vmax.f32 %v6508_v36, %v2424_v41  ;;  %v2437_v21 = vmax.f32 %v2178_v27, 0.0  ;;  %v2257_v47 = vadd.f32 %v2256_v15, %v6400_v25 }
 0x1b0   :  { %v2439_v30 = vmax.f32 %v2255_v22, 0.0  ;;  %v2438_v10 = vmax.f32 %v2180_v23, 0.0 }
 0x1b1   :  { %v6644_v42 = vmax.f32 %v6511_v52, %v2437_v21  ;;  %v2440_v49 = vmax.f32 %v2257_v47, 0.0 }
 0x1b2   :  { %v6647_v55 = vmax.f32 %v6513_v58, %v2439_v30  ;;  %v6650_v45 = vmax.f32 %v6515_v33, %v2438_v10 }
 0x1b3   :  { %v6653_v48 = vmax.f32 %v6517_v53, %v2440_v49 }
 0x1bb   :  { %v2325_v36 = vpop.f32.mrb[44].mxu0 }
 0x1bc   :  { %v2326_v18 = vadd.f32 %v2325_v36, %v6379_v11  ;;  %v2402_v43 = vpop.f32.mrb[44].mxu1  ;;  %v2327_v63 = vpop.f32.mrb[45].mxu0 }
 0x1bd   :  { %v2403_v5 = vadd.f32 %v2402_v43, %v6379_v11  ;;  %v2328_v52 = vadd.f32 %v2327_v63, %v6379_v11  ;;  %v2404_v4 = vpop.f32.mrb[45].mxu1 }
 0x1be   :  { %v2425_v7 = vmax.f32 %v2326_v18, 0.0  ;;  %v2405_v58 = vadd.f32 %v2404_v4, %v6379_v11 }
 0x1bf   :  { %v2427_v3 = vmax.f32 %v2403_v5, 0.0  ;;  %v2426_v17 = vmax.f32 %v2328_v52, 0.0  ;;  %v2331_v33 = vpop.f32.mrb[46].mxu0 }
 0x1c0   :  { %v6660_v24 = vmax.f32 %v6539_v2, %v2425_v7  ;;  %v2428_v53 = vmax.f32 %v2405_v58, 0.0  ;;  %v2332_v39 = vadd.f32 %v2331_v33, %v6400_v25  ;;  %v2408_v50 = vpop.f32.mrb[46].mxu1  ;;  %v2333_v13 = vpop.f32.mrb[47].mxu0 }
 0x1c1   :  { %v6664_v40 = vmax.f32 %v6542_v19, %v2427_v3  ;;  %v6667_v41 = vmax.f32 %v6544_v44, %v2426_v17  ;;  %v2409_v27 = vadd.f32 %v2408_v50, %v6400_v25  ;;  %v2334_v32 = vadd.f32 %v2333_v13, %v6400_v25  ;;  %v2410_v14 = vpop.f32.mrb[47].mxu1 }
 0x1c2   :  { %v6672_v22 = vmax.f32 %v6548_v51, %v2428_v53  ;;  %v2441_v2 = vmax.f32 %v2332_v39, 0.0  ;;  %v2411_v23 = vadd.f32 %v2410_v14, %v6400_v25 }
 0x1c3   :  { %v2443_v15 = vmax.f32 %v2409_v27, 0.0  ;;  %v2442_v21 = vmax.f32 %v2334_v32, 0.0 }
 0x1c4   :  { %v6676_v47 = vmax.f32 %v6551_v1, %v2441_v2  ;;  %v2444_v19 = vmax.f32 %v2411_v23, 0.0 }
 0x1c5   :  { %v6679_v44 = vmax.f32 %v6553_v12, %v2443_v15  ;;  %v6682_v30 = vmax.f32 %v6555_v16, %v2442_v21 }
 0x1c6   :  { %v6685_v10 = vmax.f32 %v6557_v8, %v2444_v19 }
 0x1ce   :  { %v2688_v51 = vpop.f32.mrb[48].mxu0 }
 0x1cf   :  { %v2689_v49 = vadd.f32 %v2688_v51, %v6379_v11  ;;  %v2765_v36 = vpop.f32.mrb[48].mxu1  ;;  %v2690_v18 = vpop.f32.mrb[49].mxu0 }
 0x1d0   :  { %v2766_v43 = vadd.f32 %v2765_v36, %v6379_v11  ;;  %v2691_v1 = vadd.f32 %v2690_v18, %v6379_v11  ;;  %v2767_v63 = vpop.f32.mrb[49].mxu1 }
 0x1d1   :  { %v3238_v5 = vmax.f32 %v2689_v49, 0.0  ;;  %v2768_v12 = vadd.f32 %v2767_v63, %v6379_v11 }
 0x1d2   :  { %v3240_v52 = vmax.f32 %v2766_v43, 0.0  ;;  %v3239_v4 = vmax.f32 %v2691_v1, 0.0  ;;  %v2694_v16 = vpop.f32.mrb[50].mxu0 }
 0x1d3   :  { %v3270_v7 = vmax.f32 %v6564_v28, %v3238_v5  ;;  %v3241_v8 = vmax.f32 %v2768_v12, 0.0  ;;  %v2695_v58 = vadd.f32 %v2694_v16, %v6400_v25  ;;  %v2771_v3 = vpop.f32.mrb[50].mxu1  ;;  %v2696_v17 = vpop.f32.mrb[51].mxu0 }
 0x1d4   :  { %v3272_v33 = vmax.f32 %v6568_v37, %v3240_v52  ;;  %v3271_v53 = vmax.f32 %v6571_v9, %v3239_v4  ;;  %v2772_v39 = vadd.f32 %v2771_v3, %v6400_v25  ;;  %v2697_v50 = vadd.f32 %v2696_v17, %v6400_v25  ;;  %v2773_v13 = vpop.f32.mrb[51].mxu1 }
 0x1d5   :  { %3302 = vst [vmem:[%s6850_s3] sm:$0xff] %v3270_v7  ;;  %v3273_v28 = vmax.f32 %v6576_v59, %v3241_v8  ;;  %v3254_v27 = vmax.f32 %v2695_v58, 0.0  ;;  %v2774_v32 = vadd.f32 %v2773_v13, %v6400_v25 }
 0x1d6   :  { %3304 = vst [vmem:[%s6850_s3 + $0x10] sm:$0xff] %v3272_v33  ;;  %3303 = vst [vmem:[%s6850_s3 + $0x8] sm:$0xff] %v3271_v53  ;;  %v3256_v37 = vmax.f32 %v2772_v39, 0.0  ;;  %v3255_v9 = vmax.f32 %v2697_v50, 0.0 }
 0x1d7   :  { %3305 = vst [vmem:[%s6850_s3 + $0x18] sm:$0xff] %v3273_v28  ;;  %v3286_v14 = vmax.f32 %v6580_v56, %v3254_v27  ;;  %v3257_v59 = vmax.f32 %v2774_v32, 0.0 }
 0x1d8   :  { %v3288_v2 = vmax.f32 %v6583_v61, %v3256_v37  ;;  %v3287_v23 = vmax.f32 %v6586_v6, %v3255_v9 }
 0x1d9   :  { %3318 = vst [vmem:[%s6850_s3 + $0x80] sm:$0xff] %v3286_v14  ;;  %v3289_v15 = vmax.f32 %v6589_v62, %v3257_v59 }
 0x1da   :  { %3320 = vst [vmem:[%s6850_s3 + $0x90] sm:$0xff] %v3288_v2  ;;  %3319 = vst [vmem:[%s6850_s3 + $0x88] sm:$0xff] %v3287_v23 }
 0x1db   :  { %3321 = vst [vmem:[%s6850_s3 + $0x98] sm:$0xff] %v3289_v15 }
 0x1e1   :  { %v2842_v56 = vpop.f32.mrb[52].mxu0 }
 0x1e2   :  { %v2843_v61 = vadd.f32 %v2842_v56, %v6379_v11  ;;  %v2919_v6 = vpop.f32.mrb[52].mxu1  ;;  %v2844_v21 = vpop.f32.mrb[53].mxu0 }
 0x1e3   :  { %v2920_v19 = vadd.f32 %v2919_v6, %v6379_v11  ;;  %v2845_v62 = vadd.f32 %v2844_v21, %v6379_v11  ;;  %v2921_v51 = vpop.f32.mrb[53].mxu1 }
 0x1e4   :  { %v3242_v49 = vmax.f32 %v2843_v61, 0.0  ;;  %v2922_v36 = vadd.f32 %v2921_v51, %v6379_v11 }
 0x1e5   :  { %v3244_v18 = vmax.f32 %v2920_v19, 0.0  ;;  %v3243_v43 = vmax.f32 %v2845_v62, 0.0  ;;  %v2848_v1 = vpop.f32.mrb[54].mxu0 }
 0x1e6   :  { %v3274_v63 = vmax.f32 %v6596_v38, %v3242_v49  ;;  %v3245_v5 = vmax.f32 %v2922_v36, 0.0  ;;  %v2849_v12 = vadd.f32 %v2848_v1, %v6400_v25  ;;  %v2925_v52 = vpop.f32.mrb[54].mxu1  ;;  %v2850_v4 = vpop.f32.mrb[55].mxu0 }
 0x1e7   :  { %v3276_v16 = vmax.f32 %v6600_v26, %v3244_v18  ;;  %v3275_v7 = vmax.f32 %v6603_v29, %v3243_v43  ;;  %v2926_v8 = vadd.f32 %v2925_v52, %v6400_v25  ;;  %v2851_v58 = vadd.f32 %v2850_v4, %v6400_v25  ;;  %v2927_v3 = vpop.f32.mrb[55].mxu1 }
 0x1e8   :  { %3306 = vst [vmem:[%s6850_s3 + $0x20] sm:$0xff] %v3274_v63  ;;  %v3277_v38 = vmax.f32 %v6608_v57, %v3245_v5  ;;  %v3258_v17 = vmax.f32 %v2849_v12, 0.0  ;;  %v2928_v33 = vadd.f32 %v2927_v3, %v6400_v25 }
 0x1e9   :  { %3308 = vst [vmem:[%s6850_s3 + $0x30] sm:$0xff] %v3276_v16  ;;  %3307 = vst [vmem:[%s6850_s3 + $0x28] sm:$0xff] %v3275_v7  ;;  %v3260_v26 = vmax.f32 %v2926_v8, 0.0  ;;  %v3259_v29 = vmax.f32 %v2851_v58, 0.0 }
 0x1ea   :  { %3309 = vst [vmem:[%s6850_s3 + $0x38] sm:$0xff] %v3277_v38  ;;  %v3290_v53 = vmax.f32 %v6612_v46, %v3258_v17  ;;  %v3261_v57 = vmax.f32 %v2928_v33, 0.0 }
 0x1eb   :  { %v3292_v39 = vmax.f32 %v6615_v20, %v3260_v26  ;;  %v3291_v50 = vmax.f32 %v6618_v54, %v3259_v29 }
 0x1ec   :  { %3322 = vst [vmem:[%s6850_s3 + $0xa0] sm:$0xff] %v3290_v53  ;;  %v3293_v13 = vmax.f32 %v6621_v60, %v3261_v57 }
 0x1ed   :  { %3324 = vst [vmem:[%s6850_s3 + $0xb0] sm:$0xff] %v3292_v39  ;;  %3323 = vst [vmem:[%s6850_s3 + $0xa8] sm:$0xff] %v3291_v50 }
 0x1ee   :  { %3325 = vst [vmem:[%s6850_s3 + $0xb8] sm:$0xff] %v3293_v13 }
 0x1f4   :  { %v2996_v46 = vpop.f32.mrb[56].mxu0 }
 0x1f5   :  { %v2997_v20 = vadd.f32 %v2996_v46, %v6379_v11  ;;  %v3073_v54 = vpop.f32.mrb[56].mxu1  ;;  %v2998_v28 = vpop.f32.mrb[57].mxu0 }
 0x1f6   :  { %v3074_v27 = vadd.f32 %v3073_v54, %v6379_v11  ;;  %v2999_v60 = vadd.f32 %v2998_v28, %v6379_v11  ;;  %v3075_v32 = vpop.f32.mrb[57].mxu1 }
 0x1f7   :  { %v3246_v37 = vmax.f32 %v2997_v20, 0.0  ;;  %v3076_v9 = vadd.f32 %v3075_v32, %v6379_v11 }
 0x1f8   :  { %v3248_v14 = vmax.f32 %v3074_v27, 0.0  ;;  %v3247_v59 = vmax.f32 %v2999_v60, 0.0  ;;  %v3002_v2 = vpop.f32.mrb[58].mxu0 }
 0x1f9   :  { %v3278_v23 = vmax.f32 %v6628_v31, %v3246_v37  ;;  %v3249_v15 = vmax.f32 %v3076_v9, 0.0  ;;  %v3003_v56 = vadd.f32 %v3002_v2, %v6400_v25  ;;  %v3079_v61 = vpop.f32.mrb[58].mxu1  ;;  %v3004_v6 = vpop.f32.mrb[59].mxu0 }
 0x1fa   :  { %v3280_v21 = vmax.f32 %v6632_v0, %v3248_v14  ;;  %v3279_v19 = vmax.f32 %v6635_v34, %v3247_v59  ;;  %v3080_v62 = vadd.f32 %v3079_v61, %v6400_v25  ;;  %v3005_v51 = vadd.f32 %v3004_v6, %v6400_v25  ;;  %v3081_v49 = vpop.f32.mrb[59].mxu1 }
 0x1fb   :  { %3310 = vst [vmem:[%s6850_s3 + $0x40] sm:$0xff] %v3278_v23  ;;  %v3281_v31 = vmax.f32 %v6640_v35, %v3249_v15  ;;  %v3262_v36 = vmax.f32 %v3003_v56, 0.0  ;;  %v3082_v18 = vadd.f32 %v3081_v49, %v6400_v25 }
 0x1fc   :  { %3312 = vst [vmem:[%s6850_s3 + $0x50] sm:$0xff] %v3280_v21  ;;  %3311 = vst [vmem:[%s6850_s3 + $0x48] sm:$0xff] %v3279_v19  ;;  %v3264_v0 = vmax.f32 %v3080_v62, 0.0  ;;  %v3263_v34 = vmax.f32 %v3005_v51, 0.0 }
 0x1fd   :  { %3313 = vst [vmem:[%s6850_s3 + $0x58] sm:$0xff] %v3281_v31  ;;  %v3294_v43 = vmax.f32 %v6644_v42, %v3262_v36  ;;  %v3265_v35 = vmax.f32 %v3082_v18, 0.0 }
 0x1fe   :  { %v3296_v1 = vmax.f32 %v6647_v55, %v3264_v0  ;;  %v3295_v63 = vmax.f32 %v6650_v45, %v3263_v34 }
 0x1ff   :  { %3326 = vst [vmem:[%s6850_s3 + $0xc0] sm:$0xff] %v3294_v43  ;;  %v3297_v5 = vmax.f32 %v6653_v48, %v3265_v35 }
 0x200   :  { %3328 = vst [vmem:[%s6850_s3 + $0xd0] sm:$0xff] %v3296_v1  ;;  %3327 = vst [vmem:[%s6850_s3 + $0xc8] sm:$0xff] %v3295_v63 }
 0x201   :  { %3329 = vst [vmem:[%s6850_s3 + $0xd8] sm:$0xff] %v3297_v5 }
 0x207   :  { %v3150_v42 = vpop.f32.mrb[60].mxu0 }
 0x208   :  { %v3151_v55 = vadd.f32 %v3150_v42, %v6379_v11  ;;  %v3227_v45 = vpop.f32.mrb[60].mxu1  ;;  %v3152_v12 = vpop.f32.mrb[61].mxu0 }
 0x209   :  { %v3228_v52 = vadd.f32 %v3227_v45, %v6379_v11  ;;  %v3153_v48 = vadd.f32 %v3152_v12, %v6379_v11  ;;  %v3229_v4 = vpop.f32.mrb[61].mxu1 }
 0x20a   :  { %v3250_v16 = vmax.f32 %v3151_v55, 0.0  ;;  %v3230_v7 = vadd.f32 %v3229_v4, %v6379_v11 }
 0x20b   :  { %v3252_v8 = vmax.f32 %v3228_v52, 0.0  ;;  %v3251_v58 = vmax.f32 %v3153_v48, 0.0  ;;  %v3156_v3 = vpop.f32.mrb[62].mxu0 }
 0x20c   :  { %v3282_v38 = vmax.f32 %v6660_v24, %v3250_v16  ;;  %v3253_v17 = vmax.f32 %v3230_v7, 0.0  ;;  %v3157_v33 = vadd.f32 %v3156_v3, %v6400_v25  ;;  %v3233_v26 = vpop.f32.mrb[62].mxu1  ;;  %v3158_v29 = vpop.f32.mrb[63].mxu0 }
 0x20d   :  { %v3284_v53 = vmax.f32 %v6664_v40, %v3252_v8  ;;  %v3283_v57 = vmax.f32 %v6667_v41, %v3251_v58  ;;  %v3234_v39 = vadd.f32 %v3233_v26, %v6400_v25  ;;  %v3159_v50 = vadd.f32 %v3158_v29, %v6400_v25  ;;  %v3235_v13 = vpop.f32.mrb[63].mxu1 }
 0x20e   :  { %3314 = vst [vmem:[%s6850_s3 + $0x60] sm:$0xff] %v3282_v38  ;;  %v3285_v11 = vmax.f32 %v6672_v22, %v3253_v17  ;;  %v3266_v24 = vmax.f32 %v3157_v33, 0.0  ;;  %v3236_v46 = vadd.f32 %v3235_v13, %v6400_v25 }
 0x20f   :  { %3316 = vst [vmem:[%s6850_s3 + $0x70] sm:$0xff] %v3284_v53  ;;  %3315 = vst [vmem:[%s6850_s3 + $0x68] sm:$0xff] %v3283_v57  ;;  %v3268_v40 = vmax.f32 %v3234_v39, 0.0  ;;  %v3267_v41 = vmax.f32 %v3159_v50, 0.0 }
 0x210   :  { %3317 = vst [vmem:[%s6850_s3 + $0x78] sm:$0xff] %v3285_v11  ;;  %v3298_v20 = vmax.f32 %v6676_v47, %v3266_v24  ;;  %v3269_v22 = vmax.f32 %v3236_v46, 0.0 }
 0x211   :  { %v3300_v54 = vmax.f32 %v6679_v44, %v3268_v40  ;;  %v3299_v25 = vmax.f32 %v6682_v30, %v3267_v41 }
 0x212   :  { %3330 = vst [vmem:[%s6850_s3 + $0xe0] sm:$0xff] %v3298_v20  ;;  %v3301_v28 = vmax.f32 %v6685_v10, %v3269_v22 }
 0x213   :  { %3332 = vst [vmem:[%s6850_s3 + $0xf0] sm:$0xff] %v3300_v54  ;;  %3331 = vst [vmem:[%s6850_s3 + $0xe8] sm:$0xff] %v3299_v25 }
 0x214   :  { %3333 = vst [vmem:[%s6850_s3 + $0xf8] sm:$0xff] %v3301_v28 }

// kernel: net_forward.5
= control target key start
LH: loop header
LB: loop body
LE: loop exit
PB: predicated region body
PF: predicated region fallthrough
CT: control target
= control target key end

     0   :  { %vm346_vm0 = vcmask 130048   ;;  %vm918_vm1 = vcmask 1042432   ;;  %vm1333_vm2 = vmmov 1   ;;  %vm911_vm4 = vcmask 613376   ;;  %s2286_s0 = inlined_call_operand.vmem [shape: f32[784,256], index: 0, kind: input, shape index: {}]   ;;  %s2287_s1 = inlined_call_operand.vmem [shape: f32[75,784], index: 1, kind: input, shape index: {}]   ;;  %s2288_s2 = inlined_call_operand.vmem [shape: f32[75,1], index: 2, kind: input, shape index: {}]   ;;  %s2289_s4 = inlined_call_operand.vmem [shape: f32[10,1], index: 4, kind: input, shape index: {}]   ;;  %s2290_s3 = inlined_call_operand.vmem [shape: f32[10,75], index: 3, kind: input, shape index: {}]   ;;  %s2291_s5 = inlined_call_operand.vmem [shape: f32[10,256], index: 5, kind: output, shape index: {}]  }
   0x1   :  { %v155_v0 = vld [vmem:[%s2286_s0 + $0x208] sm:$0xff]  ;;  %v157_v1 = vld [vmem:[%s2286_s0 + $0x218] sm:$0xff]  ;;  %v154_v2 = vld [vmem:[%s2286_s0 + $0x200] sm:$0xff] }
   0x2   :  { %v1092_v3 = vpack.c.bf16 %v157_v1, %v155_v0  ;;  %v156_v4 = vld [vmem:[%s2286_s0 + $0x210] sm:$0xff]  ;;  %v159_v5 = vld [vmem:[%s2286_s0 + $0x228] sm:$0xff]  ;;  %v161_v6 = vld [vmem:[%s2286_s0 + $0x238] sm:$0xff] }
   0x3   :  { %v1094_v7 = vpack.c.bf16 %v156_v4, %v154_v2  ;;  %v1096_v8 = vpack.c.bf16 %v161_v6, %v159_v5  ;;  %v158_v9 = vld [vmem:[%s2286_s0 + $0x220] sm:$0xff]  ;;  %v160_v10 = vld [vmem:[%s2286_s0 + $0x230] sm:$0xff]  ;;  %v163_v11 = vld [vmem:[%s2286_s0 + $0x248] sm:$0xff] }
   0x4   :  { %1093 = vmatprep.subr.bf16.mxu0 %v1092_v3  ;;  %v165_v12 = vld [vmem:[%s2286_s0 + $0x258] sm:$0xff]  ;;  %v1098_v13 = vpack.c.bf16 %v160_v10, %v158_v9  ;;  %v162_v15 = vld [vmem:[%s2286_s0 + $0x240] sm:$0xff]  ;;  %v164_v16 = vld [vmem:[%s2286_s0 + $0x250] sm:$0xff] }
   0x5   :  { %1095 = vmatpush1.bf16.msra.mxu0 %v1094_v7  ;;  %v1100_v14 = vpack.c.bf16 %v165_v12, %v163_v11  ;;  %v167_v17 = vld [vmem:[%s2286_s0 + $0x268] sm:$0xff]  ;;  %v169_v18 = vld [vmem:[%s2286_s0 + $0x278] sm:$0xff]  ;;  %v1102_v19 = vpack.c.bf16 %v164_v16, %v162_v15  ;;  %v166_v20 = vld [vmem:[%s2286_s0 + $0x260] sm:$0xff] }
   0x6   :  { %1097 = vmatprep.subr.bf16.mxu0 %v1096_v8  ;;  %v91_v21 = vld [vmem:[%s2286_s0 + $0x8] sm:$0xff]  ;;  %v1104_v22 = vpack.c.bf16 %v169_v18, %v167_v17  ;;  %v168_v23 = vld [vmem:[%s2286_s0 + $0x270] sm:$0xff]  ;;  %v93_v25 = vld [vmem:[%s2286_s0 + $0x18] sm:$0xff] }
   0x7   :  { %v171_v24 = vld [vmem:[%s2286_s0 + $0x288] sm:$0xff]  ;;  %v173_v26 = vld [vmem:[%s2286_s0 + $0x298] sm:$0xff]  ;;  %v1028_v27 = vpack.c.bf16 %v93_v25, %v91_v21  ;;  %v90_v28 = vld [vmem:[%s2286_s0] sm:$0xff]  ;;  %v1106_v33 = vpack.c.bf16 %v168_v23, %v166_v20 }
   0x8   :  { %v92_v29 = vld [vmem:[%s2286_s0 + $0x10] sm:$0xff]  ;;  %v95_v31 = vld [vmem:[%s2286_s0 + $0x28] sm:$0xff]  ;;  %v97_v32 = vld [vmem:[%s2286_s0 + $0x38] sm:$0xff]  ;;  %v1108_v37 = vpack.c.bf16 %v173_v26, %v171_v24 }
   0x9   :  { %1099 = vmatpush1.bf16.msra.mxu0 %v1098_v13  ;;  %v1030_v30 = vpack.c.bf16 %v92_v29, %v90_v28  ;;  %v170_v34 = vld [vmem:[%s2286_s0 + $0x280] sm:$0xff]  ;;  %1029 = vmatprep.subr.bf16.mxu1 %v1028_v27  ;;  %v1032_v35 = vpack.c.bf16 %v97_v32, %v95_v31  ;;  %v172_v38 = vld [vmem:[%s2286_s0 + $0x290] sm:$0xff]  ;;  %v175_v39 = vld [vmem:[%s2286_s0 + $0x2a8] sm:$0xff] }
   0xa   :  { %1101 = vmatprep.subr.bf16.mxu0 %v1100_v14  ;;  %v94_v36 = vld [vmem:[%s2286_s0 + $0x20] sm:$0xff]  ;;  %v96_v40 = vld [vmem:[%s2286_s0 + $0x30] sm:$0xff]  ;;  %v177_v41 = vld [vmem:[%s2286_s0 + $0x2b8] sm:$0xff]  ;;  %v1110_v48 = vpack.c.bf16 %v172_v38, %v170_v34 }
   0xb   :  { %1031 = vmatpush1.bf16.msra.mxu1 %v1030_v30  ;;  %v1034_v42 = vpack.c.bf16 %v96_v40, %v94_v36  ;;  %v99_v43 = vld [vmem:[%s2286_s0 + $0x48] sm:$0xff]  ;;  %v101_v44 = vld [vmem:[%s2286_s0 + $0x58] sm:$0xff]  ;;  %v98_v46 = vld [vmem:[%s2286_s0 + $0x40] sm:$0xff]  ;;  %v1112_v51 = vpack.c.bf16 %v177_v41, %v175_v39 }
   0xc   :  { %1033 = vmatprep.subr.bf16.mxu1 %v1032_v35  ;;  %v1036_v45 = vpack.c.bf16 %v101_v44, %v99_v43  ;;  %v100_v47 = vld [vmem:[%s2286_s0 + $0x50] sm:$0xff]  ;;  %v174_v49 = vld [vmem:[%s2286_s0 + $0x2a0] sm:$0xff]  ;;  %v103_v50 = vld [vmem:[%s2286_s0 + $0x68] sm:$0xff] }
   0xd   :  { %1103 = vmatpush1.bf16.msra.mxu0 %v1102_v19  ;;  %v176_v52 = vld [vmem:[%s2286_s0 + $0x2b0] sm:$0xff]  ;;  %v179_v53 = vld [vmem:[%s2286_s0 + $0x2c8] sm:$0xff]  ;;  %v1038_v54 = vpack.c.bf16 %v100_v47, %v98_v46  ;;  %v105_v55 = vld [vmem:[%s2286_s0 + $0x78] sm:$0xff] }
   0xe   :  { %1105 = vmatprep.subr.bf16.mxu0 %v1104_v22  ;;  %v181_v56 = vld [vmem:[%s2286_s0 + $0x2d8] sm:$0xff]  ;;  %v1040_v57 = vpack.c.bf16 %v105_v55, %v103_v50  ;;  %v102_v58 = vld [vmem:[%s2286_s0 + $0x60] sm:$0xff]  ;;  %v104_v59 = vld [vmem:[%s2286_s0 + $0x70] sm:$0xff]  ;;  %v1114_v62 = vpack.c.bf16 %v176_v52, %v174_v49 }
   0xf   :  { %1035 = vmatpush1.bf16.msra.mxu1 %v1034_v42  ;;  %v107_v60 = vld [vmem:[%s2286_s0 + $0x88] sm:$0xff]  ;;  %v109_v61 = vld [vmem:[%s2286_s0 + $0x98] sm:$0xff]  ;;  %v1116_v63 = vpack.c.bf16 %v181_v56, %v179_v53  ;;  %v178_v0 = vld [vmem:[%s2286_s0 + $0x2c0] sm:$0xff]  ;;  %v1042_v3 = vpack.c.bf16 %v104_v59, %v102_v58 }
  0x10   :  { %1037 = vmatprep.subr.bf16.mxu1 %v1036_v45  ;;  %v180_v1 = vld [vmem:[%s2286_s0 + $0x2d0] sm:$0xff]  ;;  %v183_v2 = vld [vmem:[%s2286_s0 + $0x2e8] sm:$0xff]  ;;  %v185_v4 = vld [vmem:[%s2286_s0 + $0x2f8] sm:$0xff]  ;;  %v1044_v5 = vpack.c.bf16 %v109_v61, %v107_v60  ;;  %v1331_v60 = vmov 0  }
  0x11   :  { %1107 = vmatpush1.bf16.msra.mxu0 %v1106_v33  ;;  %v106_v6 = vld [vmem:[%s2286_s0 + $0x80] sm:$0xff]  ;;  %v108_v7 = vld [vmem:[%s2286_s0 + $0x90] sm:$0xff]  ;;  %v111_v8 = vld [vmem:[%s2286_s0 + $0xa8] sm:$0xff]  ;;  %v1118_v10 = vpack.c.bf16 %v180_v1, %v178_v0  ;;  %v1120_v11 = vpack.c.bf16 %v185_v4, %v183_v2  ;;  %1329 = vset.pattern.permute.xlu0 %v1331_v60 }
  0x12   :  { %1109 = vmatprep.subr.bf16.mxu0 %v1108_v37  ;;  %v113_v9 = vld [vmem:[%s2286_s0 + $0xb8] sm:$0xff]  ;;  %v182_v12 = vld [vmem:[%s2286_s0 + $0x2e0] sm:$0xff]  ;;  %v184_v13 = vld [vmem:[%s2286_s0 + $0x2f0] sm:$0xff]  ;;  %v1046_v15 = vpack.c.bf16 %v108_v7, %v106_v6  ;;  %1330 = vset.pattern.permute.xlu1 %v1331_v60 }
  0x13   :  { %1039 = vmatpush1.bf16.msra.mxu1 %v1038_v54  ;;  %v187_v14 = vld [vmem:[%s2286_s0 + $0x308] sm:$0xff]  ;;  %v189_v16 = vld [vmem:[%s2286_s0 + $0x318] sm:$0xff]  ;;  %v1048_v17 = vpack.c.bf16 %v113_v9, %v111_v8  ;;  %v110_v18 = vld [vmem:[%s2286_s0 + $0xa0] sm:$0xff]  ;;  %v1122_v22 = vpack.c.bf16 %v184_v13, %v182_v12 }
  0x14   :  { %1041 = vmatprep.subr.bf16.mxu1 %v1040_v57  ;;  %v112_v19 = vld [vmem:[%s2286_s0 + $0xb0] sm:$0xff]  ;;  %v115_v20 = vld [vmem:[%s2286_s0 + $0xc8] sm:$0xff]  ;;  %v117_v21 = vld [vmem:[%s2286_s0 + $0xd8] sm:$0xff]  ;;  %v1124_v23 = vpack.c.bf16 %v189_v16, %v187_v14 }
  0x15   :  { %1111 = vmatpush1.bf16.msra.mxu0 %v1110_v48  ;;  %v186_v24 = vld [vmem:[%s2286_s0 + $0x300] sm:$0xff]  ;;  %v188_v25 = vld [vmem:[%s2286_s0 + $0x310] sm:$0xff]  ;;  %v191_v26 = vld [vmem:[%s2286_s0 + $0x328] sm:$0xff]  ;;  %v1050_v27 = vpack.c.bf16 %v112_v19, %v110_v18  ;;  %v1052_v29 = vpack.c.bf16 %v117_v21, %v115_v20 }
  0x16   :  { %1113 = vmatprep.subr.bf16.mxu0 %v1112_v51  ;;  %v193_v28 = vld [vmem:[%s2286_s0 + $0x338] sm:$0xff]  ;;  %v114_v30 = vld [vmem:[%s2286_s0 + $0xc0] sm:$0xff]  ;;  %v116_v31 = vld [vmem:[%s2286_s0 + $0xd0] sm:$0xff]  ;;  %v1126_v34 = vpack.c.bf16 %v188_v25, %v186_v24 }
  0x17   :  { %1043 = vmatpush1.bf16.msra.mxu1 %v1042_v3  ;;  %v119_v32 = vld [vmem:[%s2286_s0 + $0xe8] sm:$0xff]  ;;  %v121_v33 = vld [vmem:[%s2286_s0 + $0xf8] sm:$0xff]  ;;  %v190_v35 = vld [vmem:[%s2286_s0 + $0x320] sm:$0xff]  ;;  %v1128_v36 = vpack.c.bf16 %v193_v28, %v191_v26  ;;  %v1054_v40 = vpack.c.bf16 %v116_v31, %v114_v30 }
  0x18   :  { %1045 = vmatprep.subr.bf16.mxu1 %v1044_v5  ;;  %v192_v37 = vld [vmem:[%s2286_s0 + $0x330] sm:$0xff]  ;;  %v195_v38 = vld [vmem:[%s2286_s0 + $0x348] sm:$0xff]  ;;  %v197_v39 = vld [vmem:[%s2286_s0 + $0x358] sm:$0xff]  ;;  %v1056_v41 = vpack.c.bf16 %v121_v33, %v119_v32 }
  0x19   :  { %1115 = vmatpush1.bf16.msra.mxu0 %v1114_v62  ;;  %v118_v42 = vld [vmem:[%s2286_s0 + $0xe0] sm:$0xff]  ;;  %v120_v43 = vld [vmem:[%s2286_s0 + $0xf0] sm:$0xff]  ;;  %v23_v44 = vld [vmem:[%s2287_s1 + $0x18] sm:$0xff]  ;;  %v1130_v47 = vpack.c.bf16 %v192_v37, %v190_v35  ;;  %v1132_v48 = vpack.c.bf16 %v197_v39, %v195_v38 }
  0x1a   :  { %1117 = vmatprep.subr.bf16.mxu0 %v1116_v63  ;;  %v123_v45 = vld [vmem:[%s2286_s0 + $0x108] sm:$0xff]  ;;  %v125_v46 = vld [vmem:[%s2286_s0 + $0x118] sm:$0xff]  ;;  %566 = vmatprep.mubr.f32.mxu0 %v23_v44  ;;  %v194_v49 = vld [vmem:[%s2286_s0 + $0x340] sm:$0xff]  ;;  %v1058_v52 = vpack.c.bf16 %v120_v43, %v118_v42 }
  0x1b   :  { %1047 = vmatpush1.bf16.msra.mxu1 %v1046_v15  ;;  %v196_v50 = vld [vmem:[%s2286_s0 + $0x350] sm:$0xff]  ;;  %v199_v51 = vld [vmem:[%s2286_s0 + $0x368] sm:$0xff]  ;;  %v201_v53 = vld [vmem:[%s2286_s0 + $0x378] sm:$0xff]  ;;  %v1060_v54 = vpack.c.bf16 %v125_v46, %v123_v45 }
  0x1c   :  { %1049 = vmatprep.subr.bf16.mxu1 %v1048_v17  ;;  %v122_v55 = vld [vmem:[%s2286_s0 + $0x100] sm:$0xff]  ;;  %v124_v56 = vld [vmem:[%s2286_s0 + $0x110] sm:$0xff]  ;;  %v127_v57 = vld [vmem:[%s2286_s0 + $0x128] sm:$0xff]  ;;  %v1134_v59 = vpack.c.bf16 %v196_v50, %v194_v49  ;;  %v1136_v61 = vpack.c.bf16 %v201_v53, %v199_v51 }
  0x1d   :  { %1119 = vmatpush1.bf16.msra.mxu0 %v1118_v10  ;;  %v129_v58 = vld [vmem:[%s2286_s0 + $0x138] sm:$0xff]  ;;  %v198_v62 = vld [vmem:[%s2286_s0 + $0x360] sm:$0xff]  ;;  %v200_v63 = vld [vmem:[%s2286_s0 + $0x370] sm:$0xff]  ;;  %v1062_v1 = vpack.c.bf16 %v124_v56, %v122_v55 }
  0x1e   :  { %1121 = vmatprep.subr.bf16.mxu0 %v1120_v11  ;;  %v203_v0 = vld [vmem:[%s2286_s0 + $0x388] sm:$0xff]  ;;  %v205_v2 = vld [vmem:[%s2286_s0 + $0x398] sm:$0xff]  ;;  %v1064_v3 = vpack.c.bf16 %v129_v58, %v127_v57  ;;  %v126_v4 = vld [vmem:[%s2286_s0 + $0x120] sm:$0xff]  ;;  %v1138_v8 = vpack.c.bf16 %v200_v63, %v198_v62 }
  0x1f   :  { %1051 = vmatpush1.bf16.msra.mxu1 %v1050_v27  ;;  %v128_v5 = vld [vmem:[%s2286_s0 + $0x130] sm:$0xff]  ;;  %v131_v6 = vld [vmem:[%s2286_s0 + $0x148] sm:$0xff]  ;;  %v133_v7 = vld [vmem:[%s2286_s0 + $0x158] sm:$0xff]  ;;  %v1140_v9 = vpack.c.bf16 %v205_v2, %v203_v0 }
  0x20   :  { %1053 = vmatprep.subr.bf16.mxu1 %v1052_v29  ;;  %v202_v10 = vld [vmem:[%s2286_s0 + $0x380] sm:$0xff]  ;;  %v204_v11 = vld [vmem:[%s2286_s0 + $0x390] sm:$0xff]  ;;  %v207_v12 = vld [vmem:[%s2286_s0 + $0x3a8] sm:$0xff]  ;;  %v1066_v13 = vpack.c.bf16 %v128_v5, %v126_v4  ;;  %v1068_v15 = vpack.c.bf16 %v133_v7, %v131_v6 }
  0x21   :  { %1123 = vmatpush1.bf16.msra.mxu0 %v1122_v22  ;;  %v209_v14 = vld [vmem:[%s2286_s0 + $0x3b8] sm:$0xff]  ;;  %v130_v16 = vld [vmem:[%s2286_s0 + $0x140] sm:$0xff]  ;;  %v132_v17 = vld [vmem:[%s2286_s0 + $0x150] sm:$0xff]  ;;  %v1142_v20 = vpack.c.bf16 %v204_v11, %v202_v10 }
  0x22   :  { %1125 = vmatprep.subr.bf16.mxu0 %v1124_v23  ;;  %v135_v18 = vld [vmem:[%s2286_s0 + $0x168] sm:$0xff]  ;;  %v137_v19 = vld [vmem:[%s2286_s0 + $0x178] sm:$0xff]  ;;  %v1144_v21 = vpack.c.bf16 %v209_v14, %v207_v12  ;;  %v206_v22 = vld [vmem:[%s2286_s0 + $0x3a0] sm:$0xff]  ;;  %v1070_v25 = vpack.c.bf16 %v132_v17, %v130_v16 }
  0x23   :  { %1055 = vmatpush1.bf16.msra.mxu1 %v1054_v40  ;;  %v208_v23 = vld [vmem:[%s2286_s0 + $0x3b0] sm:$0xff]  ;;  %v211_v24 = vld [vmem:[%s2286_s0 + $0x3c8] sm:$0xff]  ;;  %v213_v26 = vld [vmem:[%s2286_s0 + $0x3d8] sm:$0xff]  ;;  %v1072_v27 = vpack.c.bf16 %v137_v19, %v135_v18 }
  0x24   :  { %1057 = vmatprep.subr.bf16.mxu1 %v1056_v41  ;;  %v134_v28 = vld [vmem:[%s2286_s0 + $0x160] sm:$0xff]  ;;  %v136_v29 = vld [vmem:[%s2286_s0 + $0x170] sm:$0xff]  ;;  %v139_v30 = vld [vmem:[%s2286_s0 + $0x188] sm:$0xff]  ;;  %v1146_v33 = vpack.c.bf16 %v208_v23, %v206_v22 }
  0x25   :  { %1127 = vmatpush1.bf16.msra.mxu0 %v1126_v34  ;;  %v141_v31 = vld [vmem:[%s2286_s0 + $0x198] sm:$0xff]  ;;  %v21_v32 = vld [vmem:[%s2287_s1 + $0x8] sm:$0xff]  ;;  %v1148_v34 = vpack.c.bf16 %v213_v26, %v211_v24  ;;  %v210_v35 = vld [vmem:[%s2286_s0 + $0x3c0] sm:$0xff]  ;;  %v1074_v38 = vpack.c.bf16 %v136_v29, %v134_v28 }
  0x26   :  { %1129 = vmatprep.subr.bf16.mxu0 %v1128_v36  ;;  %441 = vmatprep.mubr.f32.mxu1 %v21_v32  ;;  %v212_v36 = vld [vmem:[%s2286_s0 + $0x3d0] sm:$0xff]  ;;  %v215_v37 = vld [vmem:[%s2286_s0 + $0x3e8] sm:$0xff]  ;;  %v217_v39 = vld [vmem:[%s2286_s0 + $0x3f8] sm:$0xff]  ;;  %v1076_v40 = vpack.c.bf16 %v141_v31, %v139_v30 }
  0x27   :  { %1059 = vmatpush1.bf16.msra.mxu1 %v1058_v52  ;;  %v138_v41 = vld [vmem:[%s2286_s0 + $0x180] sm:$0xff]  ;;  %v140_v42 = vld [vmem:[%s2286_s0 + $0x190] sm:$0xff]  ;;  %v143_v43 = vld [vmem:[%s2286_s0 + $0x1a8] sm:$0xff]  ;;  %v1150_v45 = vpack.c.bf16 %v212_v36, %v210_v35  ;;  %v1152_v46 = vpack.c.bf16 %v217_v39, %v215_v37 }
  0x28   :  { %1061 = vmatprep.subr.bf16.mxu1 %v1060_v54  ;;  %v145_v44 = vld [vmem:[%s2286_s0 + $0x1b8] sm:$0xff]  ;;  %v219_v49 = vld [vmem:[%s2286_s0 + $0x408] sm:$0xff]  ;;  %v1078_v50 = vpack.c.bf16 %v140_v42, %v138_v41  ;;  %v142_v53 = vld [vmem:[%s2286_s0 + $0x1a0] sm:$0xff] }
  0x29   :  { %1131 = vmatpush1.bf16.msra.mxu0 %v1130_v47  ;;  %v214_v47 = vld [vmem:[%s2286_s0 + $0x3e0] sm:$0xff]  ;;  %v221_v51 = vld [vmem:[%s2286_s0 + $0x418] sm:$0xff]  ;;  %v1080_v52 = vpack.c.bf16 %v145_v44, %v143_v43  ;;  %v144_v54 = vld [vmem:[%s2286_s0 + $0x1b0] sm:$0xff] }
  0x2a   :  { %1133 = vmatprep.subr.bf16.mxu0 %v1132_v48  ;;  %v216_v48 = vld [vmem:[%s2286_s0 + $0x3f0] sm:$0xff]  ;;  %v147_v55 = vld [vmem:[%s2286_s0 + $0x1c8] sm:$0xff]  ;;  %v149_v56 = vld [vmem:[%s2286_s0 + $0x1d8] sm:$0xff]  ;;  %v1156_v58 = vpack.c.bf16 %v221_v51, %v219_v49  ;;  %v1082_v62 = vpack.c.bf16 %v144_v54, %v142_v53 }
  0x2b   :  { %1063 = vmatpush1.bf16.msra.mxu1 %v1062_v1  ;;  %v1154_v57 = vpack.c.bf16 %v216_v48, %v214_v47  ;;  %v220_v60 = vld [vmem:[%s2286_s0 + $0x410] sm:$0xff]  ;;  %v225_v63 = vld [vmem:[%s2286_s0 + $0x438] sm:$0xff]  ;;  %v1084_v0 = vpack.c.bf16 %v149_v56, %v147_v55  ;;  %v146_v1 = vld [vmem:[%s2286_s0 + $0x1c0] sm:$0xff] }
  0x2c   :  { %1065 = vmatprep.subr.bf16.mxu1 %v1064_v3  ;;  %v148_v2 = vld [vmem:[%s2286_s0 + $0x1d0] sm:$0xff]  ;;  %v151_v3 = vld [vmem:[%s2286_s0 + $0x1e8] sm:$0xff]  ;;  %v153_v4 = vld [vmem:[%s2286_s0 + $0x1f8] sm:$0xff] }
  0x2d   :  { %1135 = vmatpush1.bf16.msra.mxu0 %v1134_v59  ;;  %v218_v59 = vld [vmem:[%s2286_s0 + $0x400] sm:$0xff]  ;;  %v22_v5 = vld [vmem:[%s2287_s1 + $0x10] sm:$0xff]  ;;  %v227_v10 = vld [vmem:[%s2286_s0 + $0x448] sm:$0xff]  ;;  %v1086_v11 = vpack.c.bf16 %v148_v2, %v146_v1  ;;  %v1088_v14 = vpack.c.bf16 %v153_v4, %v151_v3 }
  0x2e   :  { %1137 = vmatprep.subr.bf16.mxu0 %v1136_v61  ;;  %v223_v61 = vld [vmem:[%s2286_s0 + $0x428] sm:$0xff]  ;;  %v1158_v6 = vpack.c.bf16 %v220_v60, %v218_v59  ;;  %v222_v7 = vld [vmem:[%s2286_s0 + $0x420] sm:$0xff]  ;;  %v30_v12 = vld [vmem:[%s2287_s1 + $0x50] sm:$0xff] }
  0x2f   :  { %1067 = vmatpush1.bf16.msra.mxu1 %v1066_v13  ;;  %v229_v13 = vld [vmem:[%s2286_s0 + $0x458] sm:$0xff]  ;;  %v152_v16 = vld [vmem:[%s2286_s0 + $0x1f0] sm:$0xff]  ;;  %v283_v17 = vld [vmem:[%s2286_s0 + $0x608] sm:$0xff] }
  0x30   :  { %1069 = vmatprep.subr.bf16.mxu1 %v1068_v15  ;;  %v150_v15 = vld [vmem:[%s2286_s0 + $0x1e0] sm:$0xff]  ;;  %v285_v18 = vld [vmem:[%s2286_s0 + $0x618] sm:$0xff]  ;;  %v228_v23 = vld [vmem:[%s2286_s0 + $0x450] sm:$0xff] }
  0x31   :  { %1139 = vmatpush1.bf16.msra.mxu0 %v1138_v8  ;;  %v1160_v8 = vpack.c.bf16 %v225_v63, %v223_v61  ;;  %v226_v22 = vld [vmem:[%s2286_s0 + $0x440] sm:$0xff]  ;;  %v1090_v24 = vpack.c.bf16 %v152_v16, %v150_v15  ;;  %v231_v26 = vld [vmem:[%s2286_s0 + $0x468] sm:$0xff]  ;;  %v1220_v28 = vpack.c.bf16 %v285_v18, %v283_v17  ;;  %v284_v30 = vld [vmem:[%s2286_s0 + $0x610] sm:$0xff] }
  0x32   :  { %1141 = vmatprep.subr.bf16.mxu0 %v1140_v9  ;;  %v224_v9 = vld [vmem:[%s2286_s0 + $0x430] sm:$0xff]  ;;  %v282_v29 = vld [vmem:[%s2286_s0 + $0x600] sm:$0xff]  ;;  %v1166_v31 = vpack.c.bf16 %v228_v23, %v226_v22  ;;  %v235_v37 = vld [vmem:[%s2286_s0 + $0x488] sm:$0xff] }
  0x33   :  { %1071 = vmatpush1.bf16.msra.mxu1 %v1070_v25  ;;  %v1162_v19 = vpack.c.bf16 %v224_v9, %v222_v7  ;;  %v37_v25 = vld [vmem:[%s2287_s1 + $0x88] sm:$0xff]  ;;  %v36_v32 = vld [vmem:[%s2287_s1 + $0x80] sm:$0xff]  ;;  %v232_v35 = vld [vmem:[%s2286_s0 + $0x470] sm:$0xff] }
  0x34   :  { %1073 = vmatprep.subr.bf16.mxu1 %v1072_v27  ;;  %v233_v27 = vld [vmem:[%s2286_s0 + $0x478] sm:$0xff]  ;;  %v20_v36 = vld [vmem:[%s2287_s1] sm:$0xff]  ;;  %v239_v48 = vld [vmem:[%s2286_s0 + $0x4a8] sm:$0xff] }
  0x35   :  { %1143 = vmatpush1.bf16.msra.mxu0 %v1142_v20  ;;  %v29_v20 = vld [vmem:[%s2287_s1 + $0x48] sm:$0xff]  ;;  %v28_v39 = vld [vmem:[%s2287_s1 + $0x40] sm:$0xff]  ;;  %v43_v43 = vld [vmem:[%s2287_s1 + $0xb8] sm:$0xff] }
  0x36   :  { %1145 = vmatprep.subr.bf16.mxu0 %v1144_v21  ;;  %v1164_v21 = vpack.c.bf16 %v229_v13, %v227_v10  ;;  %v44_v41 = vld [vmem:[%s2287_s1 + $0xc0] sm:$0xff]  ;;  %v27_v47 = vld [vmem:[%s2287_s1 + $0x38] sm:$0xff]  ;;  %v50_v53 = vld [vmem:[%s2287_s1 + $0xf0] sm:$0xff] }
  0x37   :  { %1075 = vmatpush1.bf16.msra.mxu1 %v1074_v38  ;;  %v237_v38 = vld [vmem:[%s2286_s0 + $0x498] sm:$0xff]  ;;  %v238_v55 = vld [vmem:[%s2286_s0 + $0x4a0] sm:$0xff]  ;;  %v240_v56 = vld [vmem:[%s2286_s0 + $0x4b0] sm:$0xff] }
  0x38   :  { %1077 = vmatprep.subr.bf16.mxu1 %v1076_v40  ;;  %v1222_v40 = vpack.c.bf16 %v284_v30, %v282_v29  ;;  %v1172_v44 = vpack.c.bf16 %v237_v38, %v235_v37  ;;  %v241_v49 = vld [vmem:[%s2286_s0 + $0x4b8] sm:$0xff]  ;;  %v42_v60 = vld [vmem:[%s2287_s1 + $0xb0] sm:$0xff]  ;;  %v57_v63 = vld [vmem:[%s2287_s1 + $0x128] sm:$0xff] }
  0x39   :  { %1147 = vmatpush1.bf16.msra.mxu0 %v1146_v33  ;;  %v1168_v33 = vpack.c.bf16 %v233_v27, %v231_v26  ;;  %v51_v51 = vld [vmem:[%s2287_s1 + $0xf8] sm:$0xff]  ;;  %v1176_v54 = vpack.c.bf16 %v241_v49, %v239_v48  ;;  %v58_v61 = vld [vmem:[%s2287_s1 + $0x130] sm:$0xff]  ;;  %v242_v1 = vld [vmem:[%s2286_s0 + $0x4c0] sm:$0xff] }
  0x3a   :  { %1149 = vmatprep.subr.bf16.mxu0 %v1148_v34  ;;  %v230_v34 = vld [vmem:[%s2286_s0 + $0x460] sm:$0xff]  ;;  %v245_v59 = vld [vmem:[%s2286_s0 + $0x4d8] sm:$0xff]  ;;  %v244_v2 = vld [vmem:[%s2286_s0 + $0x4d0] sm:$0xff] }
  0x3b   :  { %1079 = vmatpush1.bf16.msra.mxu1 %v1078_v50  ;;  %v1170_v42 = vpack.c.bf16 %v232_v35, %v230_v34  ;;  %v35_v50 = vld [vmem:[%s2287_s1 + $0x78] sm:$0xff]  ;;  %v41_v3 = vld [vmem:[%s2287_s1 + $0xa8] sm:$0xff]  ;;  %v246_v9 = vld [vmem:[%s2286_s0 + $0x4e0] sm:$0xff] }
  0x3c   :  { %1081 = vmatprep.subr.bf16.mxu1 %v1080_v52  ;;  %v247_v4 = vld [vmem:[%s2286_s0 + $0x4e8] sm:$0xff]  ;;  %v64_v10 = vld [vmem:[%s2287_s1 + $0x160] sm:$0xff]  ;;  %v248_v13 = vld [vmem:[%s2286_s0 + $0x4f0] sm:$0xff] }
  0x3d   :  { %1151 = vmatpush1.bf16.msra.mxu0 %v1150_v45  ;;  %v234_v45 = vld [vmem:[%s2286_s0 + $0x480] sm:$0xff]  ;;  %v65_v7 = vld [vmem:[%s2287_s1 + $0x168] sm:$0xff]  ;;  %v288_v15 = vld [vmem:[%s2288_s2 + $0x10] sm:$0xff] }
  0x3e   :  { %1153 = vmatprep.subr.bf16.mxu0 %v1152_v46  ;;  %v236_v46 = vld [vmem:[%s2286_s0 + $0x490] sm:$0xff]  ;;  %v251_v16 = vld [vmem:[%s2286_s0 + $0x508] sm:$0xff]  ;;  %v253_v17 = vld [vmem:[%s2286_s0 + $0x518] sm:$0xff]  ;;  %308 = vperm.xlu1 %1330, %v288_v15   ;;  %v1332_v15 = vmov 0.0  }
  0x3f   :  { %1083 = vmatpush1.bf16.msra.mxu1 %v1082_v62  ;;  %v1174_v52 = vpack.c.bf16 %v236_v46, %v234_v45  ;;  %v1178_v62 = vpack.c.bf16 %v240_v56, %v238_v55  ;;  %v56_v18 = vld [vmem:[%s2287_s1 + $0x120] sm:$0xff]  ;;  %v71_v22 = vld [vmem:[%s2287_s1 + $0x198] sm:$0xff]  ;;  %v252_v26 = vld [vmem:[%s2286_s0 + $0x510] sm:$0xff] }
  0x40   :  { %1085 = vmatprep.subr.bf16.mxu1 %v1084_v0  ;;  %v289_v23 = vld [vmem:[%s2288_s2 + $0x18] sm:$0xff]  ;;  %v78_v34 = vld [vmem:[%s2287_s1 + $0x1d0] sm:$0xff]  ;;  %v291_v35 = vld [vmem:[%s2288_s2 + $0x28] sm:$0xff] }
  0x41   :  { %1155 = vmatpush1.bf16.msra.mxu0 %v1154_v57  ;;  %v34_v57 = vld [vmem:[%s2287_s1 + $0x70] sm:$0xff]  ;;  %v55_v27 = vld [vmem:[%s2287_s1 + $0x118] sm:$0xff]  ;;  %v254_v37 = vld [vmem:[%s2286_s0 + $0x520] sm:$0xff] }
  0x42   :  { %1157 = vmatprep.subr.bf16.mxu0 %v1156_v58  ;;  %v243_v58 = vld [vmem:[%s2286_s0 + $0x4c8] sm:$0xff]  ;;  %v257_v29 = vld [vmem:[%s2286_s0 + $0x538] sm:$0xff]  ;;  %313 = vperm.xlu1 %1330, %v289_v23   ;;  %v256_v38 = vld [vmem:[%s2286_s0 + $0x530] sm:$0xff] }
  0x43   :  { %1087 = vmatpush1.bf16.msra.mxu1 %v1086_v11  ;;  %v1180_v0 = vpack.c.bf16 %v245_v59, %v243_v58  ;;  %v286_v11 = vld [vmem:[%s2288_s2] sm:$0xff]  ;;  %v63_v30 = vld [vmem:[%s2287_s1 + $0x158] sm:$0xff]  ;;  %v1194_v45 = vpack.c.bf16 %v256_v38, %v254_v37  ;;  %v85_v46 = vld [vmem:[%s2287_s1 + $0x208] sm:$0x7] }
  0x44   :  { %567 = vmatmul.mubr.f32.vlgmr.msra.gmra.mrb[0].mxu0 %v22_v5  ;;  %1089 = vmatprep.subr.bf16.mxu1 %v1088_v14  ;;  %v249_v5 = vld [vmem:[%s2286_s0 + $0x4f8] sm:$0xff]  ;;  %v48_v14 = vld [vmem:[%s2287_s1 + $0xe0] sm:$0xff]  ;;  %v25_v55 = vld [vmem:[%s2287_s1 + $0x28] sm:$0xff] }
  0x45   :  { %1159 = vmatpush1.bf16.msra.mxu0 %v1158_v6  ;;  %572 = vmatprep.mubr.f32.mxu0 %v30_v12  ;;  %v49_v6 = vld [vmem:[%s2287_s1 + $0xe8] sm:$0xff]  ;;  %v1184_v12 = vpack.c.bf16 %v249_v5, %v247_v4  ;;  %v258_v49 = vld [vmem:[%s2286_s0 + $0x540] sm:$0xff]  ;;  %v39_v37 = vld [vmem:[%s2287_s1 + $0x98] sm:$0xff] }
  0x46   :  { %1161 = vmatprep.subr.bf16.mxu0 %v1160_v8  ;;  %v1182_v8 = vpack.c.bf16 %v244_v2, %v242_v1  ;;  %298 = vperm.xlu0 %1329, %v286_v11   ;;  %v294_v56 = vld [vmem:[%s2288_s2 + $0x40] sm:$0xff]  ;;  %v295_v58 = vld [vmem:[%s2288_s2 + $0x48] sm:$0x7]  ;;  %vm1241_vm3 = vmpackc.low %vm918_vm1, %vm1333_vm2 }
  0x47   :  { %1091 = vmatpush1.bf16.msra.mxu1 %v1090_v24  ;;  %v1188_v24 = vpack.c.bf16 %v253_v17, %v251_v16  ;;  %323 = vperm.xlu1 %1330, %v291_v35   ;;  %v84_v1 = vld [vmem:[%s2287_s1 + $0x200] sm:$0x7]  ;;  %v900_v4 = vld [vmem:[%s2289_s4 + $0x8] sm:$0x3]  ;;  %v26_v16 = vld [vmem:[%s2287_s1 + $0x30] sm:$0xff] }
  0x48   :  { %573 = vmatmul.mubr.f32.gmra.mrb[2].mxu0 %v29_v20  ;;  %1221 = vmatprep.subr.bf16.mxu1 %v1220_v28  ;;  %v287_v20 = vld [vmem:[%s2288_s2 + $0x8] sm:$0xff]  ;;  %v899_v2 = vld [vmem:[%s2289_s4] sm:$0xff]  ;;  %v54_v35 = vld [vmem:[%s2287_s1 + $0x110] sm:$0xff] }
  0x49   :  { %1163 = vmatpush1.bf16.msra.mxu0 %v1162_v19  ;;  %578 = vmatprep.mubr.f32.mxu0 %v37_v25  ;;  %v72_v19 = vld [vmem:[%s2287_s1 + $0x1a0] sm:$0xff]  ;;  %v255_v28 = vld [vmem:[%s2286_s0 + $0x528] sm:$0xff] }
  0x4a   :  { %1165 = vmatprep.subr.bf16.mxu0 %v1164_v21  ;;  %442 = vmatmul.mubr.f32.vlgmr.msra.gmra.mrb[0].mxu1 %v20_v36  ;;  %v1186_v21 = vpack.c.bf16 %v248_v13, %v246_v9  ;;  %v250_v25 = vld [vmem:[%s2286_s0 + $0x500] sm:$0xff]  ;;  %v1192_v36 = vpack.c.bf16 %v257_v29, %v255_v28  ;;  %v271_v9 = vld [vmem:[%s2286_s0 + $0x5a8] sm:$0xff]  ;;  %v280_v29 = vld [vmem:[%s2286_s0 + $0x5f0] sm:$0xff] }
  0x4b   :  { %447 = vmatprep.mubr.f32.mxu1 %v28_v39  ;;  %1223 = vmatpush1.bf16.msra.mxu1 %v1222_v40  ;;  %v62_v39 = vld [vmem:[%s2287_s1 + $0x150] sm:$0xff]  ;;  %v259_v40 = vld [vmem:[%s2286_s0 + $0x548] sm:$0xff]  ;;  %v270_v13 = vld [vmem:[%s2286_s0 + $0x5a0] sm:$0xff] }
  0x4c   :  { %579 = vmatmul.mubr.f32.gmra.mrb[4].mxu0 %v36_v32  ;;  %303 = vperm.xlu0 %1329, %v287_v20   ;;  %v290_v32 = vld [vmem:[%s2288_s2 + $0x20] sm:$0xff]  ;;  %v275_v17 = vld [vmem:[%s2286_s0 + $0x5c8] sm:$0xff] }
  0x4d   :  { %1167 = vmatpush1.bf16.msra.mxu0 %v1166_v31  ;;  %584 = vmatprep.mubr.f32.mxu0 %v44_v41  ;;  %v79_v31 = vld [vmem:[%s2287_s1 + $0x1d8] sm:$0xff]  ;;  %v33_v23 = vld [vmem:[%s2287_s1 + $0x68] sm:$0xff]  ;;  %v278_v28 = vld [vmem:[%s2286_s0 + $0x5e0] sm:$0xff] }
  0x4e   :  { %1169 = vmatprep.subr.bf16.mxu0 %v1168_v33  ;;  %448 = vmatmul.mubr.f32.gmra.mrb[2].mxu1 %v27_v47  ;;  %v1190_v33 = vpack.c.bf16 %v252_v26, %v250_v25  ;;  %v261_v41 = vld [vmem:[%s2286_s0 + $0x558] sm:$0xff]  ;;  %v61_v38 = vld [vmem:[%s2287_s1 + $0x148] sm:$0xff] }
  0x4f   :  { %453 = vmatprep.mubr.f32.mxu1 %v35_v50  ;;  %v293_v47 = vld [vmem:[%s2288_s2 + $0x38] sm:$0xff]  ;;  %v1196_v48 = vpack.c.bf16 %v261_v41, %v259_v40  ;;  %v260_v50 = vld [vmem:[%s2286_s0 + $0x550] sm:$0xff]  ;;  %v68_v41 = vld [vmem:[%s2287_s1 + $0x180] sm:$0xff] }
  0x50   :  { %585 = vmatmul.mubr.f32.gmra.mrb[6].mxu0 %v43_v43  ;;  %318 = vperm.xlu0 %1329, %v290_v32   ;;  %v86_v43 = vld [vmem:[%s2287_s1 + $0x210] sm:$0x7]  ;;  %v281_v25 = vld [vmem:[%s2286_s0 + $0x5f8] sm:$0xff] }
  0x51   :  { %1171 = vmatpush1.bf16.msra.mxu0 %v1170_v42  ;;  %590 = vmatprep.mubr.f32.mxu0 %v51_v51  ;;  %v70_v42 = vld [vmem:[%s2287_s1 + $0x190] sm:$0xff]  ;;  %v69_v51 = vld [vmem:[%s2287_s1 + $0x188] sm:$0xff]  ;;  %v47_v32 = vld [vmem:[%s2287_s1 + $0xd8] sm:$0xff] }
  0x52   :  { %1173 = vmatprep.subr.bf16.mxu0 %v1172_v44  ;;  %454 = vmatmul.mubr.f32.gmra.mrb[4].mxu1 %v34_v57  ;;  %v292_v44 = vld [vmem:[%s2288_s2 + $0x30] sm:$0xff]  ;;  %v1198_v57 = vpack.c.bf16 %v260_v50, %v258_v49  ;;  %v67_v49 = vld [vmem:[%s2287_s1 + $0x178] sm:$0xff]  ;;  %v89_v50 = vld [vmem:[%s2287_s1 + $0x228] sm:$0x7] }
  0x53   :  { %459 = vmatprep.mubr.f32.mxu1 %v42_v60  ;;  %333 = vperm.xlu1 %1330, %v293_v47   ;;  %v262_v60 = vld [vmem:[%s2286_s0 + $0x560] sm:$0xff]  ;;  %v46_v40 = vld [vmem:[%s2287_s1 + $0xd0] sm:$0xff] }
  0x54   :  { %591 = vmatmul.mubr.f32.gmra.mrb[8].mxu0 %v50_v53  ;;  %v265_v53 = vld [vmem:[%s2286_s0 + $0x578] sm:$0xff]  ;;  %328 = vperm.xlu0 %1329, %v292_v44   ;;  %v82_v47 = vld [vmem:[%s2287_s1 + $0x1f0] sm:$0xff] }
  0x55   :  { %1175 = vmatpush1.bf16.msra.mxu0 %v1174_v52  ;;  %596 = vmatprep.mubr.f32.mxu0 %v58_v61  ;;  %v263_v52 = vld [vmem:[%s2286_s0 + $0x568] sm:$0xff]  ;;  %v264_v61 = vld [vmem:[%s2286_s0 + $0x570] sm:$0xff]  ;;  %v75_v44 = vld [vmem:[%s2287_s1 + $0x1b8] sm:$0xff] }
  0x56   :  { %1177 = vmatprep.subr.bf16.mxu0 %v1176_v54  ;;  %460 = vmatmul.mubr.f32.gmra.mrb[6].mxu1 %v41_v3  ;;  %v77_v54 = vld [vmem:[%s2287_s1 + $0x1c8] sm:$0xff]  ;;  %v1200_v59 = vpack.c.bf16 %v265_v53, %v263_v52  ;;  %v1202_v3 = vpack.c.bf16 %v264_v61, %v262_v60  ;;  %v74_v52 = vld [vmem:[%s2287_s1 + $0x1b0] sm:$0xff] }
  0x57   :  { %465 = vmatprep.mubr.f32.mxu1 %v49_v6  ;;  %343 = vperm.xlu1 %1330, %v295_v58   ;;  %v266_v6 = vld [vmem:[%s2286_s0 + $0x580] sm:$0xff]  ;;  %v73_v53 = vld [vmem:[%s2287_s1 + $0x1a8] sm:$0xff] }
  0x58   :  { %597 = vmatmul.mubr.f32.gmra.mrb[10].mxu0 %v57_v63  ;;  %v267_v63 = vld [vmem:[%s2286_s0 + $0x588] sm:$0xff]  ;;  %338 = vperm.xlu0 %1329, %v294_v56   ;;  %v88_v56 = vld [vmem:[%s2287_s1 + $0x220] sm:$0x7] }
  0x59   :  { %1179 = vmatpush1.bf16.msra.mxu0 %v1178_v62  ;;  %602 = vmatprep.mubr.f32.mxu0 %v65_v7  ;;  %v76_v62 = vld [vmem:[%s2287_s1 + $0x1c0] sm:$0xff]  ;;  %v268_v7 = vld [vmem:[%s2286_s0 + $0x590] sm:$0xff] }
  0x5a   :  { %1181 = vmatprep.subr.bf16.mxu0 %v1180_v0  ;;  %466 = vmatmul.mubr.f32.gmra.mrb[8].mxu1 %v48_v14  ;;  %v269_v0 = vld [vmem:[%s2286_s0 + $0x598] sm:$0xff]  ;;  %v1206_v11 = vpack.c.bf16 %v268_v7, %v266_v6  ;;  %v272_v14 = vld [vmem:[%s2286_s0 + $0x5b0] sm:$0xff] }
  0x5b   :  { %471 = vmatprep.mubr.f32.mxu1 %v56_v18  ;;  %v1204_v5 = vpack.c.bf16 %v269_v0, %v267_v63  ;;  %908 = vperm.xlu1 %1330, %v900_v4   ;;  %v277_v18 = vld [vmem:[%s2286_s0 + $0x5d8] sm:$0xff] }
  0x5c   :  { %603 = vmatmul.mubr.f32.gmra.mrb[12].mxu0 %v64_v10  ;;  %v273_v10 = vld [vmem:[%s2286_s0 + $0x5b8] sm:$0xff]  ;;  %903 = vperm.xlu0 %1329, %v899_v2   ;;  %v1212_v20 = vpack.c.bf16 %v277_v18, %v275_v17 }
  0x5d   :  { %1183 = vmatpush1.bf16.msra.mxu0 %v1182_v8  ;;  %608 = vmatprep.mubr.f32.mxu0 %v72_v19  ;;  %v83_v8 = vld [vmem:[%s2287_s1 + $0x1f8] sm:$0x7]  ;;  %v1210_v19 = vpack.c.bf16 %v272_v14, %v270_v13 }
  0x5e   :  { %1185 = vmatprep.subr.bf16.mxu0 %v1184_v12  ;;  %472 = vmatmul.mubr.f32.gmra.mrb[10].mxu1 %v55_v27  ;;  %v1208_v12 = vpack.c.bf16 %v273_v10, %v271_v9 }
  0x5f   :  { %477 = vmatprep.mubr.f32.mxu1 %v63_v30  ;;  %v40_v30 = vld [vmem:[%s2287_s1 + $0xa0] sm:$0xff] }
  0x60   :  { %609 = vmatmul.mubr.f32.gmra.mrb[14].mxu0 %v71_v22  ;;  %v276_v22 = vld [vmem:[%s2286_s0 + $0x5d0] sm:$0xff] }
  0x61   :  { %1187 = vmatpush1.bf16.msra.mxu0 %v1186_v21  ;;  %614 = vmatprep.mubr.f32.mxu0 %v79_v31  ;;  %v274_v21 = vld [vmem:[%s2286_s0 + $0x5c0] sm:$0xff]  ;;  %v1218_v31 = vpack.c.bf16 %v280_v29, %v278_v28 }
  0x62   :  { %1189 = vmatprep.subr.bf16.mxu0 %v1188_v24  ;;  %478 = vmatmul.mubr.f32.gmra.mrb[12].mxu1 %v62_v39  ;;  %v279_v24 = vld [vmem:[%s2286_s0 + $0x5e8] sm:$0xff]  ;;  %v1214_v26 = vpack.c.bf16 %v276_v22, %v274_v21  ;;  %v38_v39 = vld [vmem:[%s2287_s1 + $0x90] sm:$0xff] }
  0x63   :  { %483 = vmatprep.mubr.f32.mxu1 %v70_v42  ;;  %v1216_v27 = vpack.c.bf16 %v281_v25, %v279_v24  ;;  %v45_v42 = vld [vmem:[%s2287_s1 + $0xc8] sm:$0xff] }
  0x64   :  { %615 = vmatmul.mubr.f32.gmra.mrb[16].mxu0 %v78_v34  ;;  %v32_v34 = vld [vmem:[%s2287_s1 + $0x60] sm:$0xff] }
  0x65   :  { %1191 = vmatpush1.bf16.msra.mxu0 %v1190_v33  ;;  %620 = vmatprep.mubr.f32.mxu0 %v86_v43  ;;  %v24_v33 = vld [vmem:[%s2287_s1 + $0x20] sm:$0xff]  ;;  %v53_v43 = vld [vmem:[%s2287_s1 + $0x108] sm:$0xff] }
  0x66   :  { %1193 = vmatprep.subr.bf16.mxu0 %v1192_v36  ;;  %484 = vmatmul.mubr.f32.gmra.mrb[14].mxu1 %v69_v51  ;;  %v31_v36 = vld [vmem:[%s2287_s1 + $0x58] sm:$0xff]  ;;  %v66_v51 = vld [vmem:[%s2287_s1 + $0x170] sm:$0xff] }
  0x67   :  { %489 = vmatprep.mubr.f32.mxu1 %v77_v54  ;;  %v81_v54 = vld [vmem:[%s2287_s1 + $0x1e8] sm:$0xff] }
  0x68   :  { %621 = vmatmul.mubr.f32.gmra.mrb[18].mxu0 %v85_v46  ;;  %v60_v46 = vld [vmem:[%s2287_s1 + $0x140] sm:$0xff] }
  0x69   :  { %1195 = vmatpush1.bf16.msra.mxu0 %v1194_v45  ;;  %691 = vmatprep.mubr.f32.mxu0 %v25_v55  ;;  %v52_v45 = vld [vmem:[%s2287_s1 + $0x100] sm:$0xff] }
  0x6a   :  { %1197 = vmatprep.subr.bf16.mxu0 %v1196_v48  ;;  %490 = vmatmul.mubr.f32.gmra.mrb[16].mxu1 %v76_v62  ;;  %v59_v48 = vld [vmem:[%s2287_s1 + $0x138] sm:$0xff]  ;;  %v80_v55 = vld [vmem:[%s2287_s1 + $0x1e0] sm:$0xff] }
  0x6b   :  { %495 = vmatprep.mubr.f32.mxu1 %v84_v1 }
  0x6d   :  { %1199 = vmatpush1.bf16.msra.mxu0 %v1198_v57  ;;  %v87_v57 = vld [vmem:[%s2287_s1 + $0x218] sm:$0x7] }
  0x6e   :  { %1201 = vmatprep.subr.bf16.mxu0 %v1200_v59  ;;  %496 = vmatmul.mubr.f32.gmra.mrb[18].mxu1 %v83_v8 }
  0x6f   :  { %816 = vmatprep.mubr.f32.mxu1 %v1332_v15 }
  0x71   :  { %1203 = vmatpush1.bf16.msra.mxu0 %v1202_v3 }
  0x72   :  { %1205 = vmatprep.subr.bf16.mxu0 %v1204_v5  ;;  %1014 = vmatmul.mubr.msk.f32.vlgmr.msra.gmra.mrb[20].mxu1 %vm346_vm0, %v26_v16 }
  0x73   :  { %822 = vmatprep.mubr.f32.mxu1 %v1332_v15 }
  0x75   :  { %1207 = vmatpush1.bf16.msra.mxu0 %v1206_v11 }
  0x76   :  { %1209 = vmatprep.subr.bf16.mxu0 %v1208_v12  ;;  %1015 = vmatmul.mubr.msk.f32.gmra.mrb[22].mxu1 %vm346_vm0, %v33_v23 }
  0x77   :  { %828 = vmatprep.mubr.f32.mxu1 %v1332_v15 }
  0x79   :  { %1211 = vmatpush1.bf16.msra.mxu0 %v1210_v19 }
  0x7a   :  { %1213 = vmatprep.subr.bf16.mxu0 %v1212_v20  ;;  %1016 = vmatmul.mubr.msk.f32.gmra.mrb[24].mxu1 %vm346_vm0, %v40_v30 }
  0x7b   :  { %834 = vmatprep.mubr.f32.mxu1 %v1332_v15 }
  0x7d   :  { %1215 = vmatpush1.bf16.msra.mxu0 %v1214_v26 }
  0x7e   :  { %1217 = vmatprep.subr.bf16.mxu0 %v1216_v27  ;;  %1017 = vmatmul.mubr.msk.f32.gmra.mrb[26].mxu1 %vm346_vm0, %v47_v32 }
  0x7f   :  { %840 = vmatprep.mubr.f32.mxu1 %v1332_v15 }
  0x81   :  { %1219 = vmatpush1.bf16.msra.mxu0 %v1218_v31 }
  0x82   :  { %1018 = vmatmul.mubr.msk.f32.gmra.mrb[28].mxu1 %vm346_vm0, %v54_v35 }
  0x83   :  { %846 = vmatprep.mubr.f32.mxu1 %v1332_v15 }
  0x84   :  { %692 = vmatmul.mubr.f32.vlgmr.msra.gmra.mrb[0].mxu0 %v24_v33 }
  0x85   :  { %697 = vmatprep.mubr.f32.mxu0 %v32_v34 }
  0x86   :  { %1019 = vmatmul.mubr.msk.f32.gmra.mrb[30].mxu1 %vm346_vm0, %v61_v38 }
  0x87   :  { %852 = vmatprep.mubr.f32.mxu1 %v1332_v15 }
  0x88   :  { %698 = vmatmul.mubr.f32.gmra.mrb[2].mxu0 %v31_v36 }
  0x89   :  { %703 = vmatprep.mubr.f32.mxu0 %v39_v37 }
  0x8a   :  { %1020 = vmatmul.mubr.msk.f32.gmra.mrb[32].mxu1 %vm346_vm0, %v68_v41 }
  0x8b   :  { %858 = vmatprep.mubr.f32.mxu1 %v1332_v15 }
  0x8c   :  { %704 = vmatmul.mubr.f32.gmra.mrb[4].mxu0 %v38_v39 }
  0x8d   :  { %709 = vmatprep.mubr.f32.mxu0 %v46_v40 }
  0x8e   :  { %1021 = vmatmul.mubr.msk.f32.gmra.mrb[34].mxu1 %vm346_vm0, %v75_v44 }
  0x8f   :  { %864 = vmatprep.mubr.f32.mxu1 %v1332_v15 }
  0x90   :  { %710 = vmatmul.mubr.f32.gmra.mrb[6].mxu0 %v45_v42 }
  0x91   :  { %715 = vmatprep.mubr.f32.mxu0 %v53_v43 }
  0x92   :  { %1022 = vmatmul.mubr.msk.f32.gmra.mrb[36].mxu1 %vm346_vm0, %v82_v47 }
  0x93   :  { %870 = vmatprep.mubr.f32.mxu1 %v1332_v15 }
  0x94   :  { %716 = vmatmul.mubr.f32.gmra.mrb[8].mxu0 %v52_v45 }
  0x95   :  { %721 = vmatprep.mubr.f32.mxu0 %v60_v46 }
  0x96   :  { %1023 = vmatmul.mubr.msk.f32.gmra.mrb[38].mxu1 %vm346_vm0, %v89_v50 }
  0x97   :  { %989 = vmatprep.mubr.f32.mxu1 %v1332_v15 }
  0x98   :  { %722 = vmatmul.mubr.f32.gmra.mrb[10].mxu0 %v59_v48 }
  0x99   :  { %727 = vmatprep.mubr.f32.mxu0 %v67_v49 }
  0x9c   :  { %728 = vmatmul.mubr.f32.gmra.mrb[12].mxu0 %v66_v51 }
  0x9d   :  { %733 = vmatprep.mubr.f32.mxu0 %v74_v52 }
  0xa0   :  { %734 = vmatmul.mubr.f32.gmra.mrb[14].mxu0 %v73_v53 }
  0xa1   :  { %739 = vmatprep.mubr.f32.mxu0 %v81_v54 }
  0xa4   :  { %740 = vmatmul.mubr.f32.gmra.mrb[16].mxu0 %v80_v55 }
  0xa5   :  { %745 = vmatprep.mubr.f32.mxu0 %v88_v56 }
  0xa8   :  { %746 = vmatmul.mubr.f32.gmra.mrb[18].mxu0 %v87_v57 }
  0xbd   :  { %v309_v31 = vpop.permute.xlu1 %308 }
  0xc1   :  { %v314_v47 = vpop.permute.xlu1 %313 }
  0xc5   :  { %v299_v20 = vpop.permute.xlu0 %298 }
  0xcb   :  { %v304_v26 = vpop.permute.xlu0 %303 }
 0x11d   :  { %v443_v58 = vpop.f32.mrb[0].mxu1 }
 0x11e   :  { %v445_v59 = vpop.f32.mrb[1].mxu1  ;;  %v444_v24 = vadd.f32 %v443_v58, %v299_v20 }
 0x11f   :  { %v446_v25 = vadd.f32 %v445_v59, %v299_v20 }
 0x121   :  { %v449_v60 = vpop.f32.mrb[2].mxu1 }
 0x122   :  { %v451_v61 = vpop.f32.mrb[3].mxu1  ;;  %v450_v34 = vadd.f32 %v449_v60, %v304_v26 }
 0x123   :  { %v452_v36 = vadd.f32 %v451_v61, %v304_v26 }
 0x125   :  { %v455_v62 = vpop.f32.mrb[4].mxu1 }
 0x126   :  { %v457_v63 = vpop.f32.mrb[5].mxu1  ;;  %v456_v44 = vadd.f32 %v455_v62, %v309_v31 }
 0x127   :  { %v458_v46 = vadd.f32 %v457_v63, %v309_v31 }
 0x129   :  { %v461_v0 = vpop.f32.mrb[6].mxu1 }
 0x12a   :  { %v463_v1 = vpop.f32.mrb[7].mxu1  ;;  %v462_v59 = vadd.f32 %v461_v0, %v314_v47  ;;  %v324_v0 = vpop.permute.xlu1 %323 }
 0x12b   :  { %v464_v62 = vadd.f32 %v463_v1, %v314_v47 }
 0x12d   :  { %v2219_v2 = vpop.f32.mrb[8].mxu1 }
 0x12e   :  { %v2221_v3 = vpop.f32.mrb[9].mxu1 }
 0x131   :  { %v2223_v4 = vpop.f32.mrb[10].mxu1 }
 0x132   :  { %v2225_v5 = vpop.f32.mrb[11].mxu1 }
 0x135   :  { %v2227_v6 = vpop.f32.mrb[12].mxu1 }
 0x136   :  { %v2229_v7 = vpop.f32.mrb[13].mxu1 }
 0x139   :  { %v2231_v8 = vpop.f32.mrb[14].mxu1 }
 0x13a   :  { %v2233_v9 = vpop.f32.mrb[15].mxu1 }
 0x13d   :  { %v2235_v10 = vpop.f32.mrb[16].mxu1 }
 0x13e   :  { %v2237_v11 = vpop.f32.mrb[17].mxu1 }
 0x141   :  { %v2239_v12 = vpop.f32.mrb[18].mxu1 }
 0x142   :  { %v2241_v13 = vpop.f32.mrb[19].mxu1 }
 0x145   :  { %v818_v14 = vpop.f32.mrb[20].mxu1 }
 0x146   :  { %v820_v16 = vpop.f32.mrb[21].mxu1 }
 0x149   :  { %v824_v17 = vpop.f32.mrb[22].mxu1 }
 0x14a   :  { %v826_v18 = vpop.f32.mrb[23].mxu1 }
 0x14d   :  { %v830_v19 = vpop.f32.mrb[24].mxu1 }
 0x14e   :  { %v832_v21 = vpop.f32.mrb[25].mxu1 }
 0x151   :  { %v836_v22 = vpop.f32.mrb[26].mxu1 }
 0x152   :  { %v838_v23 = vpop.f32.mrb[27].mxu1 }
 0x155   :  { %v842_v30 = vpop.f32.mrb[28].mxu1 }
 0x156   :  { %v844_v33 = vpop.f32.mrb[29].mxu1 }
 0x157   :  { %v693_v27 = vpop.f32.mrb[0].mxu0 }
 0x158   :  { %v1247_v28 = vadd.f32 %v693_v27, %v444_v24  ;;  %v695_v29 = vpop.f32.mrb[1].mxu0 }
 0x159   :  { %v1250_v32 = vadd.f32 %v695_v29, %v446_v25  ;;  %v2243_v41 = vpop.f32.mrb[30].mxu1 }
 0x15a   :  { %v1248_v35 = vadd.f32 %v1247_v28, %v818_v14  ;;  %v2245_v43 = vpop.f32.mrb[31].mxu1  ;;  %v319_v14 = vpop.permute.xlu0 %318 }
 0x15b   :  { %v1251_v37 = vadd.f32 %v1250_v32, %v820_v16  ;;  %v699_v38 = vpop.f32.mrb[2].mxu0  ;;  %v468_v27 = vadd.f32 %v2219_v2, %v319_v14  ;;  %v470_v29 = vadd.f32 %v2221_v3, %v319_v14 }
 0x15c   :  { %v1253_v39 = vadd.f32 %v699_v38, %v450_v34  ;;  %v701_v40 = vpop.f32.mrb[3].mxu0  ;;  %v877_v50 = vmax.f32 %v1248_v35, 0.0 }
 0x15d   :  { %v1256_v42 = vadd.f32 %v701_v40, %v452_v36  ;;  %v2247_v54 = vpop.f32.mrb[32].mxu1  ;;  %v878_v55 = vmax.f32 %v1251_v37, 0.0  ;;  %v474_v40 = vadd.f32 %v2223_v4, %v324_v0 }
 0x15e   :  { %v1254_v45 = vadd.f32 %v1253_v39, %v824_v17  ;;  %v2249_v58 = vpop.f32.mrb[33].mxu1 }
 0x15f   :  { %v1257_v48 = vadd.f32 %v1256_v42, %v826_v18  ;;  %v705_v49 = vpop.f32.mrb[4].mxu0 }
 0x160   :  { %v879_v51 = vmax.f32 %v1254_v45, 0.0  ;;  %v1259_v52 = vadd.f32 %v705_v49, %v456_v44  ;;  %v707_v53 = vpop.f32.mrb[5].mxu0  ;;  %v329_v44 = vpop.permute.xlu0 %328 }
 0x161   :  { %v880_v56 = vmax.f32 %v1257_v48, 0.0  ;;  %v1262_v57 = vadd.f32 %v707_v53, %v458_v46  ;;  %v860_v24 = vpop.f32.mrb[34].mxu1  ;;  %v482_v4 = vadd.f32 %v2229_v7, %v329_v44 }
 0x162   :  { %v1226_v60 = vpack.c.bf16 %v879_v51, %v877_v50  ;;  %v1260_v61 = vadd.f32 %v1259_v52, %v830_v19  ;;  %v862_v26 = vpop.f32.mrb[35].mxu1  ;;  %v480_v51 = vadd.f32 %v2227_v6, %v329_v44 }
 0x163   :  { %v1224_v63 = vpack.c.bf16 %v880_v56, %v878_v55  ;;  %v1263_v16 = vadd.f32 %v1262_v57, %v832_v21  ;;  %v711_v17 = vpop.f32.mrb[6].mxu0 }
 0x164   :  { %v1265_v18 = vadd.f32 %v711_v17, %v462_v59  ;;  %v713_v20 = vpop.f32.mrb[7].mxu0  ;;  %v881_v1 = vmax.f32 %v1260_v61, 0.0 }
 0x165   :  { %v1268_v25 = vadd.f32 %v713_v20, %v464_v62  ;;  %1225 = vmatprep.subr.bf16.mxu1 %v1224_v63  ;;  %v866_v35 = vpop.f32.mrb[36].mxu1  ;;  %v882_v36 = vmax.f32 %v1263_v16, 0.0  ;;  %v339_v63 = vpop.permute.xlu0 %338 }
 0x166   :  { %v1266_v28 = vadd.f32 %v1265_v18, %v836_v22  ;;  %1227 = vmatpush1.bf16.msra.mxu1 %v1226_v60  ;;  %v868_v39 = vpop.f32.mrb[37].mxu1  ;;  %v476_v22 = vadd.f32 %v2225_v5, %v324_v0 }
 0x167   :  { %v1269_v31 = vadd.f32 %v1268_v25, %v838_v23  ;;  %v717_v19 = vpop.f32.mrb[8].mxu0  ;;  %v492_v25 = vadd.f32 %v2235_v10, %v339_v63 }
 0x168   :  { %v883_v32 = vmax.f32 %v1266_v28, 0.0  ;;  %v1271_v34 = vadd.f32 %v717_v19, %v468_v27  ;;  %v719_v21 = vpop.f32.mrb[9].mxu0 }
 0x169   :  { %v884_v37 = vmax.f32 %v1269_v31, 0.0  ;;  %v1274_v38 = vadd.f32 %v719_v21, %v470_v29  ;;  %v872_v48 = vpop.f32.mrb[38].mxu1 }
 0x16a   :  { %v1230_v42 = vpack.c.bf16 %v883_v32, %v881_v1  ;;  %v1272_v2 = vadd.f32 %v1271_v34, %v842_v30  ;;  %v874_v50 = vpop.f32.mrb[39].mxu1  ;;  %v334_v30 = vpop.permute.xlu1 %333 }
 0x16b   :  { %v1228_v3 = vpack.c.bf16 %v884_v37, %v882_v36  ;;  %v1275_v45 = vadd.f32 %v1274_v38, %v844_v33  ;;  %v723_v23 = vpop.f32.mrb[10].mxu0  ;;  %v486_v62 = vadd.f32 %v2231_v8, %v334_v30  ;;  %v494_v8 = vadd.f32 %v2237_v11, %v339_v63 }
 0x16c   :  { %v1277_v46 = vadd.f32 %v723_v23, %v474_v40  ;;  %v725_v47 = vpop.f32.mrb[11].mxu0  ;;  %v885_v55 = vmax.f32 %v1272_v2, 0.0  ;;  %v904_v23 = vpop.permute.xlu0 %903 }
 0x16d   :  { %v1280_v49 = vadd.f32 %v725_v47, %v476_v22  ;;  %1229 = vmatprep.subr.bf16.mxu1 %v1228_v3  ;;  %v886_v59 = vmax.f32 %v1275_v45, 0.0 }
 0x16e   :  { %v1278_v52 = vadd.f32 %v1277_v46, %v2243_v41  ;;  %1231 = vmatpush1.bf16.msra.mxu1 %v1230_v42  ;;  %v488_v41 = vadd.f32 %v2233_v9, %v334_v30  ;;  %v344_v28 = vpop.permute.xlu1 %343 }
 0x16f   :  { %v1281_v5 = vadd.f32 %v1280_v49, %v2245_v43  ;;  %v729_v53 = vpop.f32.mrb[12].mxu0  ;;  %v498_v34 = vadd.f32 %v2239_v12, %v344_v28  ;;  %v500_v10 = vadd.f32 %v2241_v13, %v344_v28  ;;  %v897_v13 = vld [vmem:[%s2290_s3] sm:$0xff] }
 0x170   :  { %v887_v33 = vmax.f32 %v1278_v52, 0.0  ;;  %v1283_v56 = vadd.f32 %v729_v53, %v480_v51  ;;  %v731_v57 = vpop.f32.mrb[13].mxu0 }
 0x171   :  { %v888_v60 = vmax.f32 %v1281_v5, 0.0  ;;  %v1286_v61 = vadd.f32 %v731_v57, %v482_v4 }
 0x172   :  { %v1234_v14 = vpack.c.bf16 %v887_v33, %v885_v55  ;;  %v1284_v6 = vadd.f32 %v1283_v56, %v2247_v54  ;;  %v909_v51 = vpop.permute.xlu1 %908 }
 0x173   :  { %v1232_v7 = vpack.c.bf16 %v888_v60, %v886_v59  ;;  %v1287_v16 = vadd.f32 %v1286_v61, %v2249_v58  ;;  %v735_v43 = vpop.f32.mrb[14].mxu0 }
 0x174   :  { %v1289_v17 = vadd.f32 %v735_v43, %v486_v62  ;;  %v737_v18 = vpop.f32.mrb[15].mxu0  ;;  %v889_v0 = vmax.f32 %v1284_v6, 0.0 }
 0x175   :  { %v1292_v20 = vadd.f32 %v737_v18, %v488_v41  ;;  %1233 = vmatprep.subr.bf16.mxu1 %v1232_v7  ;;  %v890_v1 = vmax.f32 %v1287_v16, 0.0 }
 0x176   :  { %v1290_v27 = vadd.f32 %v1289_v17, %v860_v24  ;;  %1235 = vmatpush1.bf16.msra.mxu1 %v1234_v14 }
 0x177   :  { %v1293_v29 = vadd.f32 %v1292_v20, %v862_v26  ;;  %v741_v54 = vpop.f32.mrb[16].mxu0 }
 0x178   :  { %v891_v9 = vmax.f32 %v1290_v27, 0.0  ;;  %v1295_v31 = vadd.f32 %v741_v54, %v492_v25  ;;  %v743_v19 = vpop.f32.mrb[17].mxu0 }
 0x179   :  { %v892_v58 = vmax.f32 %v1293_v29, 0.0  ;;  %v1298_v32 = vadd.f32 %v743_v19, %v494_v8 }
 0x17a   :  { %v1238_v21 = vpack.c.bf16 %v891_v9, %v889_v0  ;;  %v1296_v36 = vadd.f32 %v1295_v31, %v866_v35 }
 0x17b   :  { %v1236_v24 = vpack.c.bf16 %v892_v58, %v890_v1  ;;  %v1299_v37 = vadd.f32 %v1298_v32, %v868_v39  ;;  %v747_v38 = vpop.f32.mrb[18].mxu0  ;;  %v898_v39 = vld [vmem:[%s2290_s3 + $0x8] sm:$0x3] }
 0x17c   :  { %v1301_v11 = vadd.f32 %v747_v38, %v498_v34  ;;  %v749_v40 = vpop.f32.mrb[19].mxu0  ;;  %v893_v22 = vmax.f32 %v1296_v36, 0.0 }
 0x17d   :  { %v1304_v26 = vadd.f32 %v749_v40, %v500_v10  ;;  %1237 = vmatprep.subr.bf16.mxu1 %v1236_v24  ;;  %v894_v3 = vmax.f32 %v1299_v37, 0.0 }
 0x17e   :  { %v1302_v42 = vadd.f32 %v1301_v11, %v872_v48  ;;  %1239 = vmatpush1.bf16.msra.mxu1 %v1238_v21 }
 0x17f   :  { %v1305_v2 = vadd.f32 %v1304_v26, %v874_v50 }
 0x180   :  { %v895_v44 = vmax.f32 %v1302_v42, 0.0 }
 0x181   :  { %v896_v45 = vmax.f32 %v1305_v2, 0.0 }
 0x182   :  { %v1243_v12 = vpack.c.bf16 %v895_v44, %v893_v22 }
 0x183   :  { %v1240_v35 = vpack.c.bf16 %v896_v45, %v894_v3 }
 0x185   :  { %1242 = vmatprep.subr.msk.bf16.mxu1 %vm1241_vm3, %v1240_v35 }
 0x186   :  { %1245 = vmatpush1.bf16.msk.msra.mxu1 %vm1241_vm3, %v1243_v12 }
 0x189   :  { %1026 = vmatmul.mubr.msk.f32.vlgmr.msra.gmra.mrb[40].mxu1 %vm911_vm4, %v897_v13 }
 0x18a   :  { %995 = vmatprep.mubr.f32.mxu1 %v1332_v15 }
 0x18d   :  { %1027 = vmatmul.mubr.msk.f32.gmra.mrb[42].mxu1 %vm911_vm4, %v898_v39 }
 0x25c   :  { %v991_v46 = vpop.f32.mrb[40].mxu1 }
 0x25d   :  { %v992_v47 = vadd.f32 %v991_v46, %v904_v23  ;;  %v993_v48 = vpop.f32.mrb[41].mxu1 }
 0x25e   :  { %v994_v49 = vadd.f32 %v993_v48, %v904_v23 }
 0x25f   :  { %v1002_v50 = vmax.f32 %v992_v47, 0.0 }
 0x260   :  { %v1003_v52 = vmax.f32 %v994_v49, 0.0  ;;  %v997_v4 = vpop.f32.mrb[42].mxu1 }
 0x261   :  { %1006 = vst [vmem:[%s2291_s5] sm:$0xff] %v1002_v50  ;;  %v998_v30 = vadd.f32 %v997_v4, %v909_v51  ;;  %v999_v15 = vpop.f32.mrb[43].mxu1 }
 0x262   :  { %1007 = vst [vmem:[%s2291_s5 + $0x8] sm:$0xff] %v1003_v52  ;;  %v1000_v5 = vadd.f32 %v999_v15, %v909_v51 }
 0x263   :  { %v1004_v53 = vmax.f32 %v998_v30, 0.0 }
 0x264   :  { %v1005_v55 = vmax.f32 %v1000_v5, 0.0 }
 0x265   :  { %1008 = vst [vmem:[%s2291_s5 + $0x10] sm:$0x3] %v1004_v53 }
 0x266   :  { %1009 = vst [vmem:[%s2291_s5 + $0x18] sm:$0x3] %v1005_v55 }

</bundles_post_ra>
